<compile_context>
chip_gen: v6e
topology: v6e:2x2x1
jax: 0.10.0
libtpu: 0.0.40
codegen_flags: <defaults>
</compile_context>

<pallas_src>
import math
from functools import partial

import jax
import jax.numpy as jnp
from jax import lax
from jax.experimental import pallas as pl
from jax.experimental.pallas import tpu as pltpu


# ----------------------------- in-kernel helpers ----------------------------- #

def _layernorm(x, gamma, beta, eps=1e-5):
    mean = jnp.mean(x, axis=-1, keepdims=True)
    var = jnp.mean((x - mean) ** 2, axis=-1, keepdims=True)
    return gamma * ((x - mean) * lax.rsqrt(var + eps)) + beta


# per-layer parameter order (kernel <-> host contract)
_ORDER = (
    "qkv_w", "qkv_b", "sao_w", "sao_b", "g1", "b1",
    "kv_w", "kv_b", "cq_w", "cq_b", "cao_w", "cao_b", "g2", "b2",
    "fw1", "fb1", "fw2", "fb2", "g3", "b3",
)


# ----------------------------- Pallas kernel -------------------------------- #

def decoder_kernel(mask_ref, x_ref, y_ref, *rest,
                   batch, seq, num_heads, head_dim):
    *p, out_ref, av_buf = rest
    (qkv_w, qkv_b, sao_w, sao_b, g1, b1,
     kv_w, kv_b, cq_w, cq_b, cao_w, cao_b, g2, b2,
     fw1, fb1, fw2, fb2, g3, b3) = p

    l = pl.program_id(0)
    d_model = num_heads * head_dim
    scale = 1.0 / math.sqrt(head_dim)

    # layer 0: seed the resident decoder stream (out_ref is the accumulator
    # across the 'arbitrary' layer axis).
    @pl.when(l == 0)
    def _init():
        out_ref[...] = y_ref[...]

    def attend(q2, k2, v2, o_w, o_b, mask):
        """Multi-head attention over all batches at once (short head loop).

        av_buf[b, h*S + s, :] holds values[b, h, s, :].  The torch reshape
        quirk  vals[b, s', c*hd:(c+1)*hd] = values_flat[b, s'*H + c, :]
        is realized with strided row re-grouping reads (no matmuls)."""
        q3 = (q2 * scale).reshape(batch, seq, d_model)
        k3 = k2.reshape(batch, seq, d_model)
        v3 = v2.reshape(batch, seq, d_model)
        for h in range(num_heads):
            cols = slice(h * head_dim, (h + 1) * head_dim)
            s = jnp.einsum("bsd,btd->bst", q3[..., cols], k3[..., cols],
                           preferred_element_type=jnp.float32)
            if mask is not None:
                s = s + mask
            m = jnp.max(s, axis=-1, keepdims=True)
            e = jnp.exp(s - m)
            a = e / jnp.sum(e, axis=-1, keepdims=True)   # exact softmax
            av_buf[:, h * seq:(h + 1) * seq, :] = jnp.einsum(
                "bst,btd->bsd", a, v3[..., cols],
                preferred_element_type=jnp.float32)
        chunks = [av_buf[:, pl.ds(c, seq, stride=num_heads), :]
                  for c in range(num_heads)]
        vals = jnp.concatenate(chunks, axis=-1).reshape(batch * seq, d_model)
        return (jnp.dot(vals, o_w[...], preferred_element_type=jnp.float32)
                + o_b[...])

    y = out_ref[...]        # [B*S, D] decoder stream (resident across layers)
    x = x_ref[...]          # [B*S, D] encoder output
    # hoist the mask broadcast out of the head loop
    mask = jnp.broadcast_to(mask_ref[...], (batch, seq, seq))

    # ---- masked self-attention + add & LayerNorm ----
    qkv = jnp.dot(y, qkv_w[...], preferred_element_type=jnp.float32) + qkv_b[...]
    sa = attend(qkv[:, :d_model], qkv[:, d_model:2 * d_model],
                qkv[:, 2 * d_model:], sao_w, sao_b, mask)
    y1 = _layernorm(sa + y, g1[...], b1[...])

    # ---- cross-attention (kv from encoder x, q from y1) + add & LayerNorm ----
    kv = jnp.dot(x, kv_w[...], preferred_element_type=jnp.float32) + kv_b[...]
    q = jnp.dot(y1, cq_w[...], preferred_element_type=jnp.float32) + cq_b[...]
    ca = attend(q, kv[:, :d_model], kv[:, d_model:], cao_w, cao_b, None)
    y2 = _layernorm(ca + y1, g2[...], b2[...])

    # ---- position-wise feed forward + add & LayerNorm ----
    h1 = jnp.maximum(
        jnp.dot(y2, fw1[...], preferred_element_type=jnp.float32) + fb1[...], 0.0)
    ffn = jnp.dot(h1, fw2[...], preferred_element_type=jnp.float32) + fb2[...]
    out_ref[...] = _layernorm(ffn + y2, g3[...], b3[...])


# ----------------------------- host-side wrapper ----------------------------- #

def _prep_layer_params(p, num_heads):
    """Torch layout -> kernel layout: fused, head-contiguous Q/K/V columns."""
    D = p["attn_o_w"].shape[0]
    hd = D // num_heads
    qkv_w = p["qkv_w"].reshape(D, num_heads, 3, hd)
    qkv_b = p["qkv_b"].reshape(num_heads, 3, hd)
    kv_w = p["kv_w"].reshape(D, num_heads, 2, hd)
    kv_b = p["kv_b"].reshape(num_heads, 2, hd)

    def fuse_w(w, n):
        return jnp.concatenate([w[:, :, i, :].reshape(D, D) for i in range(n)], axis=1)

    def fuse_b(b, n):
        return jnp.concatenate([b[:, i, :].reshape(1, D) for i in range(n)], axis=1)

    return dict(
        qkv_w=fuse_w(qkv_w, 3), qkv_b=fuse_b(qkv_b, 3),
        sao_w=p["attn_o_w"], sao_b=p["attn_o_b"].reshape(1, D),
        g1=p["g1"].reshape(1, D), b1=p["b1"].reshape(1, D),
        kv_w=fuse_w(kv_w, 2), kv_b=fuse_b(kv_b, 2),
        cq_w=p["q_w"], cq_b=p["q_b"].reshape(1, D),
        cao_w=p["cross_o_w"], cao_b=p["cross_o_b"].reshape(1, D),
        g2=p["g2"].reshape(1, D), b2=p["b2"].reshape(1, D),
        fw1=p["ffn_w1"], fb1=p["ffn_b1"].reshape(1, -1),
        fw2=p["ffn_w2"], fb2=p["ffn_b2"].reshape(1, D),
        g3=p["g3"].reshape(1, D), b3=p["b3"].reshape(1, D),
    )


def decoder_pallas(x, y, mask, layer_params, num_heads):
    B, S, D = y.shape
    L = len(layer_params)
    hd = D // num_heads
    BS = B * S
    F = layer_params[0]["ffn_w1"].shape[1]

    preps = [_prep_layer_params(p, num_heads) for p in layer_params]
    stacked = [jnp.stack([pr[name] for pr in preps], axis=0) for name in _ORDER]

    x2d = x.reshape(BS, D)
    y2d = y.reshape(BS, D)

    in_specs = [
        pl.BlockSpec((S, S), lambda l: (0, 0)),     # mask (layer-invariant)
        pl.BlockSpec((BS, D), lambda l: (0, 0)),    # encoder output x
        pl.BlockSpec((BS, D), lambda l: (0, 0)),    # decoder input y (used at l==0)
    ]
    for arr in stacked:  # per-layer params, stacked on leading layer axis
        in_specs.append(pl.BlockSpec((None,) + arr.shape[1:],
                                     lambda l: (l, 0, 0)))

    # advisory cost estimate for the XLA scheduler
    proj_flops = 2 * BS * D * (3 * D + D + 2 * D + D + D)
    attn_flops = 8 * B * num_heads * S * S * hd
    ffn_flops = 4 * BS * D * F
    flops = L * (proj_flops + attn_flops + ffn_flops)
    transcendentals = L * 2 * B * num_heads * S * S
    bytes_accessed = 4 * (sum(int(a.size) for a in stacked)
                          + mask.size + 2 * x2d.size + 2 * y2d.size)

    kernel = partial(decoder_kernel, batch=B, seq=S,
                     num_heads=num_heads, head_dim=hd)

    out2d = pl.pallas_call(
        kernel,
        out_shape=jax.ShapeDtypeStruct((BS, D), jnp.float32),
        grid=(L,),
        in_specs=in_specs,
        out_specs=pl.BlockSpec((BS, D), lambda l: (0, 0)),
        scratch_shapes=[pltpu.VMEM((B, num_heads * S, hd), jnp.float32)],
        compiler_params=pltpu.CompilerParams(
            dimension_semantics=("arbitrary",),      # layers are sequential
            vmem_limit_bytes=32 * 1024 * 1024),
        cost_estimate=pl.CostEstimate(flops=int(flops),
                                      transcendentals=int(transcendentals),
                                      bytes_accessed=int(bytes_accessed)),
    )(mask, x2d, y2d, *stacked)
    return out2d.reshape(B, S, D)


# ----------------------------- pure-JAX reference ---------------------------- #

def _ref_ln(v, g, b, eps=1e-5):
    mean = v.mean(-1, keepdims=True)
    var = ((v - mean) ** 2).mean(-1, keepdims=True)
    return g * (v - mean) / jnp.sqrt(var + eps) + b


def ref_decoder_layer(x, y, mask, p, num_heads):
    B, S, D = y.shape
    hd = D // num_heads
    # masked self attention
    qkv = y @ p["qkv_w"] + p["qkv_b"]
    qkv = qkv.reshape(B, S, num_heads, 3 * hd).transpose(0, 2, 1, 3)
    q, k, v = jnp.split(qkv, 3, axis=-1)
    s = q @ k.transpose(0, 1, 3, 2) / math.sqrt(hd) + mask
    a = jax.nn.softmax(s, axis=-1)
    vals = (a @ v).reshape(B, S, num_heads * hd)           # torch reshape quirk
    y1 = _ref_ln(vals @ p["attn_o_w"] + p["attn_o_b"] + y, p["g1"], p["b1"])
    # cross attention
    kv = x @ p["kv_w"] + p["kv_b"]
    q = y1 @ p["q_w"] + p["q_b"]
    kv = kv.reshape(B, S, num_heads, 2 * hd).transpose(0, 2, 1, 3)
    q = q.reshape(B, S, num_heads, hd).transpose(0, 2, 1, 3)
    k, v = jnp.split(kv, 2, axis=-1)
    s = q @ k.transpose(0, 1, 3, 2) / math.sqrt(hd)
    a = jax.nn.softmax(s, axis=-1)
    vals = (a @ v).reshape(B, S, num_heads * hd)
    y2 = _ref_ln(vals @ p["cross_o_w"] + p["cross_o_b"] + y1, p["g2"], p["b2"])
    # ffn
    h = jax.nn.relu(y2 @ p["ffn_w1"] + p["ffn_b1"])
    return _ref_ln(h @ p["ffn_w2"] + p["ffn_b2"] + y2, p["g3"], p["b3"])


def ref_decoder(x, y, mask, layer_params, num_heads):
    for p in layer_params:
        y = ref_decoder_layer(x, y, mask, p, num_heads)
    return y


# ----------------------------- param init ------------------------------------ #

def make_layer_params(key, d_model, ffn_hidden):
    keys = jax.random.split(key, 7)

    def lin(k, fan_in, fan_out):
        k1, k2 = jax.random.split(k)
        bound = 1.0 / math.sqrt(fan_in)
        w = jax.random.uniform(k1, (fan_in, fan_out), jnp.float32, -bound, bound)
        b = jax.random.uniform(k2, (fan_out,), jnp.float32, -bound, bound)
        return w, b

    p = {}
    p["qkv_w"], p["qkv_b"] = lin(keys[0], d_model, 3 * d_model)
    p["attn_o_w"], p["attn_o_b"] = lin(keys[1], d_model, d_model)
    p["kv_w"], p["kv_b"] = lin(keys[2], d_model, 2 * d_model)
    p["q_w"], p["q_b"] = lin(keys[3], d_model, d_model)
    p["cross_o_w"], p["cross_o_b"] = lin(keys[4], d_model, d_model)
    p["ffn_w1"], p["ffn_b1"] = lin(keys[5], d_model, ffn_hidden)
    p["ffn_w2"], p["ffn_b2"] = lin(keys[6], ffn_hidden, d_model)
    for i in (1, 2, 3):
        p[f"g{i}"] = jnp.ones((d_model,), jnp.float32)
        p[f"b{i}"] = jnp.zeros((d_model,), jnp.float32)
    return p


# ----------------------------- main ------------------------------------------ #

if __name__ == "__main__":
    B, S, D = 2, 16, 64
    num_heads = 4
    ffn_hidden = 128
    num_layers = 2

    root = jax.random.PRNGKey(0)
    kx, ky, *layer_keys = jax.random.split(root, 2 + num_layers)

    x = jax.random.normal(kx, (B, S, D), jnp.float32)   # encoder output
    y = jax.random.normal(ky, (B, S, D), jnp.float32)   # decoder input
    # causal decoder mask (additive)
    mask = jnp.where(jnp.tril(jnp.ones((S, S), jnp.bool_)), 0.0, -1e9).astype(jnp.float32)

    layer_params = [make_layer_params(k, D, ffn_hidden) for k in layer_keys]

    out = jax.block_until_ready(decoder_pallas(x, y, mask, layer_params, num_heads))
    ref = jax.block_until_ready(ref_decoder(x, y, mask, layer_params, num_heads))

    assert out.shape == (B, S, D)
    err = float(jnp.max(jnp.abs(out - ref)))
    assert jnp.allclose(out, ref, atol=2e-3, rtol=2e-3), f"max abs diff {err}"

    print("KERNEL_OK")
</pallas_src>

<mosaic_0001>
module attributes {stable_mosaic.version = 11 : i64} {
  func.func @decoder_kernel(%arg0: i32, %arg1: memref<16x16xf32, #tpu.memory_space<vmem>>, %arg2: memref<32x64xf32, #tpu.memory_space<vmem>>, %arg3: memref<32x64xf32, #tpu.memory_space<vmem>>, %arg4: memref<1x64x192xf32, #tpu.memory_space<vmem>>, %arg5: memref<1x1x192xf32, #tpu.memory_space<vmem>>, %arg6: memref<1x64x64xf32, #tpu.memory_space<vmem>>, %arg7: memref<1x1x64xf32, #tpu.memory_space<vmem>>, %arg8: memref<1x1x64xf32, #tpu.memory_space<vmem>>, %arg9: memref<1x1x64xf32, #tpu.memory_space<vmem>>, %arg10: memref<1x64x128xf32, #tpu.memory_space<vmem>>, %arg11: memref<1x1x128xf32, #tpu.memory_space<vmem>>, %arg12: memref<1x64x64xf32, #tpu.memory_space<vmem>>, %arg13: memref<1x1x64xf32, #tpu.memory_space<vmem>>, %arg14: memref<1x64x64xf32, #tpu.memory_space<vmem>>, %arg15: memref<1x1x64xf32, #tpu.memory_space<vmem>>, %arg16: memref<1x1x64xf32, #tpu.memory_space<vmem>>, %arg17: memref<1x1x64xf32, #tpu.memory_space<vmem>>, %arg18: memref<1x64x128xf32, #tpu.memory_space<vmem>>, %arg19: memref<1x1x128xf32, #tpu.memory_space<vmem>>, %arg20: memref<1x128x64xf32, #tpu.memory_space<vmem>>, %arg21: memref<1x1x64xf32, #tpu.memory_space<vmem>>, %arg22: memref<1x1x64xf32, #tpu.memory_space<vmem>>, %arg23: memref<1x1x64xf32, #tpu.memory_space<vmem>>, %arg24: memref<32x64xf32, #tpu.memory_space<vmem>>, %arg25: memref<2x64x16xf32, #tpu.memory_space<vmem>>) attributes {dimension_semantics = [#tpu.dimension_semantics<arbitrary>], iteration_bounds = array<i64: 2>, scalar_prefetch = 0 : i64, scratch_operands = 1 : i64, tpu.core_type = #tpu.core_type<tc>, window_params = [{pipeline_mode = #tpu.pipeline_mode<synchronous>, transform_indices = @transform_0, window_bounds = array<i64: 16, 16>}, {pipeline_mode = #tpu.pipeline_mode<synchronous>, transform_indices = @transform_1, window_bounds = array<i64: 32, 64>}, {pipeline_mode = #tpu.pipeline_mode<synchronous>, transform_indices = @transform_2, window_bounds = array<i64: 32, 64>}, {transform_indices = @transform_3, window_bounds = array<i64: 1, 64, 192>}, {transform_indices = @transform_4, window_bounds = array<i64: 1, 1, 192>}, {transform_indices = @transform_5, window_bounds = array<i64: 1, 64, 64>}, {transform_indices = @transform_6, window_bounds = array<i64: 1, 1, 64>}, {transform_indices = @transform_7, window_bounds = array<i64: 1, 1, 64>}, {transform_indices = @transform_8, window_bounds = array<i64: 1, 1, 64>}, {transform_indices = @transform_9, window_bounds = array<i64: 1, 64, 128>}, {transform_indices = @transform_10, window_bounds = array<i64: 1, 1, 128>}, {transform_indices = @transform_11, window_bounds = array<i64: 1, 64, 64>}, {transform_indices = @transform_12, window_bounds = array<i64: 1, 1, 64>}, {transform_indices = @transform_13, window_bounds = array<i64: 1, 64, 64>}, {transform_indices = @transform_14, window_bounds = array<i64: 1, 1, 64>}, {transform_indices = @transform_15, window_bounds = array<i64: 1, 1, 64>}, {transform_indices = @transform_16, window_bounds = array<i64: 1, 1, 64>}, {transform_indices = @transform_17, window_bounds = array<i64: 1, 64, 128>}, {transform_indices = @transform_18, window_bounds = array<i64: 1, 1, 128>}, {transform_indices = @transform_19, window_bounds = array<i64: 1, 128, 64>}, {transform_indices = @transform_20, window_bounds = array<i64: 1, 1, 64>}, {transform_indices = @transform_21, window_bounds = array<i64: 1, 1, 64>}, {transform_indices = @transform_22, window_bounds = array<i64: 1, 1, 64>}, {pipeline_mode = #tpu.pipeline_mode<synchronous>, transform_indices = @transform_23, window_bounds = array<i64: 32, 64>}]} {
    %c0_i32 = arith.constant 0 : i32
    %0 = arith.cmpi eq, %arg0, %c0_i32 : i32
    %1 = arith.extui %0 : i1 to i32
    %c0_i32_0 = arith.constant 0 : i32
    %2 = arith.cmpi ne, %1, %c0_i32_0 : i32
    scf.if %2 {
      %c0_166 = arith.constant 0 : index
      %c0_167 = arith.constant 0 : index
      %292 = vector.load %arg3[%c0_166, %c0_167] : memref<32x64xf32, #tpu.memory_space<vmem>>, vector<32x64xf32>
      %c0_168 = arith.constant 0 : index
      %c0_169 = arith.constant 0 : index
      %293 = vector.load %arg24[%c0_168, %c0_169] : memref<32x64xf32, #tpu.memory_space<vmem>>, vector<32x64xf32>
      tpu.vector_store %arg24[%c0_168, %c0_169], %292 {strides = array<i32>} : memref<32x64xf32, #tpu.memory_space<vmem>>, vector<32x64xf32>,
    } else {
    }
    %c0 = arith.constant 0 : index
    %c0_1 = arith.constant 0 : index
    %3 = vector.load %arg24[%c0, %c0_1] : memref<32x64xf32, #tpu.memory_space<vmem>>, vector<32x64xf32>
    %c0_2 = arith.constant 0 : index
    %c0_3 = arith.constant 0 : index
    %4 = vector.load %arg2[%c0_2, %c0_3] : memref<32x64xf32, #tpu.memory_space<vmem>>, vector<32x64xf32>
    %c0_4 = arith.constant 0 : index
    %c0_5 = arith.constant 0 : index
    %5 = vector.load %arg1[%c0_4, %c0_5] : memref<16x16xf32, #tpu.memory_space<vmem>>, vector<16x16xf32>
    %6 = vector.shape_cast %5 : vector<16x16xf32> to vector<1x16x16xf32>
    %7 = vector.broadcast %6 : vector<1x16x16xf32> to vector<2x16x16xf32>
    %c0_6 = arith.constant 0 : index
    %c0_7 = arith.constant 0 : index
    %c0_8 = arith.constant 0 : index
    %8 = vector.load %arg4[%c0_6, %c0_7, %c0_8] : memref<1x64x192xf32, #tpu.memory_space<vmem>>, vector<1x64x192xf32>
    %9 = vector.shape_cast %8 : vector<1x64x192xf32> to vector<64x192xf32>
    %cst = arith.constant dense<0.000000e+00> : vector<32x192xf32>
    %10 = tpu.matmul %3, %9, %cst {dimension_numbers = #tpu.dot_dimension_numbers<[1], [0], [0], [1], [0, 0, 1, 1], [], []>} : vector<32x64xf32>, vector<64x192xf32>, vector<32x192xf32> -> vector<32x192xf32>
    %c0_9 = arith.constant 0 : index
    %c0_10 = arith.constant 0 : index
    %c0_11 = arith.constant 0 : index
    %11 = vector.load %arg5[%c0_9, %c0_10, %c0_11] : memref<1x1x192xf32, #tpu.memory_space<vmem>>, vector<1x1x192xf32>
    %12 = vector.shape_cast %11 : vector<1x1x192xf32> to vector<1x192xf32>
    %13 = vector.broadcast %12 : vector<1x192xf32> to vector<32x192xf32>
    %14 = arith.addf %10, %13 : vector<32x192xf32>
    %15 = vector.extract_strided_slice %14 {offsets = [0, 0], sizes = [32, 64], strides = [1, 1]} : vector<32x192xf32> to vector<32x64xf32>
    %16 = vector.extract_strided_slice %14 {offsets = [0, 64], sizes = [32, 64], strides = [1, 1]} : vector<32x192xf32> to vector<32x64xf32>
    %17 = vector.extract_strided_slice %14 {offsets = [0, 128], sizes = [32, 64], strides = [1, 1]} : vector<32x192xf32> to vector<32x64xf32>
    %cst_12 = arith.constant 2.500000e-01 : f32
    %18 = vector.broadcast %cst_12 : f32 to vector<32x64xf32>
    %19 = arith.mulf %15, %18 : vector<32x64xf32>
    %20 = vector.shape_cast %19 : vector<32x64xf32> to vector<2x16x64xf32>
    %21 = vector.shape_cast %16 : vector<32x64xf32> to vector<2x16x64xf32>
    %22 = vector.shape_cast %17 : vector<32x64xf32> to vector<2x16x64xf32>
    %23 = vector.extract_strided_slice %20 {offsets = [0, 0, 0], sizes = [2, 16, 16], strides = [1, 1, 1]} : vector<2x16x64xf32> to vector<2x16x16xf32>
    %24 = vector.extract_strided_slice %21 {offsets = [0, 0, 0], sizes = [2, 16, 16], strides = [1, 1, 1]} : vector<2x16x64xf32> to vector<2x16x16xf32>
    "tpu.trace_start"() <{level = 10 : i32, message = "bsd,btd->bst"}> : () -> ()
    %cst_13 = arith.constant dense<0.000000e+00> : vector<2x16x16xf32>
    %25 = tpu.matmul %23, %24, %cst_13 {dimension_numbers = #tpu.dot_dimension_numbers<[2], [2], [1], [1], [0, 0, 0, 1, 1, 1], [0], [0]>} : vector<2x16x16xf32>, vector<2x16x16xf32>, vector<2x16x16xf32> -> vector<2x16x16xf32>
    "tpu.trace_stop"() : () -> ()
    %26 = arith.addf %25, %7 : vector<2x16x16xf32>
    %cst_14 = arith.constant dense<0xFF800000> : vector<2x16xf32>
    %27 = vector.multi_reduction <maximumf>, %26, %cst_14 [2] : vector<2x16x16xf32> to vector<2x16xf32>
    %28 = vector.shape_cast %27 : vector<2x16xf32> to vector<2x16x1xf32>
    %29 = vector.broadcast %28 : vector<2x16x1xf32> to vector<2x16x16xf32>
    %30 = arith.subf %26, %29 : vector<2x16x16xf32>
    %31 = math.exp %30 : vector<2x16x16xf32>
    %cst_15 = arith.constant dense<0.000000e+00> : vector<2x16xf32>
    %32 = vector.multi_reduction <add>, %31, %cst_15 [2] : vector<2x16x16xf32> to vector<2x16xf32>
    %33 = vector.shape_cast %32 : vector<2x16xf32> to vector<2x16x1xf32>
    %34 = vector.broadcast %33 : vector<2x16x1xf32> to vector<2x16x16xf32>
    %35 = arith.divf %31, %34 : vector<2x16x16xf32>
    %36 = vector.extract_strided_slice %22 {offsets = [0, 0, 0], sizes = [2, 16, 16], strides = [1, 1, 1]} : vector<2x16x64xf32> to vector<2x16x16xf32>
    "tpu.trace_start"() <{level = 10 : i32, message = "bst,btd->bsd"}> : () -> ()
    %cst_16 = arith.constant dense<0.000000e+00> : vector<2x16x16xf32>
    %37 = tpu.matmul %35, %36, %cst_16 {dimension_numbers = #tpu.dot_dimension_numbers<[2], [1], [1], [2], [0, 0, 0, 1, 1, 2], [0], [0]>} : vector<2x16x16xf32>, vector<2x16x16xf32>, vector<2x16x16xf32> -> vector<2x16x16xf32>
    "tpu.trace_stop"() : () -> ()
    %c0_17 = arith.constant 0 : index
    %c0_18 = arith.constant 0 : index
    %c0_19 = arith.constant 0 : index
    %38 = vector.load %arg25[%c0_17, %c0_18, %c0_19] : memref<2x64x16xf32, #tpu.memory_space<vmem>>, vector<2x16x16xf32>
    tpu.vector_store %arg25[%c0_17, %c0_18, %c0_19], %37 {strides = array<i32>} : memref<2x64x16xf32, #tpu.memory_space<vmem>>, vector<2x16x16xf32>,
    %39 = vector.extract_strided_slice %20 {offsets = [0, 0, 16], sizes = [2, 16, 16], strides = [1, 1, 1]} : vector<2x16x64xf32> to vector<2x16x16xf32>
    %40 = vector.extract_strided_slice %21 {offsets = [0, 0, 16], sizes = [2, 16, 16], strides = [1, 1, 1]} : vector<2x16x64xf32> to vector<2x16x16xf32>
    "tpu.trace_start"() <{level = 10 : i32, message = "bsd,btd->bst"}> : () -> ()
    %cst_20 = arith.constant dense<0.000000e+00> : vector<2x16x16xf32>
    %41 = tpu.matmul %39, %40, %cst_20 {dimension_numbers = #tpu.dot_dimension_numbers<[2], [2], [1], [1], [0, 0, 0, 1, 1, 1], [0], [0]>} : vector<2x16x16xf32>, vector<2x16x16xf32>, vector<2x16x16xf32> -> vector<2x16x16xf32>
    "tpu.trace_stop"() : () -> ()
    %42 = arith.addf %41, %7 : vector<2x16x16xf32>
    %cst_21 = arith.constant dense<0xFF800000> : vector<2x16xf32>
    %43 = vector.multi_reduction <maximumf>, %42, %cst_21 [2] : vector<2x16x16xf32> to vector<2x16xf32>
    %44 = vector.shape_cast %43 : vector<2x16xf32> to vector<2x16x1xf32>
    %45 = vector.broadcast %44 : vector<2x16x1xf32> to vector<2x16x16xf32>
    %46 = arith.subf %42, %45 : vector<2x16x16xf32>
    %47 = math.exp %46 : vector<2x16x16xf32>
    %cst_22 = arith.constant dense<0.000000e+00> : vector<2x16xf32>
    %48 = vector.multi_reduction <add>, %47, %cst_22 [2] : vector<2x16x16xf32> to vector<2x16xf32>
    %49 = vector.shape_cast %48 : vector<2x16xf32> to vector<2x16x1xf32>
    %50 = vector.broadcast %49 : vector<2x16x1xf32> to vector<2x16x16xf32>
    %51 = arith.divf %47, %50 : vector<2x16x16xf32>
    %52 = vector.extract_strided_slice %22 {offsets = [0, 0, 16], sizes = [2, 16, 16], strides = [1, 1, 1]} : vector<2x16x64xf32> to vector<2x16x16xf32>
    "tpu.trace_start"() <{level = 10 : i32, message = "bst,btd->bsd"}> : () -> ()
    %cst_23 = arith.constant dense<0.000000e+00> : vector<2x16x16xf32>
    %53 = tpu.matmul %51, %52, %cst_23 {dimension_numbers = #tpu.dot_dimension_numbers<[2], [1], [1], [2], [0, 0, 0, 1, 1, 2], [0], [0]>} : vector<2x16x16xf32>, vector<2x16x16xf32>, vector<2x16x16xf32> -> vector<2x16x16xf32>
    "tpu.trace_stop"() : () -> ()
    %c0_24 = arith.constant 0 : index
    %c16 = arith.constant 16 : index
    %c0_25 = arith.constant 0 : index
    %54 = vector.load %arg25[%c0_24, %c16, %c0_25] : memref<2x64x16xf32, #tpu.memory_space<vmem>>, vector<2x16x16xf32>
    tpu.vector_store %arg25[%c0_24, %c16, %c0_25], %53 {strides = array<i32>} : memref<2x64x16xf32, #tpu.memory_space<vmem>>, vector<2x16x16xf32>,
    %55 = vector.extract_strided_slice %20 {offsets = [0, 0, 32], sizes = [2, 16, 16], strides = [1, 1, 1]} : vector<2x16x64xf32> to vector<2x16x16xf32>
    %56 = vector.extract_strided_slice %21 {offsets = [0, 0, 32], sizes = [2, 16, 16], strides = [1, 1, 1]} : vector<2x16x64xf32> to vector<2x16x16xf32>
    "tpu.trace_start"() <{level = 10 : i32, message = "bsd,btd->bst"}> : () -> ()
    %cst_26 = arith.constant dense<0.000000e+00> : vector<2x16x16xf32>
    %57 = tpu.matmul %55, %56, %cst_26 {dimension_numbers = #tpu.dot_dimension_numbers<[2], [2], [1], [1], [0, 0, 0, 1, 1, 1], [0], [0]>} : vector<2x16x16xf32>, vector<2x16x16xf32>, vector<2x16x16xf32> -> vector<2x16x16xf32>
    "tpu.trace_stop"() : () -> ()
    %58 = arith.addf %57, %7 : vector<2x16x16xf32>
    %cst_27 = arith.constant dense<0xFF800000> : vector<2x16xf32>
    %59 = vector.multi_reduction <maximumf>, %58, %cst_27 [2] : vector<2x16x16xf32> to vector<2x16xf32>
    %60 = vector.shape_cast %59 : vector<2x16xf32> to vector<2x16x1xf32>
    %61 = vector.broadcast %60 : vector<2x16x1xf32> to vector<2x16x16xf32>
    %62 = arith.subf %58, %61 : vector<2x16x16xf32>
    %63 = math.exp %62 : vector<2x16x16xf32>
    %cst_28 = arith.constant dense<0.000000e+00> : vector<2x16xf32>
    %64 = vector.multi_reduction <add>, %63, %cst_28 [2] : vector<2x16x16xf32> to vector<2x16xf32>
    %65 = vector.shape_cast %64 : vector<2x16xf32> to vector<2x16x1xf32>
    %66 = vector.broadcast %65 : vector<2x16x1xf32> to vector<2x16x16xf32>
    %67 = arith.divf %63, %66 : vector<2x16x16xf32>
    %68 = vector.extract_strided_slice %22 {offsets = [0, 0, 32], sizes = [2, 16, 16], strides = [1, 1, 1]} : vector<2x16x64xf32> to vector<2x16x16xf32>
    "tpu.trace_start"() <{level = 10 : i32, message = "bst,btd->bsd"}> : () -> ()
    %cst_29 = arith.constant dense<0.000000e+00> : vector<2x16x16xf32>
    %69 = tpu.matmul %67, %68, %cst_29 {dimension_numbers = #tpu.dot_dimension_numbers<[2], [1], [1], [2], [0, 0, 0, 1, 1, 2], [0], [0]>} : vector<2x16x16xf32>, vector<2x16x16xf32>, vector<2x16x16xf32> -> vector<2x16x16xf32>
    "tpu.trace_stop"() : () -> ()
    %c0_30 = arith.constant 0 : index
    %c32 = arith.constant 32 : index
    %c0_31 = arith.constant 0 : index
    %70 = vector.load %arg25[%c0_30, %c32, %c0_31] : memref<2x64x16xf32, #tpu.memory_space<vmem>>, vector<2x16x16xf32>
    tpu.vector_store %arg25[%c0_30, %c32, %c0_31], %69 {strides = array<i32>} : memref<2x64x16xf32, #tpu.memory_space<vmem>>, vector<2x16x16xf32>,
    %71 = vector.extract_strided_slice %20 {offsets = [0, 0, 48], sizes = [2, 16, 16], strides = [1, 1, 1]} : vector<2x16x64xf32> to vector<2x16x16xf32>
    %72 = vector.extract_strided_slice %21 {offsets = [0, 0, 48], sizes = [2, 16, 16], strides = [1, 1, 1]} : vector<2x16x64xf32> to vector<2x16x16xf32>
    "tpu.trace_start"() <{level = 10 : i32, message = "bsd,btd->bst"}> : () -> ()
    %cst_32 = arith.constant dense<0.000000e+00> : vector<2x16x16xf32>
    %73 = tpu.matmul %71, %72, %cst_32 {dimension_numbers = #tpu.dot_dimension_numbers<[2], [2], [1], [1], [0, 0, 0, 1, 1, 1], [0], [0]>} : vector<2x16x16xf32>, vector<2x16x16xf32>, vector<2x16x16xf32> -> vector<2x16x16xf32>
    "tpu.trace_stop"() : () -> ()
    %74 = arith.addf %73, %7 : vector<2x16x16xf32>
    %cst_33 = arith.constant dense<0xFF800000> : vector<2x16xf32>
    %75 = vector.multi_reduction <maximumf>, %74, %cst_33 [2] : vector<2x16x16xf32> to vector<2x16xf32>
    %76 = vector.shape_cast %75 : vector<2x16xf32> to vector<2x16x1xf32>
    %77 = vector.broadcast %76 : vector<2x16x1xf32> to vector<2x16x16xf32>
    %78 = arith.subf %74, %77 : vector<2x16x16xf32>
    %79 = math.exp %78 : vector<2x16x16xf32>
    %cst_34 = arith.constant dense<0.000000e+00> : vector<2x16xf32>
    %80 = vector.multi_reduction <add>, %79, %cst_34 [2] : vector<2x16x16xf32> to vector<2x16xf32>
    %81 = vector.shape_cast %80 : vector<2x16xf32> to vector<2x16x1xf32>
    %82 = vector.broadcast %81 : vector<2x16x1xf32> to vector<2x16x16xf32>
    %83 = arith.divf %79, %82 : vector<2x16x16xf32>
    %84 = vector.extract_strided_slice %22 {offsets = [0, 0, 48], sizes = [2, 16, 16], strides = [1, 1, 1]} : vector<2x16x64xf32> to vector<2x16x16xf32>
    "tpu.trace_start"() <{level = 10 : i32, message = "bst,btd->bsd"}> : () -> ()
    %cst_35 = arith.constant dense<0.000000e+00> : vector<2x16x16xf32>
    %85 = tpu.matmul %83, %84, %cst_35 {dimension_numbers = #tpu.dot_dimension_numbers<[2], [1], [1], [2], [0, 0, 0, 1, 1, 2], [0], [0]>} : vector<2x16x16xf32>, vector<2x16x16xf32>, vector<2x16x16xf32> -> vector<2x16x16xf32>
    "tpu.trace_stop"() : () -> ()
    %c0_36 = arith.constant 0 : index
    %c48 = arith.constant 48 : index
    %c0_37 = arith.constant 0 : index
    %86 = vector.load %arg25[%c0_36, %c48, %c0_37] : memref<2x64x16xf32, #tpu.memory_space<vmem>>, vector<2x16x16xf32>
    tpu.vector_store %arg25[%c0_36, %c48, %c0_37], %85 {strides = array<i32>} : memref<2x64x16xf32, #tpu.memory_space<vmem>>, vector<2x16x16xf32>,
    %c0_38 = arith.constant 0 : index
    %c0_39 = arith.constant 0 : index
    %c0_40 = arith.constant 0 : index
    %87 = tpu.strided_load %arg25[%c0_38, %c0_39, %c0_40] {strides = array<i32: 1, 4, 1>} : memref<2x64x16xf32, #tpu.memory_space<vmem>>, vector<2x16x16xf32>
    %c0_41 = arith.constant 0 : index
    %c1 = arith.constant 1 : index
    %c0_42 = arith.constant 0 : index
    %88 = tpu.strided_load %arg25[%c0_41, %c1, %c0_42] {strides = array<i32: 1, 4, 1>} : memref<2x64x16xf32, #tpu.memory_space<vmem>>, vector<2x16x16xf32>
    %c0_43 = arith.constant 0 : index
    %c2 = arith.constant 2 : index
    %c0_44 = arith.constant 0 : index
    %89 = tpu.strided_load %arg25[%c0_43, %c2, %c0_44] {strides = array<i32: 1, 4, 1>} : memref<2x64x16xf32, #tpu.memory_space<vmem>>, vector<2x16x16xf32>
    %c0_45 = arith.constant 0 : index
    %c3 = arith.constant 3 : index
    %c0_46 = arith.constant 0 : index
    %90 = tpu.strided_load %arg25[%c0_45, %c3, %c0_46] {strides = array<i32: 1, 4, 1>} : memref<2x64x16xf32, #tpu.memory_space<vmem>>, vector<2x16x16xf32>
    %91 = tpu.concatenate %87, %88, %89, %90 in 2 : vector<2x16x16xf32>, vector<2x16x16xf32>, vector<2x16x16xf32>, vector<2x16x16xf32> -> vector<2x16x64xf32>
    %92 = vector.shape_cast %91 : vector<2x16x64xf32> to vector<32x64xf32>
    %c0_47 = arith.constant 0 : index
    %c0_48 = arith.constant 0 : index
    %c0_49 = arith.constant 0 : index
    %93 = vector.load %arg6[%c0_47, %c0_48, %c0_49] : memref<1x64x64xf32, #tpu.memory_space<vmem>>, vector<1x64x64xf32>
    %94 = vector.shape_cast %93 : vector<1x64x64xf32> to vector<64x64xf32>
    %cst_50 = arith.constant dense<0.000000e+00> : vector<32x64xf32>
    %95 = tpu.matmul %92, %94, %cst_50 {dimension_numbers = #tpu.dot_dimension_numbers<[1], [0], [0], [1], [0, 0, 1, 1], [], []>} : vector<32x64xf32>, vector<64x64xf32>, vector<32x64xf32> -> vector<32x64xf32>
    %c0_51 = arith.constant 0 : index
    %c0_52 = arith.constant 0 : index
    %c0_53 = arith.constant 0 : index
    %96 = vector.load %arg7[%c0_51, %c0_52, %c0_53] : memref<1x1x64xf32, #tpu.memory_space<vmem>>, vector<1x1x64xf32>
    %97 = vector.shape_cast %96 : vector<1x1x64xf32> to vector<1x64xf32>
    %98 = vector.broadcast %97 : vector<1x64xf32> to vector<32x64xf32>
    %99 = arith.addf %95, %98 : vector<32x64xf32>
    %100 = arith.addf %99, %3 : vector<32x64xf32>
    %c0_54 = arith.constant 0 : index
    %c0_55 = arith.constant 0 : index
    %c0_56 = arith.constant 0 : index
    %101 = vector.load %arg8[%c0_54, %c0_55, %c0_56] : memref<1x1x64xf32, #tpu.memory_space<vmem>>, vector<1x1x64xf32>
    %102 = vector.shape_cast %101 : vector<1x1x64xf32> to vector<1x64xf32>
    %c0_57 = arith.constant 0 : index
    %c0_58 = arith.constant 0 : index
    %c0_59 = arith.constant 0 : index
    %103 = vector.load %arg9[%c0_57, %c0_58, %c0_59] : memref<1x1x64xf32, #tpu.memory_space<vmem>>, vector<1x1x64xf32>
    %104 = vector.shape_cast %103 : vector<1x1x64xf32> to vector<1x64xf32>
    %cst_60 = arith.constant dense<0.000000e+00> : vector<32xf32>
    %105 = vector.multi_reduction <add>, %100, %cst_60 [1] : vector<32x64xf32> to vector<32xf32>
    %106 = vector.shape_cast %105 : vector<32xf32> to vector<32x1xf32>
    %cst_61 = arith.constant 6.400000e+01 : f32
    %107 = vector.broadcast %cst_61 : f32 to vector<32x1xf32>
    %108 = arith.divf %106, %107 : vector<32x1xf32>
    %109 = vector.broadcast %108 : vector<32x1xf32> to vector<32x64xf32>
    %110 = arith.subf %100, %109 : vector<32x64xf32>
    %111 = arith.mulf %110, %110 : vector<32x64xf32>
    %cst_62 = arith.constant dense<0.000000e+00> : vector<32xf32>
    %112 = vector.multi_reduction <add>, %111, %cst_62 [1] : vector<32x64xf32> to vector<32xf32>
    %113 = vector.shape_cast %112 : vector<32xf32> to vector<32x1xf32>
    %cst_63 = arith.constant 6.400000e+01 : f32
    %114 = vector.broadcast %cst_63 : f32 to vector<32x1xf32>
    %115 = arith.divf %113, %114 : vector<32x1xf32>
    %116 = vector.broadcast %108 : vector<32x1xf32> to vector<32x64xf32>
    %117 = arith.subf %100, %116 : vector<32x64xf32>
    %cst_64 = arith.constant 9.99999974E-6 : f32
    %118 = vector.broadcast %cst_64 : f32 to vector<32x1xf32>
    %119 = arith.addf %115, %118 : vector<32x1xf32>
    %120 = math.rsqrt %119 : vector<32x1xf32>
    %121 = vector.broadcast %120 : vector<32x1xf32> to vector<32x64xf32>
    %122 = arith.mulf %117, %121 : vector<32x64xf32>
    %123 = vector.broadcast %102 : vector<1x64xf32> to vector<32x64xf32>
    %124 = arith.mulf %123, %122 : vector<32x64xf32>
    %125 = vector.broadcast %104 : vector<1x64xf32> to vector<32x64xf32>
    %126 = arith.addf %124, %125 : vector<32x64xf32>
    %c0_65 = arith.constant 0 : index
    %c0_66 = arith.constant 0 : index
    %c0_67 = arith.constant 0 : index
    %127 = vector.load %arg10[%c0_65, %c0_66, %c0_67] : memref<1x64x128xf32, #tpu.memory_space<vmem>>, vector<1x64x128xf32>
    %128 = vector.shape_cast %127 : vector<1x64x128xf32> to vector<64x128xf32>
    %cst_68 = arith.constant dense<0.000000e+00> : vector<32x128xf32>
    %129 = tpu.matmul %4, %128, %cst_68 {dimension_numbers = #tpu.dot_dimension_numbers<[1], [0], [0], [1], [0, 0, 1, 1], [], []>} : vector<32x64xf32>, vector<64x128xf32>, vector<32x128xf32> -> vector<32x128xf32>
    %c0_69 = arith.constant 0 : index
    %c0_70 = arith.constant 0 : index
    %c0_71 = arith.constant 0 : index
    %130 = vector.load %arg11[%c0_69, %c0_70, %c0_71] : memref<1x1x128xf32, #tpu.memory_space<vmem>>, vector<1x1x128xf32>
    %131 = vector.shape_cast %130 : vector<1x1x128xf32> to vector<1x128xf32>
    %132 = vector.broadcast %131 : vector<1x128xf32> to vector<32x128xf32>
    %133 = arith.addf %129, %132 : vector<32x128xf32>
    %c0_72 = arith.constant 0 : index
    %c0_73 = arith.constant 0 : index
    %c0_74 = arith.constant 0 : index
    %134 = vector.load %arg12[%c0_72, %c0_73, %c0_74] : memref<1x64x64xf32, #tpu.memory_space<vmem>>, vector<1x64x64xf32>
    %135 = vector.shape_cast %134 : vector<1x64x64xf32> to vector<64x64xf32>
    %cst_75 = arith.constant dense<0.000000e+00> : vector<32x64xf32>
    %136 = tpu.matmul %126, %135, %cst_75 {dimension_numbers = #tpu.dot_dimension_numbers<[1], [0], [0], [1], [0, 0, 1, 1], [], []>} : vector<32x64xf32>, vector<64x64xf32>, vector<32x64xf32> -> vector<32x64xf32>
    %c0_76 = arith.constant 0 : index
    %c0_77 = arith.constant 0 : index
    %c0_78 = arith.constant 0 : index
    %137 = vector.load %arg13[%c0_76, %c0_77, %c0_78] : memref<1x1x64xf32, #tpu.memory_space<vmem>>, vector<1x1x64xf32>
    %138 = vector.shape_cast %137 : vector<1x1x64xf32> to vector<1x64xf32>
    %139 = vector.broadcast %138 : vector<1x64xf32> to vector<32x64xf32>
    %140 = arith.addf %136, %139 : vector<32x64xf32>
    %141 = vector.extract_strided_slice %133 {offsets = [0, 0], sizes = [32, 64], strides = [1, 1]} : vector<32x128xf32> to vector<32x64xf32>
    %142 = vector.extract_strided_slice %133 {offsets = [0, 64], sizes = [32, 64], strides = [1, 1]} : vector<32x128xf32> to vector<32x64xf32>
    %cst_79 = arith.constant 2.500000e-01 : f32
    %143 = vector.broadcast %cst_79 : f32 to vector<32x64xf32>
    %144 = arith.mulf %140, %143 : vector<32x64xf32>
    %145 = vector.shape_cast %144 : vector<32x64xf32> to vector<2x16x64xf32>
    %146 = vector.shape_cast %141 : vector<32x64xf32> to vector<2x16x64xf32>
    %147 = vector.shape_cast %142 : vector<32x64xf32> to vector<2x16x64xf32>
    %148 = vector.extract_strided_slice %145 {offsets = [0, 0, 0], sizes = [2, 16, 16], strides = [1, 1, 1]} : vector<2x16x64xf32> to vector<2x16x16xf32>
    %149 = vector.extract_strided_slice %146 {offsets = [0, 0, 0], sizes = [2, 16, 16], strides = [1, 1, 1]} : vector<2x16x64xf32> to vector<2x16x16xf32>
    "tpu.trace_start"() <{level = 10 : i32, message = "bsd,btd->bst"}> : () -> ()
    %cst_80 = arith.constant dense<0.000000e+00> : vector<2x16x16xf32>
    %150 = tpu.matmul %148, %149, %cst_80 {dimension_numbers = #tpu.dot_dimension_numbers<[2], [2], [1], [1], [0, 0, 0, 1, 1, 1], [0], [0]>} : vector<2x16x16xf32>, vector<2x16x16xf32>, vector<2x16x16xf32> -> vector<2x16x16xf32>
    "tpu.trace_stop"() : () -> ()
    %cst_81 = arith.constant dense<0xFF800000> : vector<2x16xf32>
    %151 = vector.multi_reduction <maximumf>, %150, %cst_81 [2] : vector<2x16x16xf32> to vector<2x16xf32>
    %152 = vector.shape_cast %151 : vector<2x16xf32> to vector<2x16x1xf32>
    %153 = vector.broadcast %152 : vector<2x16x1xf32> to vector<2x16x16xf32>
    %154 = arith.subf %150, %153 : vector<2x16x16xf32>
    %155 = math.exp %154 : vector<2x16x16xf32>
    %cst_82 = arith.constant dense<0.000000e+00> : vector<2x16xf32>
    %156 = vector.multi_reduction <add>, %155, %cst_82 [2] : vector<2x16x16xf32> to vector<2x16xf32>
    %157 = vector.shape_cast %156 : vector<2x16xf32> to vector<2x16x1xf32>
    %158 = vector.broadcast %157 : vector<2x16x1xf32> to vector<2x16x16xf32>
    %159 = arith.divf %155, %158 : vector<2x16x16xf32>
    %160 = vector.extract_strided_slice %147 {offsets = [0, 0, 0], sizes = [2, 16, 16], strides = [1, 1, 1]} : vector<2x16x64xf32> to vector<2x16x16xf32>
    "tpu.trace_start"() <{level = 10 : i32, message = "bst,btd->bsd"}> : () -> ()
    %cst_83 = arith.constant dense<0.000000e+00> : vector<2x16x16xf32>
    %161 = tpu.matmul %159, %160, %cst_83 {dimension_numbers = #tpu.dot_dimension_numbers<[2], [1], [1], [2], [0, 0, 0, 1, 1, 2], [0], [0]>} : vector<2x16x16xf32>, vector<2x16x16xf32>, vector<2x16x16xf32> -> vector<2x16x16xf32>
    "tpu.trace_stop"() : () -> ()
    %c0_84 = arith.constant 0 : index
    %c0_85 = arith.constant 0 : index
    %c0_86 = arith.constant 0 : index
    %162 = vector.load %arg25[%c0_84, %c0_85, %c0_86] : memref<2x64x16xf32, #tpu.memory_space<vmem>>, vector<2x16x16xf32>
    tpu.vector_store %arg25[%c0_84, %c0_85, %c0_86], %161 {strides = array<i32>} : memref<2x64x16xf32, #tpu.memory_space<vmem>>, vector<2x16x16xf32>,
    %163 = vector.extract_strided_slice %145 {offsets = [0, 0, 16], sizes = [2, 16, 16], strides = [1, 1, 1]} : vector<2x16x64xf32> to vector<2x16x16xf32>
    %164 = vector.extract_strided_slice %146 {offsets = [0, 0, 16], sizes = [2, 16, 16], strides = [1, 1, 1]} : vector<2x16x64xf32> to vector<2x16x16xf32>
    "tpu.trace_start"() <{level = 10 : i32, message = "bsd,btd->bst"}> : () -> ()
    %cst_87 = arith.constant dense<0.000000e+00> : vector<2x16x16xf32>
    %165 = tpu.matmul %163, %164, %cst_87 {dimension_numbers = #tpu.dot_dimension_numbers<[2], [2], [1], [1], [0, 0, 0, 1, 1, 1], [0], [0]>} : vector<2x16x16xf32>, vector<2x16x16xf32>, vector<2x16x16xf32> -> vector<2x16x16xf32>
    "tpu.trace_stop"() : () -> ()
    %cst_88 = arith.constant dense<0xFF800000> : vector<2x16xf32>
    %166 = vector.multi_reduction <maximumf>, %165, %cst_88 [2] : vector<2x16x16xf32> to vector<2x16xf32>
    %167 = vector.shape_cast %166 : vector<2x16xf32> to vector<2x16x1xf32>
    %168 = vector.broadcast %167 : vector<2x16x1xf32> to vector<2x16x16xf32>
    %169 = arith.subf %165, %168 : vector<2x16x16xf32>
    %170 = math.exp %169 : vector<2x16x16xf32>
    %cst_89 = arith.constant dense<0.000000e+00> : vector<2x16xf32>
    %171 = vector.multi_reduction <add>, %170, %cst_89 [2] : vector<2x16x16xf32> to vector<2x16xf32>
    %172 = vector.shape_cast %171 : vector<2x16xf32> to vector<2x16x1xf32>
    %173 = vector.broadcast %172 : vector<2x16x1xf32> to vector<2x16x16xf32>
    %174 = arith.divf %170, %173 : vector<2x16x16xf32>
    %175 = vector.extract_strided_slice %147 {offsets = [0, 0, 16], sizes = [2, 16, 16], strides = [1, 1, 1]} : vector<2x16x64xf32> to vector<2x16x16xf32>
    "tpu.trace_start"() <{level = 10 : i32, message = "bst,btd->bsd"}> : () -> ()
    %cst_90 = arith.constant dense<0.000000e+00> : vector<2x16x16xf32>
    %176 = tpu.matmul %174, %175, %cst_90 {dimension_numbers = #tpu.dot_dimension_numbers<[2], [1], [1], [2], [0, 0, 0, 1, 1, 2], [0], [0]>} : vector<2x16x16xf32>, vector<2x16x16xf32>, vector<2x16x16xf32> -> vector<2x16x16xf32>
    "tpu.trace_stop"() : () -> ()
    %c0_91 = arith.constant 0 : index
    %c16_92 = arith.constant 16 : index
    %c0_93 = arith.constant 0 : index
    %177 = vector.load %arg25[%c0_91, %c16_92, %c0_93] : memref<2x64x16xf32, #tpu.memory_space<vmem>>, vector<2x16x16xf32>
    tpu.vector_store %arg25[%c0_91, %c16_92, %c0_93], %176 {strides = array<i32>} : memref<2x64x16xf32, #tpu.memory_space<vmem>>, vector<2x16x16xf32>,
    %178 = vector.extract_strided_slice %145 {offsets = [0, 0, 32], sizes = [2, 16, 16], strides = [1, 1, 1]} : vector<2x16x64xf32> to vector<2x16x16xf32>
    %179 = vector.extract_strided_slice %146 {offsets = [0, 0, 32], sizes = [2, 16, 16], strides = [1, 1, 1]} : vector<2x16x64xf32> to vector<2x16x16xf32>
    "tpu.trace_start"() <{level = 10 : i32, message = "bsd,btd->bst"}> : () -> ()
    %cst_94 = arith.constant dense<0.000000e+00> : vector<2x16x16xf32>
    %180 = tpu.matmul %178, %179, %cst_94 {dimension_numbers = #tpu.dot_dimension_numbers<[2], [2], [1], [1], [0, 0, 0, 1, 1, 1], [0], [0]>} : vector<2x16x16xf32>, vector<2x16x16xf32>, vector<2x16x16xf32> -> vector<2x16x16xf32>
    "tpu.trace_stop"() : () -> ()
    %cst_95 = arith.constant dense<0xFF800000> : vector<2x16xf32>
    %181 = vector.multi_reduction <maximumf>, %180, %cst_95 [2] : vector<2x16x16xf32> to vector<2x16xf32>
    %182 = vector.shape_cast %181 : vector<2x16xf32> to vector<2x16x1xf32>
    %183 = vector.broadcast %182 : vector<2x16x1xf32> to vector<2x16x16xf32>
    %184 = arith.subf %180, %183 : vector<2x16x16xf32>
    %185 = math.exp %184 : vector<2x16x16xf32>
    %cst_96 = arith.constant dense<0.000000e+00> : vector<2x16xf32>
    %186 = vector.multi_reduction <add>, %185, %cst_96 [2] : vector<2x16x16xf32> to vector<2x16xf32>
    %187 = vector.shape_cast %186 : vector<2x16xf32> to vector<2x16x1xf32>
    %188 = vector.broadcast %187 : vector<2x16x1xf32> to vector<2x16x16xf32>
    %189 = arith.divf %185, %188 : vector<2x16x16xf32>
    %190 = vector.extract_strided_slice %147 {offsets = [0, 0, 32], sizes = [2, 16, 16], strides = [1, 1, 1]} : vector<2x16x64xf32> to vector<2x16x16xf32>
    "tpu.trace_start"() <{level = 10 : i32, message = "bst,btd->bsd"}> : () -> ()
    %cst_97 = arith.constant dense<0.000000e+00> : vector<2x16x16xf32>
    %191 = tpu.matmul %189, %190, %cst_97 {dimension_numbers = #tpu.dot_dimension_numbers<[2], [1], [1], [2], [0, 0, 0, 1, 1, 2], [0], [0]>} : vector<2x16x16xf32>, vector<2x16x16xf32>, vector<2x16x16xf32> -> vector<2x16x16xf32>
    "tpu.trace_stop"() : () -> ()
    %c0_98 = arith.constant 0 : index
    %c32_99 = arith.constant 32 : index
    %c0_100 = arith.constant 0 : index
    %192 = vector.load %arg25[%c0_98, %c32_99, %c0_100] : memref<2x64x16xf32, #tpu.memory_space<vmem>>, vector<2x16x16xf32>
    tpu.vector_store %arg25[%c0_98, %c32_99, %c0_100], %191 {strides = array<i32>} : memref<2x64x16xf32, #tpu.memory_space<vmem>>, vector<2x16x16xf32>,
    %193 = vector.extract_strided_slice %145 {offsets = [0, 0, 48], sizes = [2, 16, 16], strides = [1, 1, 1]} : vector<2x16x64xf32> to vector<2x16x16xf32>
    %194 = vector.extract_strided_slice %146 {offsets = [0, 0, 48], sizes = [2, 16, 16], strides = [1, 1, 1]} : vector<2x16x64xf32> to vector<2x16x16xf32>
    "tpu.trace_start"() <{level = 10 : i32, message = "bsd,btd->bst"}> : () -> ()
    %cst_101 = arith.constant dense<0.000000e+00> : vector<2x16x16xf32>
    %195 = tpu.matmul %193, %194, %cst_101 {dimension_numbers = #tpu.dot_dimension_numbers<[2], [2], [1], [1], [0, 0, 0, 1, 1, 1], [0], [0]>} : vector<2x16x16xf32>, vector<2x16x16xf32>, vector<2x16x16xf32> -> vector<2x16x16xf32>
    "tpu.trace_stop"() : () -> ()
    %cst_102 = arith.constant dense<0xFF800000> : vector<2x16xf32>
    %196 = vector.multi_reduction <maximumf>, %195, %cst_102 [2] : vector<2x16x16xf32> to vector<2x16xf32>
    %197 = vector.shape_cast %196 : vector<2x16xf32> to vector<2x16x1xf32>
    %198 = vector.broadcast %197 : vector<2x16x1xf32> to vector<2x16x16xf32>
    %199 = arith.subf %195, %198 : vector<2x16x16xf32>
    %200 = math.exp %199 : vector<2x16x16xf32>
    %cst_103 = arith.constant dense<0.000000e+00> : vector<2x16xf32>
    %201 = vector.multi_reduction <add>, %200, %cst_103 [2] : vector<2x16x16xf32> to vector<2x16xf32>
    %202 = vector.shape_cast %201 : vector<2x16xf32> to vector<2x16x1xf32>
    %203 = vector.broadcast %202 : vector<2x16x1xf32> to vector<2x16x16xf32>
    %204 = arith.divf %200, %203 : vector<2x16x16xf32>
    %205 = vector.extract_strided_slice %147 {offsets = [0, 0, 48], sizes = [2, 16, 16], strides = [1, 1, 1]} : vector<2x16x64xf32> to vector<2x16x16xf32>
    "tpu.trace_start"() <{level = 10 : i32, message = "bst,btd->bsd"}> : () -> ()
    %cst_104 = arith.constant dense<0.000000e+00> : vector<2x16x16xf32>
    %206 = tpu.matmul %204, %205, %cst_104 {dimension_numbers = #tpu.dot_dimension_numbers<[2], [1], [1], [2], [0, 0, 0, 1, 1, 2], [0], [0]>} : vector<2x16x16xf32>, vector<2x16x16xf32>, vector<2x16x16xf32> -> vector<2x16x16xf32>
    "tpu.trace_stop"() : () -> ()
    %c0_105 = arith.constant 0 : index
    %c48_106 = arith.constant 48 : index
    %c0_107 = arith.constant 0 : index
    %207 = vector.load %arg25[%c0_105, %c48_106, %c0_107] : memref<2x64x16xf32, #tpu.memory_space<vmem>>, vector<2x16x16xf32>
    tpu.vector_store %arg25[%c0_105, %c48_106, %c0_107], %206 {strides = array<i32>} : memref<2x64x16xf32, #tpu.memory_space<vmem>>, vector<2x16x16xf32>,
    %c0_108 = arith.constant 0 : index
    %c0_109 = arith.constant 0 : index
    %c0_110 = arith.constant 0 : index
    %208 = tpu.strided_load %arg25[%c0_108, %c0_109, %c0_110] {strides = array<i32: 1, 4, 1>} : memref<2x64x16xf32, #tpu.memory_space<vmem>>, vector<2x16x16xf32>
    %c0_111 = arith.constant 0 : index
    %c1_112 = arith.constant 1 : index
    %c0_113 = arith.constant 0 : index
    %209 = tpu.strided_load %arg25[%c0_111, %c1_112, %c0_113] {strides = array<i32: 1, 4, 1>} : memref<2x64x16xf32, #tpu.memory_space<vmem>>, vector<2x16x16xf32>
    %c0_114 = arith.constant 0 : index
    %c2_115 = arith.constant 2 : index
    %c0_116 = arith.constant 0 : index
    %210 = tpu.strided_load %arg25[%c0_114, %c2_115, %c0_116] {strides = array<i32: 1, 4, 1>} : memref<2x64x16xf32, #tpu.memory_space<vmem>>, vector<2x16x16xf32>
    %c0_117 = arith.constant 0 : index
    %c3_118 = arith.constant 3 : index
    %c0_119 = arith.constant 0 : index
    %211 = tpu.strided_load %arg25[%c0_117, %c3_118, %c0_119] {strides = array<i32: 1, 4, 1>} : memref<2x64x16xf32, #tpu.memory_space<vmem>>, vector<2x16x16xf32>
    %212 = tpu.concatenate %208, %209, %210, %211 in 2 : vector<2x16x16xf32>, vector<2x16x16xf32>, vector<2x16x16xf32>, vector<2x16x16xf32> -> vector<2x16x64xf32>
    %213 = vector.shape_cast %212 : vector<2x16x64xf32> to vector<32x64xf32>
    %c0_120 = arith.constant 0 : index
    %c0_121 = arith.constant 0 : index
    %c0_122 = arith.constant 0 : index
    %214 = vector.load %arg14[%c0_120, %c0_121, %c0_122] : memref<1x64x64xf32, #tpu.memory_space<vmem>>, vector<1x64x64xf32>
    %215 = vector.shape_cast %214 : vector<1x64x64xf32> to vector<64x64xf32>
    %cst_123 = arith.constant dense<0.000000e+00> : vector<32x64xf32>
    %216 = tpu.matmul %213, %215, %cst_123 {dimension_numbers = #tpu.dot_dimension_numbers<[1], [0], [0], [1], [0, 0, 1, 1], [], []>} : vector<32x64xf32>, vector<64x64xf32>, vector<32x64xf32> -> vector<32x64xf32>
    %c0_124 = arith.constant 0 : index
    %c0_125 = arith.constant 0 : index
    %c0_126 = arith.constant 0 : index
    %217 = vector.load %arg15[%c0_124, %c0_125, %c0_126] : memref<1x1x64xf32, #tpu.memory_space<vmem>>, vector<1x1x64xf32>
    %218 = vector.shape_cast %217 : vector<1x1x64xf32> to vector<1x64xf32>
    %219 = vector.broadcast %218 : vector<1x64xf32> to vector<32x64xf32>
    %220 = arith.addf %216, %219 : vector<32x64xf32>
    %221 = arith.addf %220, %126 : vector<32x64xf32>
    %c0_127 = arith.constant 0 : index
    %c0_128 = arith.constant 0 : index
    %c0_129 = arith.constant 0 : index
    %222 = vector.load %arg16[%c0_127, %c0_128, %c0_129] : memref<1x1x64xf32, #tpu.memory_space<vmem>>, vector<1x1x64xf32>
    %223 = vector.shape_cast %222 : vector<1x1x64xf32> to vector<1x64xf32>
    %c0_130 = arith.constant 0 : index
    %c0_131 = arith.constant 0 : index
    %c0_132 = arith.constant 0 : index
    %224 = vector.load %arg17[%c0_130, %c0_131, %c0_132] : memref<1x1x64xf32, #tpu.memory_space<vmem>>, vector<1x1x64xf32>
    %225 = vector.shape_cast %224 : vector<1x1x64xf32> to vector<1x64xf32>
    %cst_133 = arith.constant dense<0.000000e+00> : vector<32xf32>
    %226 = vector.multi_reduction <add>, %221, %cst_133 [1] : vector<32x64xf32> to vector<32xf32>
    %227 = vector.shape_cast %226 : vector<32xf32> to vector<32x1xf32>
    %cst_134 = arith.constant 6.400000e+01 : f32
    %228 = vector.broadcast %cst_134 : f32 to vector<32x1xf32>
    %229 = arith.divf %227, %228 : vector<32x1xf32>
    %230 = vector.broadcast %229 : vector<32x1xf32> to vector<32x64xf32>
    %231 = arith.subf %221, %230 : vector<32x64xf32>
    %232 = arith.mulf %231, %231 : vector<32x64xf32>
    %cst_135 = arith.constant dense<0.000000e+00> : vector<32xf32>
    %233 = vector.multi_reduction <add>, %232, %cst_135 [1] : vector<32x64xf32> to vector<32xf32>
    %234 = vector.shape_cast %233 : vector<32xf32> to vector<32x1xf32>
    %cst_136 = arith.constant 6.400000e+01 : f32
    %235 = vector.broadcast %cst_136 : f32 to vector<32x1xf32>
    %236 = arith.divf %234, %235 : vector<32x1xf32>
    %237 = vector.broadcast %229 : vector<32x1xf32> to vector<32x64xf32>
    %238 = arith.subf %221, %237 : vector<32x64xf32>
    %cst_137 = arith.constant 9.99999974E-6 : f32
    %239 = vector.broadcast %cst_137 : f32 to vector<32x1xf32>
    %240 = arith.addf %236, %239 : vector<32x1xf32>
    %241 = math.rsqrt %240 : vector<32x1xf32>
    %242 = vector.broadcast %241 : vector<32x1xf32> to vector<32x64xf32>
    %243 = arith.mulf %238, %242 : vector<32x64xf32>
    %244 = vector.broadcast %223 : vector<1x64xf32> to vector<32x64xf32>
    %245 = arith.mulf %244, %243 : vector<32x64xf32>
    %246 = vector.broadcast %225 : vector<1x64xf32> to vector<32x64xf32>
    %247 = arith.addf %245, %246 : vector<32x64xf32>
    %c0_138 = arith.constant 0 : index
    %c0_139 = arith.constant 0 : index
    %c0_140 = arith.constant 0 : index
    %248 = vector.load %arg18[%c0_138, %c0_139, %c0_140] : memref<1x64x128xf32, #tpu.memory_space<vmem>>, vector<1x64x128xf32>
    %249 = vector.shape_cast %248 : vector<1x64x128xf32> to vector<64x128xf32>
    %cst_141 = arith.constant dense<0.000000e+00> : vector<32x128xf32>
    %250 = tpu.matmul %247, %249, %cst_141 {dimension_numbers = #tpu.dot_dimension_numbers<[1], [0], [0], [1], [0, 0, 1, 1], [], []>} : vector<32x64xf32>, vector<64x128xf32>, vector<32x128xf32> -> vector<32x128xf32>
    %c0_142 = arith.constant 0 : index
    %c0_143 = arith.constant 0 : index
    %c0_144 = arith.constant 0 : index
    %251 = vector.load %arg19[%c0_142, %c0_143, %c0_144] : memref<1x1x128xf32, #tpu.memory_space<vmem>>, vector<1x1x128xf32>
    %252 = vector.shape_cast %251 : vector<1x1x128xf32> to vector<1x128xf32>
    %253 = vector.broadcast %252 : vector<1x128xf32> to vector<32x128xf32>
    %254 = arith.addf %250, %253 : vector<32x128xf32>
    %cst_145 = arith.constant 0.000000e+00 : f32
    %255 = vector.broadcast %cst_145 : f32 to vector<32x128xf32>
    %256 = arith.maximumf %254, %255 : vector<32x128xf32>
    %c0_146 = arith.constant 0 : index
    %c0_147 = arith.constant 0 : index
    %c0_148 = arith.constant 0 : index
    %257 = vector.load %arg20[%c0_146, %c0_147, %c0_148] : memref<1x128x64xf32, #tpu.memory_space<vmem>>, vector<1x128x64xf32>
    %258 = vector.shape_cast %257 : vector<1x128x64xf32> to vector<128x64xf32>
    %cst_149 = arith.constant dense<0.000000e+00> : vector<32x64xf32>
    %259 = tpu.matmul %256, %258, %cst_149 {dimension_numbers = #tpu.dot_dimension_numbers<[1], [0], [0], [1], [0, 0, 1, 1], [], []>} : vector<32x128xf32>, vector<128x64xf32>, vector<32x64xf32> -> vector<32x64xf32>
    %c0_150 = arith.constant 0 : index
    %c0_151 = arith.constant 0 : index
    %c0_152 = arith.constant 0 : index
    %260 = vector.load %arg21[%c0_150, %c0_151, %c0_152] : memref<1x1x64xf32, #tpu.memory_space<vmem>>, vector<1x1x64xf32>
    %261 = vector.shape_cast %260 : vector<1x1x64xf32> to vector<1x64xf32>
    %262 = vector.broadcast %261 : vector<1x64xf32> to vector<32x64xf32>
    %263 = arith.addf %259, %262 : vector<32x64xf32>
    %264 = arith.addf %263, %247 : vector<32x64xf32>
    %c0_153 = arith.constant 0 : index
    %c0_154 = arith.constant 0 : index
    %c0_155 = arith.constant 0 : index
    %265 = vector.load %arg22[%c0_153, %c0_154, %c0_155] : memref<1x1x64xf32, #tpu.memory_space<vmem>>, vector<1x1x64xf32>
    %266 = vector.shape_cast %265 : vector<1x1x64xf32> to vector<1x64xf32>
    %c0_156 = arith.constant 0 : index
    %c0_157 = arith.constant 0 : index
    %c0_158 = arith.constant 0 : index
    %267 = vector.load %arg23[%c0_156, %c0_157, %c0_158] : memref<1x1x64xf32, #tpu.memory_space<vmem>>, vector<1x1x64xf32>
    %268 = vector.shape_cast %267 : vector<1x1x64xf32> to vector<1x64xf32>
    %cst_159 = arith.constant dense<0.000000e+00> : vector<32xf32>
    %269 = vector.multi_reduction <add>, %264, %cst_159 [1] : vector<32x64xf32> to vector<32xf32>
    %270 = vector.shape_cast %269 : vector<32xf32> to vector<32x1xf32>
    %cst_160 = arith.constant 6.400000e+01 : f32
    %271 = vector.broadcast %cst_160 : f32 to vector<32x1xf32>
    %272 = arith.divf %270, %271 : vector<32x1xf32>
    %273 = vector.broadcast %272 : vector<32x1xf32> to vector<32x64xf32>
    %274 = arith.subf %264, %273 : vector<32x64xf32>
    %275 = arith.mulf %274, %274 : vector<32x64xf32>
    %cst_161 = arith.constant dense<0.000000e+00> : vector<32xf32>
    %276 = vector.multi_reduction <add>, %275, %cst_161 [1] : vector<32x64xf32> to vector<32xf32>
    %277 = vector.shape_cast %276 : vector<32xf32> to vector<32x1xf32>
    %cst_162 = arith.constant 6.400000e+01 : f32
    %278 = vector.broadcast %cst_162 : f32 to vector<32x1xf32>
    %279 = arith.divf %277, %278 : vector<32x1xf32>
    %280 = vector.broadcast %272 : vector<32x1xf32> to vector<32x64xf32>
    %281 = arith.subf %264, %280 : vector<32x64xf32>
    %cst_163 = arith.constant 9.99999974E-6 : f32
    %282 = vector.broadcast %cst_163 : f32 to vector<32x1xf32>
    %283 = arith.addf %279, %282 : vector<32x1xf32>
    %284 = math.rsqrt %283 : vector<32x1xf32>
    %285 = vector.broadcast %284 : vector<32x1xf32> to vector<32x64xf32>
    %286 = arith.mulf %281, %285 : vector<32x64xf32>
    %287 = vector.broadcast %266 : vector<1x64xf32> to vector<32x64xf32>
    %288 = arith.mulf %287, %286 : vector<32x64xf32>
    %289 = vector.broadcast %268 : vector<1x64xf32> to vector<32x64xf32>
    %290 = arith.addf %288, %289 : vector<32x64xf32>
    %c0_164 = arith.constant 0 : index
    %c0_165 = arith.constant 0 : index
    %291 = vector.load %arg24[%c0_164, %c0_165] : memref<32x64xf32, #tpu.memory_space<vmem>>, vector<32x64xf32>
    tpu.vector_store %arg24[%c0_164, %c0_165], %290 {strides = array<i32>} : memref<32x64xf32, #tpu.memory_space<vmem>>, vector<32x64xf32>,
    return
  }
  func.func @transform_0(%arg0: i32) -> (i32, i32) {
    %c0_i32 = arith.constant 0 : i32
    %c0_i32_0 = arith.constant 0 : i32
    %c0_i32_1 = arith.constant 0 : i32
    return %c0_i32, %c0_i32_0 : i32, i32
  }
  func.func @transform_1(%arg0: i32) -> (i32, i32) {
    %c0_i32 = arith.constant 0 : i32
    %c0_i32_0 = arith.constant 0 : i32
    %c0_i32_1 = arith.constant 0 : i32
    return %c0_i32, %c0_i32_0 : i32, i32
  }
  func.func @transform_2(%arg0: i32) -> (i32, i32) {
    %c0_i32 = arith.constant 0 : i32
    %c0_i32_0 = arith.constant 0 : i32
    %c0_i32_1 = arith.constant 0 : i32
    return %c0_i32, %c0_i32_0 : i32, i32
  }
  func.func @transform_3(%arg0: i32) -> (i32, i32, i32) {
    %c0_i32 = arith.constant 0 : i32
    %c0_i32_0 = arith.constant 0 : i32
    %c0_i32_1 = arith.constant 0 : i32
    return %arg0, %c0_i32, %c0_i32_0 : i32, i32, i32
  }
  func.func @transform_4(%arg0: i32) -> (i32, i32, i32) {
    %c0_i32 = arith.constant 0 : i32
    %c0_i32_0 = arith.constant 0 : i32
    %c0_i32_1 = arith.constant 0 : i32
    return %arg0, %c0_i32, %c0_i32_0 : i32, i32, i32
  }
  func.func @transform_5(%arg0: i32) -> (i32, i32, i32) {
    %c0_i32 = arith.constant 0 : i32
    %c0_i32_0 = arith.constant 0 : i32
    %c0_i32_1 = arith.constant 0 : i32
    return %arg0, %c0_i32, %c0_i32_0 : i32, i32, i32
  }
  func.func @transform_6(%arg0: i32) -> (i32, i32, i32) {
    %c0_i32 = arith.constant 0 : i32
    %c0_i32_0 = arith.constant 0 : i32
    %c0_i32_1 = arith.constant 0 : i32
    return %arg0, %c0_i32, %c0_i32_0 : i32, i32, i32
  }
  func.func @transform_7(%arg0: i32) -> (i32, i32, i32) {
    %c0_i32 = arith.constant 0 : i32
    %c0_i32_0 = arith.constant 0 : i32
    %c0_i32_1 = arith.constant 0 : i32
    return %arg0, %c0_i32, %c0_i32_0 : i32, i32, i32
  }
  func.func @transform_8(%arg0: i32) -> (i32, i32, i32) {
    %c0_i32 = arith.constant 0 : i32
    %c0_i32_0 = arith.constant 0 : i32
    %c0_i32_1 = arith.constant 0 : i32
    return %arg0, %c0_i32, %c0_i32_0 : i32, i32, i32
  }
  func.func @transform_9(%arg0: i32) -> (i32, i32, i32) {
    %c0_i32 = arith.constant 0 : i32
    %c0_i32_0 = arith.constant 0 : i32
    %c0_i32_1 = arith.constant 0 : i32
    return %arg0, %c0_i32, %c0_i32_0 : i32, i32, i32
  }
  func.func @transform_10(%arg0: i32) -> (i32, i32, i32) {
    %c0_i32 = arith.constant 0 : i32
    %c0_i32_0 = arith.constant 0 : i32
    %c0_i32_1 = arith.constant 0 : i32
    return %arg0, %c0_i32, %c0_i32_0 : i32, i32, i32
  }
  func.func @transform_11(%arg0: i32) -> (i32, i32, i32) {
    %c0_i32 = arith.constant 0 : i32
    %c0_i32_0 = arith.constant 0 : i32
    %c0_i32_1 = arith.constant 0 : i32
    return %arg0, %c0_i32, %c0_i32_0 : i32, i32, i32
  }
  func.func @transform_12(%arg0: i32) -> (i32, i32, i32) {
    %c0_i32 = arith.constant 0 : i32
    %c0_i32_0 = arith.constant 0 : i32
    %c0_i32_1 = arith.constant 0 : i32
    return %arg0, %c0_i32, %c0_i32_0 : i32, i32, i32
  }
  func.func @transform_13(%arg0: i32) -> (i32, i32, i32) {
    %c0_i32 = arith.constant 0 : i32
    %c0_i32_0 = arith.constant 0 : i32
    %c0_i32_1 = arith.constant 0 : i32
    return %arg0, %c0_i32, %c0_i32_0 : i32, i32, i32
  }
  func.func @transform_14(%arg0: i32) -> (i32, i32, i32) {
    %c0_i32 = arith.constant 0 : i32
    %c0_i32_0 = arith.constant 0 : i32
    %c0_i32_1 = arith.constant 0 : i32
    return %arg0, %c0_i32, %c0_i32_0 : i32, i32, i32
  }
  func.func @transform_15(%arg0: i32) -> (i32, i32, i32) {
    %c0_i32 = arith.constant 0 : i32
    %c0_i32_0 = arith.constant 0 : i32
    %c0_i32_1 = arith.constant 0 : i32
    return %arg0, %c0_i32, %c0_i32_0 : i32, i32, i32
  }
  func.func @transform_16(%arg0: i32) -> (i32, i32, i32) {
    %c0_i32 = arith.constant 0 : i32
    %c0_i32_0 = arith.constant 0 : i32
    %c0_i32_1 = arith.constant 0 : i32
    return %arg0, %c0_i32, %c0_i32_0 : i32, i32, i32
  }
  func.func @transform_17(%arg0: i32) -> (i32, i32, i32) {
    %c0_i32 = arith.constant 0 : i32
    %c0_i32_0 = arith.constant 0 : i32
    %c0_i32_1 = arith.constant 0 : i32
    return %arg0, %c0_i32, %c0_i32_0 : i32, i32, i32
  }
  func.func @transform_18(%arg0: i32) -> (i32, i32, i32) {
    %c0_i32 = arith.constant 0 : i32
    %c0_i32_0 = arith.constant 0 : i32
    %c0_i32_1 = arith.constant 0 : i32
    return %arg0, %c0_i32, %c0_i32_0 : i32, i32, i32
  }
  func.func @transform_19(%arg0: i32) -> (i32, i32, i32) {
    %c0_i32 = arith.constant 0 : i32
    %c0_i32_0 = arith.constant 0 : i32
    %c0_i32_1 = arith.constant 0 : i32
    return %arg0, %c0_i32, %c0_i32_0 : i32, i32, i32
  }
  func.func @transform_20(%arg0: i32) -> (i32, i32, i32) {
    %c0_i32 = arith.constant 0 : i32
    %c0_i32_0 = arith.constant 0 : i32
    %c0_i32_1 = arith.constant 0 : i32
    return %arg0, %c0_i32, %c0_i32_0 : i32, i32, i32
  }
  func.func @transform_21(%arg0: i32) -> (i32, i32, i32) {
    %c0_i32 = arith.constant 0 : i32
    %c0_i32_0 = arith.constant 0 : i32
    %c0_i32_1 = arith.constant 0 : i32
    return %arg0, %c0_i32, %c0_i32_0 : i32, i32, i32
  }
  func.func @transform_22(%arg0: i32) -> (i32, i32, i32) {
    %c0_i32 = arith.constant 0 : i32
    %c0_i32_0 = arith.constant 0 : i32
    %c0_i32_1 = arith.constant 0 : i32
    return %arg0, %c0_i32, %c0_i32_0 : i32, i32, i32
  }
  func.func @transform_23(%arg0: i32) -> (i32, i32) {
    %c0_i32 = arith.constant 0 : i32
    %c0_i32_0 = arith.constant 0 : i32
    %c0_i32_1 = arith.constant 0 : i32
    return %c0_i32, %c0_i32_0 : i32, i32
  }
}

</mosaic_0001>

<bundles_post_ra>
// kernel: tpu_custom_call.1
= control target key start
LH: loop header
LB: loop body
LE: loop exit
PB: predicated region body
PF: predicated region fallthrough
CT: control target
= control target key end

     0   :  { %s8446_s0 = inlined_call_operand.hbm [shape: f32[16,16], index: 0, kind: input, shape index: {}]   ;;  %s8447_s1 = inlined_call_operand.hbm [shape: f32[32,64], index: 1, kind: input, shape index: {}]   ;;  %s8448_s2 = inlined_call_operand.hbm [shape: f32[32,64], index: 2, kind: input, shape index: {}]   ;;  %s8449_s3 = inlined_call_operand.vmem [shape: f32[2,64,192], index: 3, kind: input, shape index: {}]   ;;  %s8450_s4 = inlined_call_operand.vmem [shape: f32[2,1,192], index: 4, kind: input, shape index: {}]   ;;  %s8451_s5 = inlined_call_operand.vmem [shape: f32[2,64,64], index: 5, kind: input, shape index: {}]   ;;  %s8452_s6 = inlined_call_operand.vmem [shape: f32[2,1,64], index: 6, kind: input, shape index: {}]   ;;  %s8453_s7 = inlined_call_operand.vmem [shape: f32[2,1,64], index: 7, kind: input, shape index: {}]   ;;  %s8454_s8 = inlined_call_operand.vmem [shape: f32[2,1,64], index: 8, kind: input, shape index: {}]   ;;  %s8455_s9 = inlined_call_operand.hbm [shape: f32[2,64,128], index: 9, kind: input, shape index: {}]   ;;  %s8456_s10 = inlined_call_operand.vmem [shape: f32[2,1,128], index: 10, kind: input, shape index: {}]   ;;  %s8457_s11 = inlined_call_operand.hbm [shape: f32[2,64,64], index: 11, kind: input, shape index: {}]   ;;  %s8458_s12 = inlined_call_operand.vmem [shape: f32[2,1,64], index: 12, kind: input, shape index: {}]   ;;  %s8459_s13 = inlined_call_operand.hbm [shape: f32[2,64,64], index: 13, kind: input, shape index: {}]   ;;  %s8460_s14 = inlined_call_operand.vmem [shape: f32[2,1,64], index: 14, kind: input, shape index: {}]   ;;  %s8461_s15 = inlined_call_operand.vmem [shape: f32[2,1,64], index: 15, kind: input, shape index: {}]   ;;  %s8462_s16 = inlined_call_operand.vmem [shape: f32[2,1,64], index: 16, kind: input, shape index: {}]   ;;  %s8463_s17 = inlined_call_operand.hbm [shape: f32[2,64,128], index: 17, kind: input, shape index: {}]   ;;  %s8464_s18 = inlined_call_operand.vmem [shape: f32[2,1,128], index: 18, kind: input, shape index: {}]   ;;  %s8465_s19 = inlined_call_operand.vmem [shape: f32[2,128,64], index: 19, kind: input, shape index: {}]   ;;  %s8466_s20 = inlined_call_operand.vmem [shape: f32[2,1,64], index: 20, kind: input, shape index: {}]   ;;  %s8467_s21 = inlined_call_operand.vmem [shape: f32[2,1,64], index: 21, kind: input, shape index: {}]   ;;  %s8468_s22 = inlined_call_operand.vmem [shape: f32[2,1,64], index: 22, kind: input, shape index: {}]   ;;  %s8469_s23 = inlined_call_operand.hbm [shape: f32[32,64], index: 23, kind: output, shape index: {}]  }
   0x1   :  { %8486 = sst [smem:[#allocation27_spill]] %s8446_s0 }
   0x2   :  { %8487 = sst [smem:[#allocation28_spill]] %s8447_s1 }
   0x3   :  { %8488 = sst [smem:[#allocation29_spill]] %s8448_s2 }
   0x4   :  { %8489 = sst [smem:[#allocation30_spill]] %s8449_s3 }
   0x5   :  { %8490 = sst [smem:[#allocation31_spill]] %s8450_s4 }
   0x6   :  { %8491 = sst [smem:[#allocation32_spill]] %s8451_s5 }
   0x7   :  { %8492 = sst [smem:[#allocation33_spill]] %s8452_s6 }
   0x8   :  { %8493 = sst [smem:[#allocation34_spill]] %s8453_s7 }
   0x9   :  { %8494 = sst [smem:[#allocation35_spill]] %s8455_s9 }
   0xa   :  { %8495 = sst [smem:[#allocation36_spill]] %s8456_s10 }
   0xb   :  { %8496 = sst [smem:[#allocation37_spill]] %s8457_s11 }
   0xc   :  { %8497 = sst [smem:[#allocation38_spill]] %s8459_s13 }
   0xd   :  { %8498 = sst [smem:[#allocation39_spill]] %s8460_s14 }
   0xe   :  { %8499 = sst [smem:[#allocation40_spill]] %s8461_s15 }
   0xf   :  { %8500 = sst [smem:[#allocation41_spill]] %s8462_s16 }
  0x10   :  { %8501 = sst [smem:[#allocation42_spill]] %s8463_s17 }
  0x11   :  { %8502 = sst [smem:[#allocation43_spill]] %s8464_s18 }
  0x12   :  { %8503 = sst [smem:[#allocation44_spill]] %s8465_s19 }
  0x13   :  { %8504 = sst [smem:[#allocation45_spill]] %s8466_s20 }
  0x14   :  { %8505 = sst [smem:[#allocation46_spill]] %s8467_s21 }
  0x15   :  { %8506 = sst [smem:[#allocation47_spill]] %s8468_s22 }
  0x16   :  { %8507 = sst [smem:[#allocation48_spill]] %s8469_s23 }
  0x17   :  { %28 = vsyncpa [#allocation4], 0 }
  0x18   :  { %29 = vsyncpa [#allocation7], 0 }
  0x19   :  { %30 = vsyncpa [#allocation10], 0 }
  0x1a   :  { %32 = vsyncpa [#allocation10 + $0x1], 0 }
  0x1b   :  { %33 = vsyncpa [#allocation13], 0 }
  0x1c   :  { %35 = vsyncpa [#allocation13 + $0x1], 0 }
  0x1d   :  { %36 = vsyncpa [#allocation5], 0  ;;  %s7310_s4 = smov 0   ;;  %s7312_s30 = smov 0  }
  0x1e   :  { %s7314_s24 = smov 0   ;;  %s7316_s25 = smov 0  }
  0x1f LB: > { %8508 = sst [smem:[#allocation21_spill]] %s7160_s30  ;;  %s7329_s5 = sadd.s32 4294967295, %s7168_s25   ;;  %s7168_s25 = sphi %s7316_s25, %s8576_s25   ;;  %s7164_s24 = sphi %s7314_s24, %s8579_s24   ;;  %s7160_s30 = sphi %s7312_s30, %s8578_s30   ;;  %s7156_s4 = sphi %s7310_s4, %s8577_s4  }
  0x20   : > { %8509 = sst [smem:[#allocation22_spill]] %s7164_s24  ;;  %s7332_s1 = sadd.s32 1, %s7168_s25  }
  0x21   : > { %8510 = sst [smem:[#allocation23_spill]] %s7332_s1  ;;  %s265_s26 = ssub.s32 %s7168_s25, %s7332_s1 }
  0x22   : > { %s268_s2 = sadd.s32 1, %s7164_s24  ;;  %p266_p0 = scmp.eq.s32.totalorder %s265_s26, 0 }
  0x23   : > { %p275_p1 = scmp.ne.s32.totalorder %s7164_s24, %s7160_s30  ;;  %p276_p2 = scmp.eq.s32.totalorder %s7168_s25, 0 }
  0x24   : > { %p281_p3 = scmp.ne.s32.totalorder %s7160_s30, %s7156_s4  ;;  %p8475_p5 = scmp.eq.s32.totalorder %s7329_s5, 0 }
  0x25   : > { %s7342_s6 = scalar_select %p266_p0, %s7164_s24, %s268_s2  }
  0x26   : > { %p7344_p4 = por %p276_p2, %p275_p1  ;;  %p5888_p6 = scmp.ge.s32.totalorder %s7168_s25, 1 }
  0x27   : > { %8511 = sst [smem:[#allocation24_spill]] %s7342_s6  ;;  %p651_p7 = scmp.lt.s32.totalorder %s7168_s25, 3 }
  0x28   : > { %p7353_p8 = por %p8475_p5, %p281_p3  ;;  %s7170_s29 = smov [#allocation6]  }
  0x29   : > { %p7358_p10 = pnand %p5888_p6, %p651_p7  ;;  %s676_s3 = sshll.u32 %s7170_s29, 4  ;;  %s677_s3 = int_to_ptr.vmem [resolvable:$true] %s676_s3 }
  0x2a   : > { %s8513_s7 = scalar_select %p7353_p8, 1, 0 }
  0x2b   : > { %s8514_s28 = scalar_select %p7358_p10, 1, 0 }
  0x2c   : > { %p6668_p11 = pneg %p7358_p10  ;;  %p6694_p13 = scmp.lt.s32.totalorder %s7168_s25, 2 }
  0x2d   : > { %s746_s26 = sand.u32 1, %s7164_s24   ;;  %s6915_s2 = scalar_lea.vmem %s677_s3, 512 }
  0x2e   : > { %p7366_p12 = pnand %p6668_p11, %p8475_p5  ;;  %p6916_p1 = scmp.ne.s32.totalorder %s677_s3, %s6915_s2 }
  0x2f   : > { %p6923_p6 = scmp.lt.s32.totalorder %s677_s3, %s677_s3  ;;  %p6924_p7 = scmp.lt.s32.totalorder %s6915_s2, %s6915_s2 }
  0x30   : > { %s8515_s0 = scalar_select %p7366_p12, 1, 0 }
  0x31   : > { %p8478_p0 = pneg %p7366_p12  ;;  %p6925_p9 = por %p6924_p7, %p6923_p6 }
  0x33   : > { %p6918_p2 = pnand %p6916_p1, %p8478_p0 }
  0x35   : > { %p6919_p3 = pneg %p6918_p2 }
  0x37   : > { %p6926_p11 = pnand %p6925_p9, %p6919_p3 }
  0x39   : > { %6929 = shalt.err (!%p6926_p11)
}
  0x3a   : > { %s8473_s29 = smov 128   ;;  %s8476_s4 = smov 8  }
  0x3b   : > { %s8516_s1 = sld [smem:[#allocation28_spill]]  ;;  %s7386_s23 = sshll.u32 %s746_s26, 6 }
  0x3c   : > { %s7389_s2 = sshll.u32 %s7168_s25, 10  ;;  %s8517_s9 = sld [smem:[#allocation35_spill]] }
  0x3d   : > { %s748_s19 = scalar_lea.vmem [#allocation9], %s7386_s23  ;;  %p7402_p9 = pnand %p6694_p13, %p7344_p4 }
  0x3e   : > { %s755_s18 = sshll.u32 %s748_s19, 4  ;;  %s7406_s18 = int_to_ptr.vmem [resolvable:$true] %s755_s18 }
  0x3f   : > { %p7416_p2 = pneg %p7402_p9 }
  0x41   : > { %6674 = dma.hbm_to_vmem [thread:$0]  (!%p7366_p12), %s8516_s1, 512, %s677_s3, [#allocation7], %s8473_s29, %s8473_s29, %s8476_s4  }
  0x42   : > { %s7395_s20 = scalar_lea.hbm %s8517_s9, %s7389_s2  ;;  %s8519_s1 = sand.u32 1, %s7168_s25  }
  0x43   : > { %s7410_s6 = scalar_lea.sflag [#allocation10], %s8519_s1  ;;  %s6930_s21 = scalar_lea.hbm %s7395_s20, 1024 }
  0x44   : > { %p6931_p1 = scmp.ne.s32.totalorder %s7395_s20, %s6930_s21  ;;  %s6935_s3 = scalar_lea.hbm %s8517_s9, 2048 }
  0x45   : > { %p6936_p13 = scmp.lt.s32.totalorder %s7395_s20, %s8517_s9  ;;  %p6937_p6 = scmp.lt.s32.totalorder %s6935_s3, %s6930_s21 }
  0x46   : > { %p6933_p3 = pnand %p7416_p2, %p6931_p1 }
  0x47   : > { %p6938_p7 = por %p6937_p6, %p6936_p13 }
  0x48   : > { %p6934_p4 = pneg %p6933_p3 }
  0x4a   : > { %p6939_p11 = pnand %p6938_p7, %p6934_p4 }
  0x4c   : > { %6942 = shalt.err (!%p6939_p11)
}
  0x4d   : > { %s6943_s1 = scalar_lea.vmem %s7406_s18, 1024  ;;  %s7173_s4 = smov [#allocation9]  }
  0x4e   : > { %p6944_p5 = scmp.ne.s32.totalorder %s7406_s18, %s6943_s1  ;;  %s6948_s19 = sshll.u32 %s7173_s4, 4  ;;  %s6949_s19 = int_to_ptr.vmem [resolvable:$false] %s6948_s19 }
  0x4f   : > { %s6950_s27 = scalar_lea.vmem %s6949_s19, 2048  ;;  %p6951_p0 = scmp.lt.s32.totalorder %s7406_s18, %s6949_s19 }
  0x50   : > { %p6946_p1 = pnand %p6944_p5, %p7416_p2  ;;  %p6952_p8 = scmp.lt.s32.totalorder %s6950_s27, %s6943_s1 }
  0x52   : > { %p6947_p3 = pneg %p6946_p1  ;;  %p6953_p10 = por %p6952_p8, %p6951_p0 }
  0x54   : > { %p6954_p12 = pnand %p6953_p10, %p6947_p3 }
  0x56   : > { %6957 = shalt.err (!%p6954_p12)
}
  0x57   : > { %s8521_s29 = smov 8   ;;  %s8522_s21 = smov 128  }
  0x58   : > { %6681 = dma.hbm_to_vmem [thread:$0]  (!%p7402_p9), %s7395_s20, 1024, %s7406_s18, %s7410_s6, %s8522_s21, %s8522_s21, %s8521_s29  }
  0x59   : > { %s8523_s13 = sld [smem:[#allocation38_spill]]  ;;  %s802_s1 = scalar_lea.vmem [#allocation12], %s7386_s23 }
  0x5a   : > { %s809_s19 = sshll.u32 %s802_s1, 4  ;;  %s8524_s27 = sand.u32 1, %s7168_s25   ;;  %s7449_s19 = int_to_ptr.vmem [resolvable:$true] %s809_s19 }
  0x5b   : > { %s7453_s9 = scalar_lea.sflag [#allocation13], %s8524_s27 }
  0x5f   : > { %s7446_s26 = scalar_lea.hbm %s8523_s13, %s7389_s2  ;;  %s6963_s4 = scalar_lea.hbm %s8523_s13, 2048 }
  0x60   : > { %s6958_s16 = scalar_lea.hbm %s7446_s26, 1024  ;;  %p6964_p12 = scmp.lt.s32.totalorder %s7446_s26, %s8523_s13 }
  0x61   : > { %p6959_p5 = scmp.ne.s32.totalorder %s7446_s26, %s6958_s16  ;;  %p6965_p0 = scmp.lt.s32.totalorder %s6963_s4, %s6958_s16 }
  0x63   : > { %p6961_p8 = pnand %p6959_p5, %p7416_p2  ;;  %p6966_p4 = por %p6965_p0, %p6964_p12 }
  0x65   : > { %p6962_p10 = pneg %p6961_p8 }
  0x67   : > { %p6967_p13 = pnand %p6966_p4, %p6962_p10 }
  0x69   : > { %6970 = shalt.err (!%p6967_p13)
}
  0x6a   : > { %s6971_s25 = scalar_lea.vmem %s7449_s19, 1024  ;;  %s7174_s1 = smov [#allocation12]  }
  0x6b   : > { %p6972_p6 = scmp.ne.s32.totalorder %s7449_s19, %s6971_s25  ;;  %s6976_s27 = sshll.u32 %s7174_s1, 4  ;;  %s6977_s27 = int_to_ptr.vmem [resolvable:$false] %s6976_s27 }
  0x6c   : > { %s6978_s18 = scalar_lea.vmem %s6977_s27, 2048  ;;  %p6979_p1 = scmp.lt.s32.totalorder %s7449_s19, %s6977_s27 }
  0x6d   : > { %p6974_p7 = pnand %p6972_p6, %p7416_p2  ;;  %p6980_p3 = scmp.lt.s32.totalorder %s6978_s18, %s6971_s25 }
  0x6f   : > { %p6975_p11 = pneg %p6974_p7  ;;  %p6981_p5 = por %p6980_p3, %p6979_p1 }
  0x71   : > { %p6982_p8 = pnand %p6981_p5, %p6975_p11 }
  0x73   : > { %6985 = shalt.err (!%p6982_p8)
}
  0x74   : > { %6687 = dma.hbm_to_vmem [thread:$0]  (!%p7402_p9), %s7446_s26, 1024, %s7449_s19, %s7453_s9, %s8522_s21, %s8522_s21, %s8521_s29  }
  0x75   : > { %s7175_s15 = smov [#allocation3]   ;;  %s7176_s20 = smov [#allocation8]  }
  0x76   : > { %s663_s16 = sshll.u32 %s7175_s15, 4  ;;  %s689_s4 = sshll.u32 %s7176_s20, 4  ;;  %s664_s16 = int_to_ptr.vmem [resolvable:$true] %s663_s16  ;;  %s690_s4 = int_to_ptr.vmem [resolvable:$true] %s689_s4 }
  0x77   : > { %s6997_s3 = scalar_lea.vmem %s664_s16, 256  ;;  %p8525_p12 = scmp.ne.s32.totalorder %s8515_s0, 0 }
  0x78   : > { %p6998_p10 = scmp.ne.s32.totalorder %s664_s16, %s6997_s3  ;;  %p7005_p6 = scmp.lt.s32.totalorder %s664_s16, %s664_s16 }
  0x79   : > { %p8526_p0 = pneg %p8525_p12  ;;  %p7006_p7 = scmp.lt.s32.totalorder %s6997_s3, %s6997_s3 }
  0x7b   : > { %p7000_p4 = pnand %p6998_p10, %p8526_p0  ;;  %p7007_p11 = por %p7006_p7, %p7005_p6 }
  0x7d   : > { %p7001_p13 = pneg %p7000_p4 }
  0x7f   : > { %p7008_p1 = pnand %p7007_p11, %p7001_p13 }
  0x81   : > { %7011 = shalt.err (!%p7008_p1)
}
  0x82   : > { %s8527_s25 = sld [smem:[#allocation27_spill]]  ;;  %s7023_s1 = scalar_lea.vmem %s690_s4, 512 }
  0x83   : > { %p7024_p3 = scmp.ne.s32.totalorder %s690_s4, %s7023_s1  ;;  %p8528_p5 = pmov %p8526_p0 }
  0x84   : > { %p7031_p0 = scmp.lt.s32.totalorder %s690_s4, %s690_s4  ;;  %p7032_p4 = scmp.lt.s32.totalorder %s7023_s1, %s7023_s1 }
  0x85   : > { %p7026_p8 = pnand %p7024_p3, %p8528_p5 }
  0x86   : > { %p7033_p13 = por %p7032_p4, %p7031_p0 }
  0x87   : > { %p7027_p10 = pneg %p7026_p8 }
  0x88   : > { %6671 = dma.hbm_to_vmem [thread:$0]  (!%p8525_p12), %s8527_s25, 256, %s664_s16, [#allocation4], %s8522_s21, %s8522_s21, %s8521_s29  }
  0x89   : > { %p7034_p6 = pnand %p7033_p13, %p7027_p10 }
  0x8b   : > { %7037 = shalt.err (!%p7034_p6)
}
  0x8c   : > { %s8529_s15 = sld [smem:[#allocation29_spill]]  ;;  %s775_s26 = scalar_lea.vmem [#allocation11], %s7386_s23 }
  0x8d   : > { %s8530_s11 = sld [smem:[#allocation37_spill]]  ;;  %s782_s0 = sshll.u32 %s775_s26, 4  ;;  %s783_s0 = int_to_ptr.vmem [resolvable:$true] %s782_s0 }
  0x92   : > { %6677 = dma.hbm_to_vmem [thread:$0]  (!%p8525_p12), %s8529_s15, 512, %s690_s4, [#allocation7], %s8522_s21, %s8522_s21, %s8521_s29  }
  0x93   : > { %s7505_s3 = scalar_lea.hbm %s8530_s11, %s7389_s2  ;;  %s7043_s4 = scalar_lea.hbm %s8530_s11, 2048 }
  0x94   : > { %s7038_s19 = scalar_lea.hbm %s7505_s3, 1024  ;;  %p7044_p12 = scmp.lt.s32.totalorder %s7505_s3, %s8530_s11 }
  0x95   : > { %p7039_p7 = scmp.ne.s32.totalorder %s7505_s3, %s7038_s19  ;;  %p7045_p3 = scmp.lt.s32.totalorder %s7043_s4, %s7038_s19 }
  0x97   : > { %p7041_p11 = pnand %p7039_p7, %p7416_p2  ;;  %p7046_p5 = por %p7045_p3, %p7044_p12 }
  0x99   : > { %p7042_p1 = pneg %p7041_p11 }
  0x9b   : > { %p7047_p8 = pnand %p7046_p5, %p7042_p1 }
  0x9d   : > { %7050 = shalt.err (!%p7047_p8)
}
  0x9e   : > { %s7051_s15 = scalar_lea.vmem %s783_s0, 1024  ;;  %s7177_s16 = smov [#allocation11]  }
  0x9f   : > { %p7052_p10 = scmp.ne.s32.totalorder %s783_s0, %s7051_s15  ;;  %s7056_s20 = sshll.u32 %s7177_s16, 4  ;;  %s7057_s20 = int_to_ptr.vmem [resolvable:$false] %s7056_s20 }
  0xa0   : > { %s7058_s26 = scalar_lea.vmem %s7057_s20, 2048  ;;  %p7059_p13 = scmp.lt.s32.totalorder %s783_s0, %s7057_s20 }
  0xa1   : > { %p7054_p0 = pnand %p7052_p10, %p7416_p2  ;;  %p7060_p6 = scmp.lt.s32.totalorder %s7058_s26, %s7051_s15 }
  0xa3   : > { %p7055_p4 = pneg %p7054_p0  ;;  %p7061_p7 = por %p7060_p6, %p7059_p13 }
  0xa5   : > { %p7062_p11 = pnand %p7061_p7, %p7055_p4 }
  0xa7   : > { %7065 = shalt.err (!%p7062_p11)
}
  0xa8   : > { %6684 = dma.hbm_to_vmem [thread:$0]  (!%p7402_p9), %s7505_s3, 1024, %s783_s0, %s7410_s6, %s8522_s21, %s8522_s21, %s8521_s29  }
  0xa9   : > { %s8531_s17 = sld [smem:[#allocation42_spill]]  ;;  %s841_s4 = scalar_lea.vmem [#allocation14], %s7386_s23 }
  0xaa   : > { %s848_s27 = sshll.u32 %s841_s4, 4  ;;  %s849_s27 = int_to_ptr.vmem [resolvable:$true] %s848_s27 }
  0xaf   : > { %s7532_s1 = scalar_lea.hbm %s8531_s17, %s7389_s2  ;;  %s7071_s6 = scalar_lea.hbm %s8531_s17, 2048 }
  0xb0   : > { %s7066_s18 = scalar_lea.hbm %s7532_s1, 1024  ;;  %p7072_p5 = scmp.lt.s32.totalorder %s7532_s1, %s8531_s17 }
  0xb1   : > { %p7067_p1 = scmp.ne.s32.totalorder %s7532_s1, %s7066_s18  ;;  %p7073_p8 = scmp.lt.s32.totalorder %s7071_s6, %s7066_s18 }
  0xb3   : > { %p7069_p12 = pnand %p7067_p1, %p7416_p2  ;;  %p7074_p10 = por %p7073_p8, %p7072_p5 }
  0xb5   : > { %p7070_p3 = pneg %p7069_p12 }
  0xb7   : > { %p7075_p0 = pnand %p7074_p10, %p7070_p3 }
  0xb9   : > { %7078 = shalt.err (!%p7075_p0)
}
  0xba   : > { %s7079_s23 = scalar_lea.vmem %s849_s27, 1024  ;;  %s7178_s2 = smov [#allocation14]  }
  0xbb   : > { %p7080_p4 = scmp.ne.s32.totalorder %s849_s27, %s7079_s23  ;;  %s7084_s20 = sshll.u32 %s7178_s2, 4  ;;  %s7085_s20 = int_to_ptr.vmem [resolvable:$false] %s7084_s20 }
  0xbc   : > { %s7086_s26 = scalar_lea.vmem %s7085_s20, 2048  ;;  %p7087_p7 = scmp.lt.s32.totalorder %s849_s27, %s7085_s20 }
  0xbd   : > { %p7082_p13 = pnand %p7080_p4, %p7416_p2  ;;  %p7088_p11 = scmp.lt.s32.totalorder %s7086_s26, %s7079_s23 }
  0xbf   : > { %p7083_p6 = pneg %p7082_p13  ;;  %p7089_p1 = por %p7088_p11, %p7087_p7 }
  0xc1   : > { %p7090_p12 = pnand %p7089_p1, %p7083_p6 }
  0xc3   : > { %7093 = shalt.err (!%p7090_p12)
}
  0xc4   : > { %6690 = dma.hbm_to_vmem [thread:$0]  (!%p7402_p9), %s7532_s1, 1024, %s849_s27, %s7453_s9, %s8522_s21, %s8522_s21, %s8521_s29  }
  0xc5   : > { %p8532_p2 = scmp.ne.s32.totalorder %s8514_s28, 0 }
  0xc7   : > { %892 = sbr.rel (%p8532_p2) target bundleno = 7562 (0x1d8a), region = 112 }
  0xcc   : > { %p8533_p3 = scmp.eq.s32.totalorder %s7329_s5, 0 }
  0xce   : > { %7135 = dma.done.wait (%p8533_p3), [#allocation4], 256   ;;  %p8534_p5 = pmov %p8533_p3 }
  0xcf   : > { %p8535_p8 = pmov %p8533_p3 }
  0xd0   : > { %7137 = vsyncadd (%p8534_p5), [#allocation4], 4294967040 }
  0xd1   : > { %7139 = dma.done.wait (%p8535_p8), [#allocation7], 1024   ;;  %p8536_p10 = pmov %p8533_p3 }
  0xd2   : > { %s906_s24 = sand.u32 1, %s7329_s5   ;;  %s908_s9 = sand.u32 1, %s7160_s30  }
  0xd3   : > { %7141 = vsyncadd (%p8536_p10), [#allocation7], 4294966272  ;;  %s7567_s22 = sshll.u32 %s908_s9, 6  ;;  %s907_s28 = scalar_lea.sflag [#allocation10], %s906_s24 }
  0xd4   : > { %s7570_s29 = scalar_lea.vmem [#allocation9], %s7567_s22  ;;  %p8537_p9 = scmp.ne.s32.totalorder %s8513_s7, 0 }
  0xd6   : > { %7143 = dma.done.wait (%p8537_p9), %s907_s28, 2048  }
  0xd7   : > { %7145 = vsyncadd (%p8537_p9), %s907_s28, 4294965248  ;;  %s7577_s21 = scalar_lea.vmem [#allocation11], %s7567_s22  ;;  %s925_s19 = scalar_lea.sflag [#allocation13], %s906_s24 }
  0xd8   : > { %8538 = sst [smem:[#allocation25_spill]] %s7577_s21  ;;  %s7580_s25 = scalar_lea.vmem [#allocation12], %s7567_s22 }
  0xd9   : > { %8539 = sst [smem:[#allocation26_spill]] %s7580_s25 }
  0xda   : > { %7147 = dma.done.wait (%p8537_p9), %s925_s19, 2048  }
  0xdb   : > { %7149 = vsyncadd (%p8537_p9), %s925_s19, 4294965248  ;;  %p1065_p0 = scmp.lt.s32.totalorder %s7329_s5, 1  ;;  %s8540_s15 = sld [smem:[#allocation30_spill]] }
  0xdc   : > { %s8541_s0 = sld [smem:[#allocation31_spill]]  ;;  %s7662_s6 = scalar_lea.vmem [#allocation14], %s7567_s22 }
  0xdd   : > { %s7588_s1 = scalar_select %p1065_p0, %s7329_s5, 1 }
  0xde   : > { %s8543_s11 = sld [smem:[#allocation32_spill]]  ;;  %p8554_p4 = scmp.ne.s32.totalorder %s7329_s5, 0 }
  0xdf   : > { %s6061_s4 = sshll.u32 %s7588_s1, 7  ;;  %s5915_s7 = sshll.u32 %s7588_s1, 1 }
  0xe0   : > { %s6062_s2 = sshll.u32 %s7588_s1, 6  ;;  %s8549_s3 = sld [smem:[#allocation43_spill]] }
  0xe1   : > { %s7595_s16 = scalar_lea.vmem %s8540_s15, %s6061_s4  ;;  %s8550_s21 = sld [smem:[#allocation44_spill]] }
  0xe2   : > { %s7600_s23 = scalar_lea.vmem %s8541_s0, %s5915_s7  ;;  %s8551_s28 = sld [smem:[#allocation45_spill]] }
  0xe3   : > { %s8552_s19 = sld [smem:[#allocation46_spill]] }
  0xe4   : > { %s7610_s13 = scalar_lea.vmem %s8543_s11, %s6062_s2  ;;  %s8553_s15 = sld [smem:[#allocation47_spill]] }
  0xe6   : > { %s1105_s0 = scalar_lea.vmem %s8549_s3, %s7588_s1  ;;  %1123 = sbr.rel (%p8554_p4) target bundleno = 238 (0xee), region = 144 }
  0xe7   : > { %s7647_s20 = scalar_lea.vmem %s8550_s21, %s6061_s4 }
  0xe8   : > { %s1113_s11 = scalar_lea.vmem %s8551_s28, %s7588_s1 }
  0xe9   : > { %s1116_s27 = scalar_lea.vmem %s8552_s19, %s7588_s1 }
  0xea   : > { %s1119_s30 = scalar_lea.vmem %s8553_s15, %s7588_s1 }
  0xeb   : > { %v1124_v0 = vld [vmem:[#allocation8] sm:$0xff]  ;;  %vm1128_vm0 = vcmask 523264   ;;  %v1125_v1 = vld [vmem:[#allocation8 + $0x8] sm:$0xff]  ;;  %v1126_v2 = vld [vmem:[#allocation8 + $0x10] sm:$0xff] }
  0xec   : > { %1129 = vst.msk [vmem:[#allocation15] sm:$0xff] %vm1128_vm0, %v1124_v0  ;;  %1130 = vst.msk [vmem:[#allocation15 + $0x8] sm:$0xff] %vm1128_vm0, %v1125_v1  ;;  %v1127_v3 = vld [vmem:[#allocation8 + $0x18] sm:$0xff] }
  0xed   : > { %1131 = vst.msk [vmem:[#allocation15 + $0x10] sm:$0xff] %vm1128_vm0, %v1126_v2  ;;  %1132 = vst.msk [vmem:[#allocation15 + $0x18] sm:$0xff] %vm1128_vm0, %v1127_v3 }
  0xee PF: > { %v1158_v4 = vld [vmem:[%s7595_s16 + $0x78] sm:$0xff]  ;;  %v1157_v5 = vld [vmem:[%s7595_s16 + $0x70] sm:$0xff]  ;;  %v1156_v6 = vld [vmem:[%s7595_s16 + $0x68] sm:$0xff]  ;;  %v7179_v8 = vmov 0.0   ;;  %vm1171_vm1 = vcmask 523264   ;;  %v1161_v25 = vlaneseq  ;;  %vm1283_vm2 = vcmask 130048   ;;  %s8560_s19 = scalar_lea.vmem %s8454_s8, %s7588_s1 }
  0xef   : > { %1200 = vmatprep.subr.mxu0 %v1158_v4  ;;  %v1155_v7 = vld [vmem:[%s7595_s16 + $0x60] sm:$0xff]  ;;  %1248 = vmatprep.mubr.f32.mxu0 %v7179_v8  ;;  %v1154_v9 = vld [vmem:[%s7595_s16 + $0x58] sm:$0xff]  ;;  %v1153_v10 = vld [vmem:[%s7595_s16 + $0x50] sm:$0xff]  ;;  %s7180_s10 = smov 64   ;;  %s7181_s14 = smov 48   ;;  %vm2969_vm3 = vcmask 261120  }
  0xf0   : > { %1201 = vmatpush1.msra.mxu0 %v1157_v5  ;;  %v1152_v11 = vld [vmem:[%s7595_s16 + $0x48] sm:$0xff]  ;;  %v1151_v12 = vld [vmem:[%s7595_s16 + $0x40] sm:$0xff]  ;;  %v1150_v13 = vld [vmem:[%s7595_s16 + $0x38] sm:$0xff]  ;;  %v1162_v26 = vshrl.u32 %v1161_v25, 7  ;;  %s7182_s22 = smov 112   ;;  %s7183_s25 = smov 32  }
  0xf1   : > { %1202 = vmatprep.subr.mxu0 %v1156_v6  ;;  %v1149_v14 = vld [vmem:[%s7595_s16 + $0x30] sm:$0xff]  ;;  %v1148_v15 = vld [vmem:[%s7595_s16 + $0x28] sm:$0xff]  ;;  %v1147_v16 = vld [vmem:[%s7595_s16 + $0x20] sm:$0xff]  ;;  %s7184_s4 = smov 96   ;;  %vm2974_vm4 = vcmask 392192   ;;  %s8555_s7 = sld [smem:[#allocation33_spill]] }
  0xf2   : > { %1203 = vmatpush1.msra.mxu0 %v1155_v7  ;;  %v1146_v17 = vld [vmem:[%s7595_s16 + $0x18] sm:$0xff]  ;;  %v1145_v18 = vld [vmem:[%s7595_s16 + $0x10] sm:$0xff]  ;;  %v1144_v19 = vld [vmem:[%s7595_s16 + $0x8] sm:$0xff]  ;;  %v1163_v27 = vsub.s32 0, %v1162_v26  ;;  %v1167_v35 = vsub.s32 1, %v1162_v26  ;;  %s8557_s18 = sld [smem:[#allocation25_spill]] }
  0xf3   : > { %1204 = vmatprep.subr.mxu0 %v1154_v9  ;;  %v1143_v20 = vld [vmem:[%s7595_s16] sm:$0xff]  ;;  %v1133_v21 = vld [vmem:[#allocation15] sm:$0xff]  ;;  %v1134_v22 = vld [vmem:[#allocation15 + $0x8] sm:$0xff]  ;;  %s7185_s16 = smov 16   ;;  %s8558_s21 = sld [smem:[#allocation34_spill]] }
  0xf4   : > { %1205 = vmatpush1.msra.mxu0 %v1153_v10  ;;  %v1135_v23 = vld [vmem:[#allocation15 + $0x10] sm:$0xff]  ;;  %v1136_v24 = vld [vmem:[#allocation15 + $0x18] sm:$0xff]  ;;  %p6698_p13 = scmp.eq.s32.totalorder %s7329_s5, 1 }
  0xf5   : > { %1206 = vmatprep.subr.mxu0 %v1152_v11  ;;  %v1159_v28 = vld [vmem:[%s7600_s23] sm:$0x3]  ;;  %v7744_v56 = vld [vmem:[#allocation3 + $0x8] sm:$0xff]  ;;  %s7186_s23 = smov 80  }
  0xf6   : > { %1207 = vmatpush1.msra.mxu0 %v1151_v12  ;;  %v1164_v29 = vrot.slane %v1159_v28, %v1163_v27  ;;  %v1168_v39 = vrot.slane %v1159_v28, %v1167_v35  ;;  %v7746_v58 = vld [vmem:[#allocation3] sm:$0xff] }
  0xf7   : > { %1208 = vmatprep.subr.mxu0 %v1150_v13  ;;  %s8556_s26 = scalar_lea.vmem %s8555_s7, %s7588_s1 }
  0xf8   : > { %1209 = vmatpush1.msra.mxu0 %v1149_v14 }
  0xf9   : > { %1210 = vmatprep.subr.mxu0 %v1148_v15  ;;  %s8559_s24 = scalar_lea.vmem %s8558_s21, %s7588_s1 }
  0xfa   : > { %1211 = vmatpush1.msra.mxu0 %v1147_v16 }
  0xfb   : > { %1212 = vmatprep.subr.mxu0 %v1146_v17 }
  0xfc   : > { %1213 = vmatpush1.msra.mxu0 %v1145_v18 }
  0xfd   : > { %1214 = vmatprep.subr.mxu0 %v1144_v19 }
  0xfe   : > { %1215 = vmatpush1.msra.mxu0 %v1143_v20 }
  0xff   : > { %5921 = vmatmul.mubr.msk.f32.vlgmr.msra.gmra.mxu0 %vm1171_vm1, %v1133_v21 }
 0x100   : > { %1254 = vmatprep.mubr.f32.mxu0 %v7179_v8 }
 0x103   : > { %5922 = vmatmul.mubr.msk.f32.gmra.mxu0 %vm1171_vm1, %v1134_v22 }
 0x104   : > { %1260 = vmatprep.mubr.f32.mxu0 %v7179_v8 }
 0x107   : > { %5923 = vmatmul.mubr.msk.f32.gmra.mxu0 %vm1171_vm1, %v1135_v23 }
 0x108   : > { %1266 = vmatprep.mubr.f32.mxu0 %v7179_v8 }
 0x10b   : > { %5924 = vmatmul.mubr.msk.f32.gmra.mxu0 %vm1171_vm1, %v1136_v24 }
 0x1bf   : > { %v1250_v30 = vpop.f32.mrf.mxu0 }
 0x1c0   : > { %v7687_v31 = vadd.f32 %v1250_v30, %v1164_v29 }
 0x1c1   : > { %v1252_v32 = vpop.f32.mrf.mxu0 }
 0x1c2   : > { %v7690_v33 = vmul.f32 0.25, %v7687_v31  ;;  %v7734_v54 = vadd.f32 %v1252_v32, %v1168_v39 }
 0x1c3   : > { %v1256_v34 = vpop.f32.mrf.mxu0 }
 0x1c4   : > { %v7692_v36 = vadd.f32 %v1256_v34, %v1164_v29  ;;  %6276 = vmatprep.mubr.msk.f32.mxu1 %vm1283_vm2, %v7690_v33 }
 0x1c5   : > { %v1258_v37 = vpop.f32.mrf.mxu0 }
 0x1c6   : > { %1281 = vrot.lane.b32.xlu0 %v7692_v36, %s7180_s10  ;;  %v7715_v47 = vmul.f32 0.25, %v7692_v36  ;;  %v7726_v51 = vadd.f32 %v1258_v37, %v1168_v39 }
 0x1c7   : > { %v1262_v38 = vpop.f32.mrf.mxu0 }
 0x1c8   : > { %v7706_v44 = vadd.f32 %v1262_v38, %v1164_v29 }
 0x1c9   : > { %v1264_v40 = vpop.f32.mrf.mxu0 }
 0x1ca   : > { %v7698_v41 = vadd.f32 %v1264_v40, %v1168_v39  ;;  %1279 = vrot.lane.b32.xlu0 %v7687_v31, %s7180_s10  ;;  %v7718_v49 = vmul.f32 0.25, %v7706_v44 }
 0x1cb   : > { %v1268_v42 = vpop.f32.mrf.mxu0 }
 0x1cc   : > { %v7702_v43 = vadd.f32 %v1268_v42, %v1164_v29 }
 0x1cd   : > { %v1270_v53 = vpop.f32.mrf.mxu0 }
 0x1ce   : > { %1373 = vrot.lane.b32.xlu1 %v7702_v43, %s7180_s10  ;;  %v7732_v52 = vmul.f32 0.25, %v7702_v43  ;;  %v7739_v55 = vadd.f32 %v1270_v53, %v1168_v39 }
 0x1d2   : > { %1371 = vrot.lane.b32.xlu1 %v7706_v44, %s7180_s10 }
 0x238   : > { %v1282_v45 = vpop.permute.xlu0 %1281 }
 0x239   : > { %6272 = vmatprep.subr.msk.mxu1 %vm1283_vm2, %v1282_v45 }
 0x23a   : > { %6273 = vmatpush3.xpose.msk.msra.mxu1 %vm1283_vm2, %v1282_v45 }
 0x23c   : > { %v1280_v46 = vpop.permute.xlu0 %1279 }
 0x23d   : > { %6274 = vmatprep.subr.msk.mxu1 %vm1283_vm2, %v1280_v46 }
 0x23e   : > { %6275 = vmatpush3.xpose.msk.msra.mxu1 %vm1283_vm2, %v1280_v46 }
 0x240   : > { %v1374_v48 = vpop.permute.xlu1 %1373 }
 0x241   : > { %6277 = vmatmul.mubr.msk.f32.vlgmr.msra.gmra.mxu1 %vm1283_vm2, %v7715_v47  ;;  %6279 = vmatprep.subr.msk.mxu1 %vm1283_vm2, %v1374_v48 }
 0x242   : > { %6280 = vmatpush3.xpose.msk.msra.mxu1 %vm1283_vm2, %v1374_v48  ;;  %6283 = vmatprep.mubr.msk.f32.mxu1 %vm1283_vm2, %v7718_v49 }
 0x244   : > { %v1372_v50 = vpop.permute.xlu1 %1371 }
 0x245   : > { %6281 = vmatprep.subr.msk.mxu1 %vm1283_vm2, %v1372_v50 }
 0x246   : > { %6282 = vmatpush3.xpose.msk.msra.mxu1 %vm1283_vm2, %v1372_v50 }
 0x247   : > { %6286 = vmatprep.subr.mxu1 %v7726_v51 }
 0x249   : > { %6284 = vmatmul.mubr.msk.f32.vlgmr.msra.gmra.mxu1 %vm1283_vm2, %v7732_v52 }
 0x24a   : > { %6287 = vmatpush3.msra.mxu1 %v7726_v51 }
 0x24b   : > { %6288 = vmatprep.subr.mxu1 %v7734_v54 }
 0x24c   : > { %6289 = vmatpush3.msra.mxu1 %v7734_v54 }
 0x24d   : > { %6293 = vmatprep.subr.mxu1 %v7739_v55 }
 0x301   : > { %v6278_v57 = vpop.f32.mrf.mxu1 }
 0x302   : > { %v1366_v59 = vadd.f32 %v6278_v57, %v7744_v56 }
 0x303   : > { %v1360_v60 = vpop.f32.mrf.mxu1 }
 0x304   : > { %v1361_v61 = vadd.f32 %v1360_v60, %v7746_v58  ;;  %v1463_v62 = vsel %vm1283_vm2, %v1366_v59, -inf }
 0x305   : > { %1464 = vmax.xlane.f32.xlu1 %v1463_v62 }
 0x306   : > { %v1460_v63 = vsel %vm1283_vm2, %v1361_v61, -inf }
 0x307   : > { %1461 = vmax.xlane.f32.xlu0 %v1460_v63 }
 0x309   : > { %v6285_v0 = vpop.f32.mrf.mxu1 }
 0x30a   : > { %v1457_v3 = vadd.f32 %v6285_v0, %v7744_v56 }
 0x30b   : > { %v1451_v1 = vpop.f32.mrf.mxu1 }
 0x30c   : > { %v1452_v2 = vadd.f32 %v1451_v1, %v7746_v58  ;;  %v1469_v5 = vsel %vm1283_vm2, %v1457_v3, -inf }
 0x30e   : > { %v1466_v4 = vsel %vm1283_vm2, %v1452_v2, -inf }
 0x30f   : > { %1467 = vmax.xlane.f32.xlu0 %v1466_v4 }
 0x313   : > { %1470 = vmax.xlane.f32.xlu0 %v1469_v5 }
 0x316   : > { %1676 = vrot.lane.b32.xlu1 %v7692_v36, %s7181_s14 }
 0x31a   : > { %1670 = vrot.lane.b32.xlu1 %v7690_v33, %s7182_s22 }
 0x31e   : > { %1767 = vrot.lane.b32.xlu1 %v7702_v43, %s7181_s14 }
 0x329   : > { %1674 = vrot.lane.b32.xlu0 %v7687_v31, %s7181_s14 }
 0x38e   : > { %v1465_v6 = vpop.xlane.xlu1 %1464 }
 0x38f   : > { %v1473_v7 = vsub.f32 %v1366_v59, %v1465_v6 }
 0x390   : > { %v1462_v8 = vpop.xlane.xlu0 %1461 }
 0x391   : > { %v1478_v9 = vmul.f32 1.442695, %v1473_v7  ;;  %v1472_v10 = vsub.f32 %v1361_v61, %v1462_v8 }
 0x392   : > { %v1677_v11 = vpop.permute.xlu1 %1676 }
 0x393   : > { %6748 = vpow2.f32 %v1478_v9  ;;  %v1476_v12 = vmul.f32 1.442695, %v1472_v10  ;;  %6300 = vmatprep.subr.msk.mxu0 %vm1283_vm2, %v1677_v11 }
 0x394   : > { %6301 = vmatpush3.xpose.msk.msra.mxu0 %vm1283_vm2, %v1677_v11 }
 0x395   : > { %6750 = vpow2.f32 %v1476_v12 }
 0x396   : > { %v1671_v13 = vpop.permute.xlu1 %1670 }
 0x397   : > { %6304 = vmatprep.mubr.msk.f32.mxu0 %vm1283_vm2, %v1671_v13 }
 0x398   : > { %v1468_v14 = vpop.xlane.xlu0 %1467 }
 0x399   : > { %v1474_v25 = vsub.f32 %v1452_v2, %v1468_v14 }
 0x39a   : > { %v1768_v29 = vpop.permute.xlu1 %1767 }
 0x39b   : > { %v1480_v26 = vmul.f32 1.442695, %v1474_v25 }
 0x39c   : > { %v1471_v15 = vpop.xlane.xlu0 %1470 }
 0x39d   : > { %v1475_v16 = vsub.f32 %v1457_v3, %v1471_v15 }
 0x39f   : > { %v1482_v17 = vmul.f32 1.442695, %v1475_v16 }
 0x3a0   : > { %v6749_v18 = vpop.eup %6748  ;;  %v1675_v19 = vpop.permute.xlu0 %1674 }
 0x3a1   : > { %6752 = vpow2.f32 %v1482_v17  ;;  %6302 = vmatprep.subr.msk.mxu0 %vm1283_vm2, %v1675_v19  ;;  %v1487_v20 = vsel %vm1283_vm2, %v6749_v18, 0.0 }
 0x3a2   : > { %v6751_v21 = vpop.eup %6750  ;;  %1488 = vadd.xlane.f32.xlu0 %v1487_v20  ;;  %6303 = vmatpush3.xpose.msk.msra.mxu0 %vm1283_vm2, %v1675_v19  ;;  %6754 = vpow2.f32 %v1480_v26 }
 0x3a3   : > { %v1484_v22 = vsel %vm1283_vm2, %v6751_v21, 0.0 }
 0x3a4   : > { %1485 = vadd.xlane.f32.xlu1 %v1484_v22 }
 0x3ae   : > { %v6753_v23 = vpop.eup %6752 }
 0x3af   : > { %v1493_v24 = vsel %vm1283_vm2, %v6753_v23, 0.0  ;;  %v6755_v27 = vpop.eup %6754 }
 0x3b0   : > { %1494 = vadd.xlane.f32.xlu0 %v1493_v24  ;;  %v1490_v28 = vsel %vm1283_vm2, %v6755_v27, 0.0 }
 0x3b5   : > { %1765 = vrot.lane.b32.xlu1 %v7706_v44, %s7181_s14 }
 0x3c6   : > { %1672 = vrot.lane.b32.xlu0 %v7715_v47, %s7182_s22 }
 0x3ca   : > { %1761 = vrot.lane.b32.xlu0 %v7718_v49, %s7182_s22 }
 0x3d9   : > { %1491 = vadd.xlane.f32.xlu1 %v1490_v28 }
 0x3ea   : > { %1763 = vrot.lane.b32.xlu1 %v7732_v52, %s7182_s22 }
 0x42b   : > { %v1489_v30 = vpop.xlane.xlu0 %1488 }
 0x42c   : > { %6756 = vrcp.f32 %v1489_v30 }
 0x42d   : > { %v1486_v32 = vpop.xlane.xlu1 %1485 }
 0x42e   : > { %6758 = vrcp.f32 %v1486_v32 }
 0x431   : > { %v1766_v42 = vpop.permute.xlu1 %1765 }
 0x439   : > { %v1495_v34 = vpop.xlane.xlu0 %1494  ;;  %v6757_v35 = vpop.eup %6756 }
 0x43a   : > { %v1499_v40 = vmul.f32 %v6757_v35, %v6749_v18  ;;  %6760 = vrcp.f32 %v1495_v34 }
 0x43b   : > { %v6759_v37 = vpop.eup %6758 }
 0x43c   : > { %v1497_v38 = vmul.f32 %v6759_v37, %v6751_v21 }
 0x43d   : > { %v1673_v39 = vpop.permute.xlu0 %1672 }
 0x43e   : > { %6290 = vmatprep.mubr.msk.f32.mxu1 %vm1283_vm2, %v1497_v38  ;;  %6305 = vmatmul.mubr.msk.f32.vlgmr.msra.gmra.mxu0 %vm1283_vm2, %v1673_v39 }
 0x43f   : > { %6291 = vmatmul.mubr.msk.f32.vlgmr.msra.gmra.mxu1 %vm1283_vm2, %v1499_v40 }
 0x440   : > { %6294 = vmatpush3.msra.mxu1 %v7739_v55 }
 0x441   : > { %6295 = vmatprep.subr.mxu1 %v7698_v41  ;;  %v1762_v57 = vpop.permute.xlu0 %1761 }
 0x442   : > { %6296 = vmatpush3.msra.mxu1 %v7698_v41 }
 0x443   : > { %6307 = vmatprep.subr.msk.mxu1 %vm1283_vm2, %v1768_v29 }
 0x447   : > { %v6761_v46 = vpop.eup %6760 }
 0x448   : > { %v1503_v53 = vmul.f32 %v6761_v46, %v6753_v23 }
 0x462   : > { %v1492_v45 = vpop.xlane.xlu1 %1491 }
 0x463   : > { %6762 = vrcp.f32 %v1492_v45 }
 0x466   : > { %v1764_v59 = vpop.permute.xlu1 %1763 }
 0x470   : > { %v6763_v48 = vpop.eup %6762 }
 0x471   : > { %v1501_v50 = vmul.f32 %v6763_v48, %v6755_v27 }
 0x473   : > { %6297 = vmatprep.mubr.msk.f32.mxu1 %vm1283_vm2, %v1501_v50 }
 0x474   : > { %6298 = vmatmul.mubr.msk.f32.vlgmr.msra.gmra.mxu1 %vm1283_vm2, %v1503_v53 }
 0x475   : > { %6308 = vmatpush3.xpose.msk.msra.mxu1 %vm1283_vm2, %v1768_v29  ;;  %6311 = vmatprep.mubr.msk.f32.mxu1 %vm1283_vm2, %v1762_v57 }
 0x476   : > { %6309 = vmatprep.subr.msk.mxu1 %vm1283_vm2, %v1766_v42 }
 0x479   : > { %6310 = vmatpush3.xpose.msk.msra.mxu1 %vm1283_vm2, %v1766_v42 }
 0x47c   : > { %6312 = vmatmul.mubr.msk.f32.vlgmr.msra.gmra.mxu1 %vm1283_vm2, %v1764_v59 }
 0x4fe   : > { %v6306_v60 = vpop.f32.mrf.mxu0 }
 0x4ff   : > { %v1758_v61 = vadd.f32 %v6306_v60, %v7744_v56  ;;  %v6292_v62 = vpop.f32.mrf.mxu1 }
 0x500   : > { %1667 = vst.msk [vmem:[#allocation2 + $0x8] sm:$0xff] %vm1283_vm2, %v6292_v62  ;;  %v1752_v63 = vpop.f32.mrf.mxu0 }
 0x501   : > { %v1753_v0 = vadd.f32 %v1752_v63, %v7746_v58  ;;  %v1576_v1 = vpop.f32.mrf.mxu1  ;;  %v1855_v2 = vsel %vm1283_vm2, %v1758_v61, -inf }
 0x502   : > { %1666 = vst.msk [vmem:[#allocation2] sm:$0xff] %vm1283_vm2, %v1576_v1  ;;  %1856 = vmax.xlane.f32.xlu1 %v1855_v2 }
 0x503   : > { %v1852_v3 = vsel %vm1283_vm2, %v1753_v0, -inf }
 0x504   : > { %1853 = vmax.xlane.f32.xlu0 %v1852_v3 }
 0x534   : > { %v6299_v4 = vpop.f32.mrf.mxu1 }
 0x535   : > { %1669 = vst.msk [vmem:[#allocation2 + $0x48] sm:$0xff] %vm1283_vm2, %v6299_v4 }
 0x536   : > { %v1657_v5 = vpop.f32.mrf.mxu1 }
 0x537   : > { %1668 = vst.msk [vmem:[#allocation2 + $0x40] sm:$0xff] %vm1283_vm2, %v1657_v5 }
 0x53c   : > { %v6313_v6 = vpop.f32.mrf.mxu1 }
 0x53d   : > { %v1849_v9 = vadd.f32 %v6313_v6, %v7744_v56 }
 0x53e   : > { %v1843_v7 = vpop.f32.mrf.mxu1 }
 0x53f   : > { %v1844_v8 = vadd.f32 %v1843_v7, %v7746_v58  ;;  %v1861_v11 = vsel %vm1283_vm2, %v1849_v9, -inf }
 0x541   : > { %v1858_v10 = vsel %vm1283_vm2, %v1844_v8, -inf }
 0x542   : > { %1859 = vmax.xlane.f32.xlu0 %v1858_v10 }
 0x546   : > { %1862 = vmax.xlane.f32.xlu0 %v1861_v11 }
 0x58b   : > { %v1857_v12 = vpop.xlane.xlu1 %1856 }
 0x58c   : > { %v1865_v13 = vsub.f32 %v1758_v61, %v1857_v12 }
 0x58d   : > { %v1854_v14 = vpop.xlane.xlu0 %1853 }
 0x58e   : > { %v1870_v15 = vmul.f32 1.442695, %v1865_v13  ;;  %v1864_v16 = vsub.f32 %v1753_v0, %v1854_v14 }
 0x590   : > { %6764 = vpow2.f32 %v1870_v15  ;;  %v1868_v17 = vmul.f32 1.442695, %v1864_v16 }
 0x592   : > { %6766 = vpow2.f32 %v1868_v17 }
 0x59d   : > { %v6765_v18 = vpop.eup %6764 }
 0x59e   : > { %v1879_v19 = vsel %vm1283_vm2, %v6765_v18, 0.0 }
 0x59f   : > { %v6767_v20 = vpop.eup %6766  ;;  %1880 = vadd.xlane.f32.xlu0 %v1879_v19 }
 0x5a0   : > { %v1876_v21 = vsel %vm1283_vm2, %v6767_v20, 0.0 }
 0x5a1   : > { %1877 = vadd.xlane.f32.xlu1 %v1876_v21 }
 0x5b2   : > { %1900 = vrot.lane.b32.xlu1 %v7726_v51, %s7182_s22 }
 0x5b5   : > { %1898 = vrot.lane.b32.xlu0 %v7734_v54, %s7182_s22 }
 0x5b6   : > { %2084 = vrot.lane.b32.xlu1 %v7692_v36, %s7183_s25 }
 0x5b9   : > { %2082 = vrot.lane.b32.xlu0 %v7687_v31, %s7183_s25 }
 0x5ba   : > { %1989 = vrot.lane.b32.xlu1 %v7739_v55, %s7182_s22 }
 0x5bd   : > { %2078 = vrot.lane.b32.xlu0 %v7690_v33, %s7184_s4 }
 0x5be   : > { %1987 = vrot.lane.b32.xlu1 %v7698_v41, %s7182_s22 }
 0x5c2   : > { %2175 = vrot.lane.b32.xlu1 %v7702_v43, %s7183_s25 }
 0x5c6   : > { %2173 = vrot.lane.b32.xlu1 %v7706_v44, %s7183_s25 }
 0x5cb   : > { %v1860_v22 = vpop.xlane.xlu0 %1859 }
 0x5cc   : > { %v1866_v25 = vsub.f32 %v1844_v8, %v1860_v22 }
 0x5ce   : > { %v1872_v27 = vmul.f32 1.442695, %v1866_v25 }
 0x5cf   : > { %v1863_v23 = vpop.xlane.xlu0 %1862 }
 0x5d0   : > { %v1867_v24 = vsub.f32 %v1849_v9, %v1863_v23 }
 0x5d2   : > { %v1874_v26 = vmul.f32 1.442695, %v1867_v24 }
 0x5d4   : > { %6768 = vpow2.f32 %v1874_v26 }
 0x5d5   : > { %6770 = vpow2.f32 %v1872_v27 }
 0x5e1   : > { %v6769_v28 = vpop.eup %6768 }
 0x5e2   : > { %v1885_v29 = vsel %vm1283_vm2, %v6769_v28, 0.0  ;;  %v6771_v30 = vpop.eup %6770 }
 0x5e3   : > { %1886 = vadd.xlane.f32.xlu0 %v1885_v29  ;;  %v1882_v32 = vsel %vm1283_vm2, %v6771_v30, 0.0 }
 0x5ea   : > { %1883 = vadd.xlane.f32.xlu1 %v1882_v32 }
 0x5f9   : > { %2080 = vrot.lane.b32.xlu0 %v7715_v47, %s7184_s4 }
 0x5fb   : > { %2171 = vrot.lane.b32.xlu1 %v7732_v52, %s7184_s4 }
 0x5fd   : > { %2169 = vrot.lane.b32.xlu0 %v7718_v49, %s7184_s4 }
 0x628   : > { %v1881_v34 = vpop.xlane.xlu0 %1880 }
 0x629   : > { %6772 = vrcp.f32 %v1881_v34 }
 0x62a   : > { %v1878_v35 = vpop.xlane.xlu1 %1877 }
 0x62b   : > { %6774 = vrcp.f32 %v1878_v35 }
 0x62c   : > { %v1899_v38 = vpop.permute.xlu0 %1898 }
 0x62e   : > { %v1901_v37 = vpop.permute.xlu1 %1900 }
 0x62f   : > { %6314 = vmatprep.subr.mxu0 %v1901_v37 }
 0x630   : > { %6315 = vmatpush3.msra.mxu0 %v1901_v37  ;;  %v2083_v40 = vpop.permute.xlu0 %2082 }
 0x631   : > { %6316 = vmatprep.subr.mxu0 %v1899_v38 }
 0x632   : > { %v2085_v39 = vpop.permute.xlu1 %2084  ;;  %6317 = vmatpush3.msra.mxu0 %v1899_v38 }
 0x633   : > { %6328 = vmatprep.subr.msk.mxu0 %vm1283_vm2, %v2085_v39 }
 0x634   : > { %v2079_v57 = vpop.permute.xlu0 %2078 }
 0x636   : > { %v1990_v42 = vpop.permute.xlu1 %1989  ;;  %v6773_v45 = vpop.eup %6772 }
 0x637   : > { %6321 = vmatprep.subr.mxu1 %v1990_v42  ;;  %v1891_v53 = vmul.f32 %v6773_v45, %v6765_v18 }
 0x638   : > { %v6775_v46 = vpop.eup %6774  ;;  %6322 = vmatpush3.msra.mxu1 %v1990_v42 }
 0x639   : > { %v1889_v48 = vmul.f32 %v6775_v46, %v6767_v20 }
 0x63a   : > { %v1988_v50 = vpop.permute.xlu1 %1987 }
 0x63b   : > { %6318 = vmatprep.mubr.msk.f32.mxu0 %vm1283_vm2, %v1889_v48  ;;  %6323 = vmatprep.subr.mxu1 %v1988_v50 }
 0x63c   : > { %6319 = vmatmul.mubr.msk.f32.vlgmr.msra.gmra.mxu0 %vm1283_vm2, %v1891_v53  ;;  %6324 = vmatpush3.msra.mxu1 %v1988_v50 }
 0x63d   : > { %6329 = vmatpush3.xpose.msk.msra.mxu0 %vm1283_vm2, %v2085_v39  ;;  %6332 = vmatprep.mubr.msk.f32.mxu0 %vm1283_vm2, %v2079_v57 }
 0x63e   : > { %6330 = vmatprep.subr.msk.mxu0 %vm1283_vm2, %v2083_v40  ;;  %v2176_v59 = vpop.permute.xlu1 %2175 }
 0x63f   : > { %6335 = vmatprep.subr.msk.mxu1 %vm1283_vm2, %v2176_v59 }
 0x641   : > { %6331 = vmatpush3.xpose.msk.msra.mxu0 %vm1283_vm2, %v2083_v40 }
 0x642   : > { %v2174_v61 = vpop.permute.xlu1 %2173 }
 0x66c   : > { %v1887_v60 = vpop.xlane.xlu0 %1886 }
 0x66d   : > { %6776 = vrcp.f32 %v1887_v60 }
 0x670   : > { %v2081_v62 = vpop.permute.xlu0 %2080 }
 0x671   : > { %6333 = vmatmul.mubr.msk.f32.vlgmr.msra.gmra.mxu0 %vm1283_vm2, %v2081_v62 }
 0x673   : > { %v1884_v63 = vpop.xlane.xlu1 %1883 }
 0x674   : > { %6778 = vrcp.f32 %v1884_v63  ;;  %v2170_v4 = vpop.permute.xlu0 %2169 }
 0x677   : > { %v2172_v5 = vpop.permute.xlu1 %2171 }
 0x67a   : > { %v6777_v0 = vpop.eup %6776 }
 0x67b   : > { %v1895_v3 = vmul.f32 %v6777_v0, %v6769_v28 }
 0x681   : > { %v6779_v1 = vpop.eup %6778 }
 0x682   : > { %v1893_v2 = vmul.f32 %v6779_v1, %v6771_v30 }
 0x684   : > { %6325 = vmatprep.mubr.msk.f32.mxu1 %vm1283_vm2, %v1893_v2 }
 0x685   : > { %6326 = vmatmul.mubr.msk.f32.vlgmr.msra.gmra.mxu1 %vm1283_vm2, %v1895_v3 }
 0x686   : > { %6336 = vmatpush3.xpose.msk.msra.mxu1 %vm1283_vm2, %v2176_v59  ;;  %6339 = vmatprep.mubr.msk.f32.mxu1 %vm1283_vm2, %v2170_v4 }
 0x687   : > { %6337 = vmatprep.subr.msk.mxu1 %vm1283_vm2, %v2174_v61 }
 0x68a   : > { %6338 = vmatpush3.xpose.msk.msra.mxu1 %vm1283_vm2, %v2174_v61 }
 0x68d   : > { %6340 = vmatmul.mubr.msk.f32.vlgmr.msra.gmra.mxu1 %vm1283_vm2, %v2172_v5 }
 0x6fc   : > { %v6320_v6 = vpop.f32.mrf.mxu0 }
 0x6fd   : > { %2075 = vst.msk [vmem:[#allocation2 + $0x18] sm:$0xff] %vm1283_vm2, %v6320_v6 }
 0x6fe   : > { %v1976_v7 = vpop.f32.mrf.mxu0 }
 0x6ff   : > { %2074 = vst.msk [vmem:[#allocation2 + $0x10] sm:$0xff] %vm1283_vm2, %v1976_v7 }
 0x731   : > { %v6334_v8 = vpop.f32.mrf.mxu0 }
 0x732   : > { %v2166_v9 = vadd.f32 %v6334_v8, %v7744_v56 }
 0x733   : > { %v2160_v10 = vpop.f32.mrf.mxu0 }
 0x734   : > { %v2161_v11 = vadd.f32 %v2160_v10, %v7746_v58  ;;  %v2263_v12 = vsel %vm1283_vm2, %v2166_v9, -inf }
 0x735   : > { %2264 = vmax.xlane.f32.xlu1 %v2263_v12 }
 0x736   : > { %v2260_v13 = vsel %vm1283_vm2, %v2161_v11, -inf }
 0x737   : > { %2261 = vmax.xlane.f32.xlu0 %v2260_v13 }
 0x745   : > { %v6327_v14 = vpop.f32.mrf.mxu1 }
 0x746   : > { %2077 = vst.msk [vmem:[#allocation2 + $0x58] sm:$0xff] %vm1283_vm2, %v6327_v14 }
 0x747   : > { %v2065_v15 = vpop.f32.mrf.mxu1 }
 0x748   : > { %2076 = vst.msk [vmem:[#allocation2 + $0x50] sm:$0xff] %vm1283_vm2, %v2065_v15 }
 0x74d   : > { %v6341_v16 = vpop.f32.mrf.mxu1 }
 0x74e   : > { %v2257_v19 = vadd.f32 %v6341_v16, %v7744_v56 }
 0x74f   : > { %v2251_v17 = vpop.f32.mrf.mxu1 }
 0x750   : > { %v2252_v18 = vadd.f32 %v2251_v17, %v7746_v58  ;;  %v2269_v21 = vsel %vm1283_vm2, %v2257_v19, -inf }
 0x752   : > { %v2266_v20 = vsel %vm1283_vm2, %v2252_v18, -inf }
 0x753   : > { %2267 = vmax.xlane.f32.xlu0 %v2266_v20 }
 0x757   : > { %2270 = vmax.xlane.f32.xlu0 %v2269_v21 }
 0x7be   : > { %v2265_v22 = vpop.xlane.xlu1 %2264 }
 0x7bf   : > { %v2273_v23 = vsub.f32 %v2166_v9, %v2265_v22 }
 0x7c0   : > { %v2262_v24 = vpop.xlane.xlu0 %2261 }
 0x7c1   : > { %v2278_v25 = vmul.f32 1.442695, %v2273_v23  ;;  %v2272_v26 = vsub.f32 %v2161_v11, %v2262_v24 }
 0x7c3   : > { %6780 = vpow2.f32 %v2278_v25  ;;  %v2276_v27 = vmul.f32 1.442695, %v2272_v26 }
 0x7c5   : > { %6782 = vpow2.f32 %v2276_v27 }
 0x7d0   : > { %v6781_v28 = vpop.eup %6780 }
 0x7d1   : > { %v2287_v29 = vsel %vm1283_vm2, %v6781_v28, 0.0 }
 0x7d2   : > { %v6783_v30 = vpop.eup %6782  ;;  %2288 = vadd.xlane.f32.xlu0 %v2287_v29 }
 0x7d3   : > { %v2284_v32 = vsel %vm1283_vm2, %v6783_v30, 0.0 }
 0x7d4   : > { %2285 = vadd.xlane.f32.xlu1 %v2284_v32 }
 0x7dc   : > { %v2268_v34 = vpop.xlane.xlu0 %2267 }
 0x7e0   : > { %v2271_v35 = vpop.xlane.xlu0 %2270 }
 0x7e1   : > { %v2275_v37 = vsub.f32 %v2257_v19, %v2271_v35 }
 0x7e5   : > { %2306 = vrot.lane.b32.xlu1 %v7726_v51, %s7184_s4 }
 0x7e8   : > { %2304 = vrot.lane.b32.xlu0 %v7734_v54, %s7184_s4 }
 0x7e9   : > { %2488 = vrot.lane.b32.xlu1 %v7692_v36, %s7185_s16  ;;  %v2274_v36 = vsub.f32 %v2252_v18, %v2268_v34 }
 0x7eb   : > { %v2280_v38 = vmul.f32 1.442695, %v2274_v36 }
 0x7ec   : > { %2486 = vrot.lane.b32.xlu0 %v7687_v31, %s7185_s16  ;;  %v2282_v31 = vmul.f32 1.442695, %v2275_v37 }
 0x7ed   : > { %2393 = vrot.lane.b32.xlu1 %v7739_v55, %s7184_s4 }
 0x7ee   : > { %6784 = vpow2.f32 %v2282_v31 }
 0x7ef   : > { %6786 = vpow2.f32 %v2280_v38 }
 0x7f0   : > { %2482 = vrot.lane.b32.xlu0 %v7690_v33, %s7186_s23 }
 0x7f1   : > { %2391 = vrot.lane.b32.xlu1 %v7698_v41, %s7184_s4 }
 0x7f5   : > { %2579 = vrot.lane.b32.xlu1 %v7702_v43, %s7185_s16 }
 0x7f9   : > { %2577 = vrot.lane.b32.xlu1 %v7706_v44, %s7185_s16 }
 0x7fb   : > { %v6785_v39 = vpop.eup %6784 }
 0x7fc   : > { %v2293_v40 = vsel %vm1283_vm2, %v6785_v39, 0.0  ;;  %v6787_v33 = vpop.eup %6786 }
 0x7fd   : > { %v2290_v42 = vsel %vm1283_vm2, %v6787_v33, 0.0 }
 0x80f   : > { %2294 = vadd.xlane.f32.xlu0 %v2293_v40 }
 0x81d   : > { %2291 = vadd.xlane.f32.xlu1 %v2290_v42 }
 0x825   : > { %2484 = vrot.lane.b32.xlu0 %v7715_v47, %s7186_s23 }
 0x829   : > { %2573 = vrot.lane.b32.xlu0 %v7718_v49, %s7186_s23 }
 0x82e   : > { %2575 = vrot.lane.b32.xlu1 %v7732_v52, %s7186_s23 }
 0x85b   : > { %v2289_v43 = vpop.xlane.xlu0 %2288 }
 0x85c   : > { %6788 = vrcp.f32 %v2289_v43  ;;  %v2910_v43 = vld [vmem:[#allocation2 + $0x3] ss:$4 sm:$0xff] }
 0x85d   : > { %v2286_v44 = vpop.xlane.xlu1 %2285 }
 0x85e   : > { %6790 = vrcp.f32 %v2286_v44  ;;  %v2898_v44 = vld [vmem:[#allocation2 + $0x41] ss:$4 sm:$0xff] }
 0x85f   : > { %v2305_v46 = vpop.permute.xlu0 %2304 }
 0x861   : > { %v2307_v45 = vpop.permute.xlu1 %2306 }
 0x862   : > { %6342 = vmatprep.subr.mxu0 %v2307_v45 }
 0x863   : > { %6343 = vmatpush3.msra.mxu0 %v2307_v45  ;;  %v2487_v47 = vpop.permute.xlu0 %2486  ;;  %v2906_v45 = vld [vmem:[#allocation2 + $0x42] ss:$4 sm:$0xff] }
 0x864   : > { %6344 = vmatprep.subr.mxu0 %v2305_v46 }
 0x865   : > { %v2489_v48 = vpop.permute.xlu1 %2488  ;;  %6345 = vmatpush3.msra.mxu0 %v2305_v46  ;;  %v2914_v46 = vld [vmem:[#allocation2 + $0x43] ss:$4 sm:$0xff] }
 0x866   : > { %6356 = vmatprep.subr.msk.mxu0 %vm1283_vm2, %v2489_v48 }
 0x867   : > { %v2483_v60 = vpop.permute.xlu0 %2482 }
 0x869   : > { %v2394_v50 = vpop.permute.xlu1 %2393  ;;  %v6789_v53 = vpop.eup %6788 }
 0x86a   : > { %6349 = vmatprep.subr.mxu1 %v2394_v50  ;;  %v2299_v59 = vmul.f32 %v6789_v53, %v6781_v28 }
 0x86b   : > { %v6791_v49 = vpop.eup %6790  ;;  %6350 = vmatpush3.msra.mxu1 %v2394_v50 }
 0x86c   : > { %v2297_v52 = vmul.f32 %v6791_v49, %v6783_v30 }
 0x86d   : > { %v2392_v57 = vpop.permute.xlu1 %2391 }
 0x86e   : > { %6346 = vmatprep.mubr.msk.f32.mxu0 %vm1283_vm2, %v2297_v52  ;;  %6351 = vmatprep.subr.mxu1 %v2392_v57 }
 0x86f   : > { %6347 = vmatmul.mubr.msk.f32.vlgmr.msra.gmra.mxu0 %vm1283_vm2, %v2299_v59  ;;  %6352 = vmatpush3.msra.mxu1 %v2392_v57 }
 0x870   : > { %6357 = vmatpush3.xpose.msk.msra.mxu0 %vm1283_vm2, %v2489_v48  ;;  %6360 = vmatprep.mubr.msk.f32.mxu0 %vm1283_vm2, %v2483_v60 }
 0x871   : > { %6358 = vmatprep.subr.msk.mxu0 %vm1283_vm2, %v2487_v47  ;;  %v2580_v61 = vpop.permute.xlu1 %2579 }
 0x872   : > { %6363 = vmatprep.subr.msk.mxu1 %vm1283_vm2, %v2580_v61 }
 0x874   : > { %6359 = vmatpush3.xpose.msk.msra.mxu0 %vm1283_vm2, %v2487_v47 }
 0x875   : > { %v2578_v0 = vpop.permute.xlu1 %2577 }
 0x898   : > { %v2295_v62 = vpop.xlane.xlu0 %2294 }
 0x899   : > { %6792 = vrcp.f32 %v2295_v62  ;;  %v2886_v62 = vld [vmem:[#allocation2] ss:$4 sm:$0xff] }
 0x89c   : > { %v2485_v63 = vpop.permute.xlu0 %2484 }
 0x89d   : > { %6361 = vmatmul.mubr.msk.f32.vlgmr.msra.gmra.mxu0 %vm1283_vm2, %v2485_v63 }
 0x8a0   : > { %v2574_v6 = vpop.permute.xlu0 %2573 }
 0x8a6   : > { %v2292_v1 = vpop.xlane.xlu1 %2291  ;;  %v6793_v2 = vpop.eup %6792 }
 0x8a7   : > { %6794 = vrcp.f32 %v2292_v1  ;;  %v2303_v5 = vmul.f32 %v6793_v2, %v6785_v39 }
 0x8aa   : > { %v2576_v7 = vpop.permute.xlu1 %2575 }
 0x8b4   : > { %v6795_v3 = vpop.eup %6794 }
 0x8b5   : > { %v2301_v4 = vmul.f32 %v6795_v3, %v6787_v33 }
 0x8b7   : > { %6353 = vmatprep.mubr.msk.f32.mxu1 %vm1283_vm2, %v2301_v4 }
 0x8b8   : > { %6354 = vmatmul.mubr.msk.f32.vlgmr.msra.gmra.mxu1 %vm1283_vm2, %v2303_v5 }
 0x8b9   : > { %6364 = vmatpush3.xpose.msk.msra.mxu1 %vm1283_vm2, %v2580_v61  ;;  %6367 = vmatprep.mubr.msk.f32.mxu1 %vm1283_vm2, %v2574_v6 }
 0x8ba   : > { %6365 = vmatprep.subr.msk.mxu1 %vm1283_vm2, %v2578_v0 }
 0x8bd   : > { %6366 = vmatpush3.xpose.msk.msra.mxu1 %vm1283_vm2, %v2578_v0 }
 0x8c0   : > { %6368 = vmatmul.mubr.msk.f32.vlgmr.msra.gmra.mxu1 %vm1283_vm2, %v2576_v7 }
 0x92f   : > { %v6348_v8 = vpop.f32.mrf.mxu0 }
 0x930   : > { %2479 = vst.msk [vmem:[#allocation2 + $0x28] sm:$0xff] %vm1283_vm2, %v6348_v8 }
 0x931   : > { %v2382_v9 = vpop.f32.mrf.mxu0 }
 0x932   : > { %2478 = vst.msk [vmem:[#allocation2 + $0x20] sm:$0xff] %vm1283_vm2, %v2382_v9  ;;  %v2986_v9 = vld [vmem:[%s7610_s13 + $0x38] sm:$0xff] }
 0x95d   : > { %v6362_v10 = vpop.f32.mrf.mxu0 }
 0x95e   : > { %v2570_v11 = vadd.f32 %v6362_v10, %v7744_v56  ;;  %v2985_v10 = vld [vmem:[%s7610_s13 + $0x30] sm:$0xff] }
 0x95f   : > { %v2564_v12 = vpop.f32.mrf.mxu0 }
 0x960   : > { %v2565_v13 = vadd.f32 %v2564_v12, %v7746_v58  ;;  %v2667_v14 = vsel %vm1283_vm2, %v2570_v11, -inf  ;;  %v2983_v12 = vld [vmem:[%s7610_s13 + $0x20] sm:$0xff] }
 0x961   : > { %2668 = vmax.xlane.f32.xlu1 %v2667_v14  ;;  %v2981_v14 = vld [vmem:[%s7610_s13 + $0x10] sm:$0xff] }
 0x962   : > { %v2664_v15 = vsel %vm1283_vm2, %v2565_v13, -inf }
 0x963   : > { %2665 = vmax.xlane.f32.xlu0 %v2664_v15 }
 0x978   : > { %v6355_v16 = vpop.f32.mrf.mxu1 }
 0x979   : > { %2481 = vst.msk [vmem:[#allocation2 + $0x68] sm:$0xff] %vm1283_vm2, %v6355_v16 }
 0x97a   : > { %v2469_v17 = vpop.f32.mrf.mxu1 }
 0x97b   : > { %2480 = vst.msk [vmem:[#allocation2 + $0x60] sm:$0xff] %vm1283_vm2, %v2469_v17  ;;  %v2980_v17 = vld [vmem:[%s7610_s13 + $0x8] sm:$0xff] }
 0x980   : > { %v6369_v18 = vpop.f32.mrf.mxu1 }
 0x981   : > { %v2661_v21 = vadd.f32 %v6369_v18, %v7744_v56  ;;  %v2979_v18 = vld [vmem:[%s7610_s13] sm:$0xff] }
 0x982   : > { %v2655_v19 = vpop.f32.mrf.mxu1 }
 0x983   : > { %v2656_v20 = vadd.f32 %v2655_v19, %v7746_v58  ;;  %v2673_v23 = vsel %vm1283_vm2, %v2661_v21, -inf }
 0x985   : > { %v2670_v22 = vsel %vm1283_vm2, %v2656_v20, -inf }
 0x986   : > { %2671 = vmax.xlane.f32.xlu0 %v2670_v22 }
 0x98a   : > { %2674 = vmax.xlane.f32.xlu0 %v2673_v23 }
 0x9ea   : > { %v2669_v24 = vpop.xlane.xlu1 %2668 }
 0x9eb   : > { %v2677_v25 = vsub.f32 %v2570_v11, %v2669_v24  ;;  %v2984_v11 = vld [vmem:[%s7610_s13 + $0x28] sm:$0xff] }
 0x9ec   : > { %v2666_v26 = vpop.xlane.xlu0 %2665 }
 0x9ed   : > { %v2682_v27 = vmul.f32 1.442695, %v2677_v25  ;;  %v2676_v28 = vsub.f32 %v2565_v13, %v2666_v26  ;;  %v2982_v13 = vld [vmem:[%s7610_s13 + $0x18] sm:$0xff]  ;;  %s8561_s13 = sld [smem:[#allocation36_spill]] }
 0x9ef   : > { %6796 = vpow2.f32 %v2682_v27  ;;  %v2680_v29 = vmul.f32 1.442695, %v2676_v28 }
 0x9f1   : > { %6798 = vpow2.f32 %v2680_v29 }
 0x9f3   : > { %s8562_s9 = scalar_lea.vmem %s8561_s13, %s7588_s1 }
 0x9fc   : > { %v6797_v30 = vpop.eup %6796 }
 0x9fd   : > { %v2691_v32 = vsel %vm1283_vm2, %v6797_v30, 0.0 }
 0x9fe   : > { %v6799_v58 = vpop.eup %6798  ;;  %2692 = vadd.xlane.f32.xlu0 %v2691_v32 }
 0x9ff   : > { %v2688_v56 = vsel %vm1283_vm2, %v6799_v58, 0.0 }
 0xa00   : > { %2689 = vadd.xlane.f32.xlu1 %v2688_v56 }
 0xa0f   : > { %v2672_v34 = vpop.xlane.xlu0 %2671 }
 0xa10   : > { %v2678_v36 = vsub.f32 %v2656_v20, %v2672_v34 }
 0xa11   : > { %2710 = vrot.lane.b32.xlu1 %v7726_v51, %s7186_s23  ;;  %v2894_v51 = vld [vmem:[#allocation2 + $0x1] ss:$4 sm:$0xff] }
 0xa12   : > { %v2684_v38 = vmul.f32 1.442695, %v2678_v36 }
 0xa13   : > { %v2675_v35 = vpop.xlane.xlu0 %2674 }
 0xa14   : > { %v2679_v37 = vsub.f32 %v2661_v21, %v2675_v35 }
 0xa15   : > { %2797 = vrot.lane.b32.xlu1 %v7739_v55, %s7186_s23  ;;  %v2902_v55 = vld [vmem:[#allocation2 + $0x2] ss:$4 sm:$0xff] }
 0xa16   : > { %v2686_v31 = vmul.f32 1.442695, %v2679_v37 }
 0xa18   : > { %6800 = vpow2.f32 %v2686_v31 }
 0xa19   : > { %6802 = vpow2.f32 %v2684_v38 }
 0xa25   : > { %v6801_v39 = vpop.eup %6800 }
 0xa26   : > { %v2697_v40 = vsel %vm1283_vm2, %v6801_v39, 0.0  ;;  %v6803_v33 = vpop.eup %6802 }
 0xa27   : > { %2698 = vadd.xlane.f32.xlu0 %v2697_v40  ;;  %v2694_v42 = vsel %vm1283_vm2, %v6803_v33, 0.0 }
 0xa39   : > { %2695 = vadd.xlane.f32.xlu1 %v2694_v42 }
 0xa3d   : > { %2708 = vrot.lane.b32.xlu0 %v7734_v54, %s7186_s23 }
 0xa41   : > { %2921 = vrot.lane.b32.xlu0 %v2894_v51, %s7185_s16 }
 0xa45   : > { %2937 = vrot.lane.b32.xlu0 %v2902_v55, %s7183_s25 }
 0xa49   : > { %2953 = vrot.lane.b32.xlu0 %v2910_v43, %s7181_s14 }
 0xa4a   : > { %2795 = vrot.lane.b32.xlu1 %v7698_v41, %s7186_s23 }
 0xa4d   : > { %2925 = vrot.lane.b32.xlu0 %v2898_v44, %s7185_s16 }
 0xa51   : > { %2941 = vrot.lane.b32.xlu0 %v2906_v45, %s7183_s25  ;;  %v5973_v45 = vld [vmem:[%s8556_s26] ss:$0 sm:$0xff] }
 0xa55   : > { %2957 = vrot.lane.b32.xlu0 %v2914_v46, %s7181_s14 }
 0xa87   : > { %v2693_v41 = vpop.xlane.xlu0 %2692 }
 0xa89   : > { %v2690_v54 = vpop.xlane.xlu1 %2689 }
 0xa8a   : > { %6804 = vrcp.f32 %v2690_v54 }
 0xa8b   : > { %6806 = vrcp.f32 %v2693_v41 }
 0xa8d   : > { %v2711_v48 = vpop.permute.xlu1 %2710 }
 0xa8e   : > { %6370 = vmatprep.subr.mxu0 %v2711_v48 }
 0xa8f   : > { %6371 = vmatpush3.msra.mxu0 %v2711_v48 }
 0xa91   : > { %v2798_v47 = vpop.permute.xlu1 %2797 }
 0xa92   : > { %6377 = vmatprep.subr.mxu1 %v2798_v47 }
 0xa93   : > { %6378 = vmatpush3.msra.mxu1 %v2798_v47 }
 0xa97   : > { %v6805_v50 = vpop.eup %6804 }
 0xa98   : > { %v2701_v53 = vmul.f32 %v6805_v50, %v6799_v58  ;;  %v6807_v52 = vpop.eup %6806  ;;  %v2890_v58 = vld [vmem:[#allocation2 + $0x40] ss:$4 sm:$0xff] }
 0xa99   : > { %v2703_v59 = vmul.f32 %v6807_v52, %v6797_v30  ;;  %v6900_v50 = vld [vmem:[#allocation15 + $0x8] sm:$0xff] }
 0xa9a   : > { %6374 = vmatprep.mubr.msk.f32.mxu0 %vm1283_vm2, %v2701_v53 }
 0xab0   : > { %v2699_v49 = vpop.xlane.xlu0 %2698 }
 0xab1   : > { %6808 = vrcp.f32 %v2699_v49  ;;  %v6901_v49 = vld [vmem:[#allocation15] sm:$0xff] }
 0xab4   : > { %v2709_v57 = vpop.permute.xlu0 %2708 }
 0xab5   : > { %6372 = vmatprep.subr.mxu0 %v2709_v57 }
 0xab6   : > { %6373 = vmatpush3.msra.mxu0 %v2709_v57 }
 0xab7   : > { %6375 = vmatmul.mubr.msk.f32.vlgmr.msra.gmra.mxu0 %vm1283_vm2, %v2703_v59  ;;  %6384 = vmatprep.subr.mxu0 %v2986_v9 }
 0xab8   : > { %v2922_v60 = vpop.permute.xlu0 %2921  ;;  %6385 = vmatpush3.msra.mxu0 %v2986_v9 }
 0xab9   : > { %v2965_v63 = vsel %vm1283_vm2, %v2886_v62, %v2922_v60  ;;  %6386 = vmatprep.subr.mxu0 %v2985_v10 }
 0xaba   : > { %6387 = vmatpush3.msra.mxu0 %v2985_v10 }
 0xabb   : > { %6388 = vmatprep.subr.mxu0 %v2984_v11 }
 0xabc   : > { %v2938_v61 = vpop.permute.xlu0 %2937  ;;  %6389 = vmatpush3.msra.mxu0 %v2984_v11 }
 0xabd   : > { %v2970_v0 = vsel %vm2969_vm3, %v2965_v63, %v2938_v61  ;;  %6390 = vmatprep.subr.mxu0 %v2983_v12  ;;  %v6902_v63 = vld [vmem:[#allocation15 + $0x10] sm:$0xff] }
 0xabe   : > { %v6809_v5 = vpop.eup %6808  ;;  %6391 = vmatpush3.msra.mxu0 %v2983_v12 }
 0xabf   : > { %v2707_v8 = vmul.f32 %v6809_v5, %v6801_v39  ;;  %6392 = vmatprep.subr.mxu0 %v2982_v13  ;;  %v3177_v5 = vld [vmem:[%s7570_s29 + $0x38] sm:$0xff] }
 0xac0   : > { %v2954_v1 = vpop.permute.xlu0 %2953  ;;  %6393 = vmatpush3.msra.mxu0 %v2982_v13 }
 0xac1   : > { %v2975_v2 = vsel %vm2974_vm4, %v2970_v0, %v2954_v1  ;;  %6394 = vmatprep.subr.mxu0 %v2981_v14 }
 0xac2   : > { %6400 = vmatprep.mubr.msk.f32.mxu0 %vm1171_vm1, %v2975_v2  ;;  %v2696_v3 = vpop.xlane.xlu1 %2695  ;;  %6395 = vmatpush3.msra.mxu0 %v2981_v14  ;;  %v6903_v2 = vld [vmem:[#allocation15 + $0x18] sm:$0xff] }
 0xac3   : > { %6810 = vrcp.f32 %v2696_v3  ;;  %6396 = vmatprep.subr.mxu0 %v2980_v17 }
 0xac4   : > { %6397 = vmatpush3.msra.mxu0 %v2980_v17  ;;  %v2926_v27 = vpop.permute.xlu0 %2925 }
 0xac5   : > { %6398 = vmatprep.subr.mxu0 %v2979_v18  ;;  %v2967_v35 = vsel %vm1283_vm2, %v2890_v58, %v2926_v27  ;;  %v3288_v27 = vld [vmem:[%s8557_s18 + $0x30] sm:$0xff]  ;;  %v3286_v58 = vld [vmem:[%s8557_s18 + $0x20] sm:$0xff] }
 0xac6   : > { %v2796_v4 = vpop.permute.xlu1 %2795  ;;  %6399 = vmatpush3.msra.mxu0 %v2979_v18 }
 0xac7   : > { %6379 = vmatprep.subr.mxu1 %v2796_v4  ;;  %6406 = vmatprep.subr.mxu0 %v3177_v5 }
 0xac8   : > { %6380 = vmatpush3.msra.mxu1 %v2796_v4  ;;  %v2942_v29 = vpop.permute.xlu0 %2941 }
 0xac9   : > { %v2972_v36 = vsel %vm2969_vm3, %v2967_v35, %v2942_v29  ;;  %v3287_v29 = vld [vmem:[%s8557_s18 + $0x28] sm:$0xff]  ;;  %v3285_v35 = vld [vmem:[%s8557_s18 + $0x18] sm:$0xff] }
 0xacc   : > { %v2958_v56 = vpop.permute.xlu0 %2957 }
 0xacd   : > { %v2977_v39 = vsel %vm2974_vm4, %v2972_v36, %v2958_v56  ;;  %v1140_v36 = vld [vmem:[#allocation6 + $0x18] sm:$0xff] }
 0xad0   : > { %v6811_v6 = vpop.eup %6810 }
 0xad1   : > { %v2705_v7 = vmul.f32 %v6811_v6, %v6803_v33  ;;  %v3176_v6 = vld [vmem:[%s7570_s29 + $0x30] sm:$0xff] }
 0xad3   : > { %6381 = vmatprep.mubr.msk.f32.mxu1 %vm1283_vm2, %v2705_v7  ;;  %v3175_v7 = vld [vmem:[%s7570_s29 + $0x28] sm:$0xff] }
 0xad4   : > { %6382 = vmatmul.mubr.msk.f32.vlgmr.msra.gmra.mxu1 %vm1283_vm2, %v2707_v8  ;;  %v3174_v8 = vld [vmem:[%s7570_s29 + $0x20] sm:$0xff] }
 0xb77   : > { %v6376_v15 = vpop.f32.mrf.mxu0 }
 0xb78   : > { %2883 = vst.msk [vmem:[#allocation2 + $0x38] sm:$0xff] %vm1283_vm2, %v6376_v15 }
 0xb79   : > { %v2786_v16 = vpop.f32.mrf.mxu0 }
 0xb7a   : > { %2882 = vst.msk [vmem:[#allocation2 + $0x30] sm:$0xff] %vm1283_vm2, %v2786_v16 }
 0xb81   : > { %v2896_v19 = vld [vmem:[#allocation2 + $0x21] ss:$4 sm:$0xff]  ;;  %v2904_v20 = vld [vmem:[#allocation2 + $0x22] ss:$4 sm:$0xff]  ;;  %v2912_v21 = vld [vmem:[#allocation2 + $0x23] ss:$4 sm:$0xff] }
 0xb82   : > { %2923 = vrot.lane.b32.xlu1 %v2896_v19, %s7185_s16  ;;  %v2888_v32 = vld [vmem:[#allocation2 + $0x20] ss:$4 sm:$0xff] }
 0xb83   : > { %v3173_v19 = vld [vmem:[%s7570_s29 + $0x18] sm:$0xff] }
 0xb86   : > { %2939 = vrot.lane.b32.xlu1 %v2904_v20, %s7183_s25  ;;  %v3172_v20 = vld [vmem:[%s7570_s29 + $0x10] sm:$0xff] }
 0xb8a   : > { %2955 = vrot.lane.b32.xlu1 %v2912_v21, %s7181_s14  ;;  %v3171_v21 = vld [vmem:[%s7570_s29 + $0x8] sm:$0xff] }
 0xb94   : > { %v6383_v22 = vpop.f32.mrf.mxu1 }
 0xb95   : > { %2885 = vst.msk [vmem:[#allocation2 + $0x78] sm:$0xff] %vm1283_vm2, %v6383_v22  ;;  %v3170_v22 = vld [vmem:[%s7570_s29] sm:$0xff] }
 0xb96   : > { %v2873_v23 = vpop.f32.mrf.mxu1 }
 0xb97   : > { %2884 = vst.msk [vmem:[#allocation2 + $0x70] sm:$0xff] %vm1283_vm2, %v2873_v23  ;;  %v1137_v23 = vld [vmem:[#allocation6] sm:$0xff] }
 0xb9e   : > { %v2900_v24 = vld [vmem:[#allocation2 + $0x61] ss:$4 sm:$0xff]  ;;  %v2908_v25 = vld [vmem:[#allocation2 + $0x62] ss:$4 sm:$0xff]  ;;  %v2916_v26 = vld [vmem:[#allocation2 + $0x63] ss:$4 sm:$0xff] }
 0xb9f   : > { %2927 = vrot.lane.b32.xlu1 %v2900_v24, %s7185_s16  ;;  %v2892_v42 = vld [vmem:[#allocation2 + $0x60] ss:$4 sm:$0xff] }
 0xba0   : > { %v1138_v24 = vld [vmem:[#allocation6 + $0x8] sm:$0xff] }
 0xba3   : > { %2943 = vrot.lane.b32.xlu1 %v2908_v25, %s7183_s25  ;;  %v3289_v25 = vld [vmem:[%s8557_s18 + $0x38] sm:$0xff] }
 0xba7   : > { %2959 = vrot.lane.b32.xlu1 %v2916_v26, %s7181_s14 }
 0xbf4   : > { %v2924_v28 = vpop.permute.xlu1 %2923 }
 0xbf5   : > { %v2966_v34 = vsel %vm1283_vm2, %v2888_v32, %v2924_v28 }
 0xbf8   : > { %v2940_v30 = vpop.permute.xlu1 %2939 }
 0xbf9   : > { %v2971_v37 = vsel %vm2969_vm3, %v2966_v34, %v2940_v30 }
 0xbfc   : > { %v2956_v31 = vpop.permute.xlu1 %2955 }
 0xbfd   : > { %v2976_v38 = vsel %vm2974_vm4, %v2971_v37, %v2956_v31  ;;  %v1139_v37 = vld [vmem:[#allocation6 + $0x10] sm:$0xff]  ;;  %v3284_v31 = vld [vmem:[%s8557_s18 + $0x10] sm:$0xff] }
 0xbfe   : > { %6401 = vmatmul.mubr.msk.f32.vlgmr.msra.gmra.mxu0 %vm1171_vm1, %v2976_v38 }
 0xbff   : > { %6403 = vmatprep.mubr.msk.f32.mxu0 %vm1171_vm1, %v2977_v39  ;;  %6407 = vmatpush3.msra.mxu0 %v3177_v5 }
 0xc00   : > { %6408 = vmatprep.subr.mxu0 %v3176_v6 }
 0xc01   : > { %6409 = vmatpush3.msra.mxu0 %v3176_v6 }
 0xc02   : > { %6410 = vmatprep.subr.mxu0 %v3175_v7 }
 0xc03   : > { %6411 = vmatpush3.msra.mxu0 %v3175_v7 }
 0xc04   : > { %6412 = vmatprep.subr.mxu0 %v3174_v8 }
 0xc05   : > { %6413 = vmatpush3.msra.mxu0 %v3174_v8 }
 0xc06   : > { %6414 = vmatprep.subr.mxu0 %v3173_v19 }
 0xc07   : > { %6415 = vmatpush3.msra.mxu0 %v3173_v19 }
 0xc08   : > { %6416 = vmatprep.subr.mxu0 %v3172_v20 }
 0xc09   : > { %6417 = vmatpush3.msra.mxu0 %v3172_v20 }
 0xc0a   : > { %6418 = vmatprep.subr.mxu0 %v3171_v21 }
 0xc0b   : > { %6419 = vmatpush3.msra.mxu0 %v3171_v21 }
 0xc0c   : > { %6420 = vmatprep.subr.mxu0 %v3170_v22 }
 0xc0d   : > { %6421 = vmatpush3.msra.mxu0 %v3170_v22 }
 0xc0e   : > { %6428 = vmatprep.subr.mxu0 %v3289_v25 }
 0xc11   : > { %v2928_v40 = vpop.permute.xlu1 %2927 }
 0xc12   : > { %v2968_v51 = vsel %vm1283_vm2, %v2892_v42, %v2928_v40  ;;  %v3283_v40 = vld [vmem:[%s8557_s18 + $0x8] sm:$0xff]  ;;  %v3282_v42 = vld [vmem:[%s8557_s18] sm:$0xff]  ;;  %s8563_s18 = scalar_lea.vmem %s8458_s12, %s7588_s1 }
 0xc13   : > { %v5985_v19 = vld [vmem:[%s8563_s18] ss:$0 sm:$0xff] }
 0xc15   : > { %v2944_v33 = vpop.permute.xlu1 %2943 }
 0xc16   : > { %v2973_v55 = vsel %vm2969_vm3, %v2968_v51, %v2944_v33 }
 0xc19   : > { %v2960_v43 = vpop.permute.xlu1 %2959 }
 0xc1a   : > { %v2978_v44 = vsel %vm2974_vm4, %v2973_v55, %v2960_v43 }
 0xc1b   : > { %6404 = vmatmul.mubr.msk.f32.gmra.mxu0 %vm1171_vm1, %v2978_v44 }
 0xc1c   : > { %6422 = vmatprep.mubr.msk.f32.mxu0 %vm1171_vm1, %v1137_v23 }
 0xc1f   : > { %6423 = vmatmul.mubr.msk.f32.vlgmr.msra.gmra.mxu0 %vm1171_vm1, %v1138_v24 }
 0xc20   : > { %6429 = vmatpush3.msra.mxu0 %v3289_v25  ;;  %6425 = vmatprep.mubr.msk.f32.mxu0 %vm1171_vm1, %v1139_v37 }
 0xc21   : > { %6430 = vmatprep.subr.mxu0 %v3288_v27 }
 0xc22   : > { %6431 = vmatpush3.msra.mxu0 %v3288_v27 }
 0xc23   : > { %6432 = vmatprep.subr.mxu0 %v3287_v29  ;;  %6426 = vmatmul.mubr.msk.f32.gmra.mxu0 %vm1171_vm1, %v1140_v36 }
 0xc24   : > { %6433 = vmatpush3.msra.mxu0 %v3287_v29 }
 0xc25   : > { %6434 = vmatprep.subr.mxu0 %v3286_v58 }
 0xc26   : > { %6435 = vmatpush3.msra.mxu0 %v3286_v58 }
 0xc27   : > { %6436 = vmatprep.subr.mxu0 %v3285_v35 }
 0xc28   : > { %6437 = vmatpush3.msra.mxu0 %v3285_v35 }
 0xc29   : > { %6438 = vmatprep.subr.mxu0 %v3284_v31 }
 0xc2a   : > { %6439 = vmatpush3.msra.mxu0 %v3284_v31 }
 0xc2b   : > { %6440 = vmatprep.subr.mxu0 %v3283_v40 }
 0xc2c   : > { %6441 = vmatpush3.msra.mxu0 %v3283_v40 }
 0xc2d   : > { %6442 = vmatprep.subr.mxu0 %v3282_v42 }
 0xc2e   : > { %6443 = vmatpush3.msra.mxu0 %v3282_v42 }
 0xcbe   : > { %v6402_v46 = vpop.f32.mrf.mxu0 }
 0xcbf   : > { %v3078_v54 = vadd.f32 %v6402_v46, %v5973_v45 }
 0xcc0   : > { %v3072_v48 = vpop.f32.mrf.mxu0 }
 0xcc1   : > { %v3073_v47 = vadd.f32 %v5973_v45, %v3072_v48  ;;  %v3092_v53 = vadd.f32 %v6900_v50, %v3078_v54  ;;  %v5978_v50 = vld [vmem:[%s8559_s24] ss:$0 sm:$0xff]  ;;  %s8569_s24 = sld [smem:[#allocation41_spill]] }
 0xcc3   : > { %v3100_v41 = vsel %vm1171_vm1, %v3092_v53, 0.0  ;;  %v3091_v52 = vadd.f32 %v6901_v49, %v3073_v47 }
 0xcc4   : > { %3101 = vadd.xlane.f32.xlu1 %v3100_v41 }
 0xcc5   : > { %v3097_v57 = vsel %vm1171_vm1, %v3091_v52, 0.0 }
 0xcc6   : > { %3098 = vadd.xlane.f32.xlu0 %v3097_v57 }
 0xcc7   : > { %s8570_s28 = scalar_lea.vmem %s8569_s24, %s7588_s1 }
 0xcdb   : > { %v6405_v59 = vpop.f32.mrf.mxu0 }
 0xcdc   : > { %v3088_v61 = vadd.f32 %v6405_v59, %v5973_v45 }
 0xcdd   : > { %v3082_v60 = vpop.f32.mrf.mxu0 }
 0xcde   : > { %v3083_v62 = vadd.f32 %v5973_v45, %v3082_v60  ;;  %v7983_v3 = vadd.f32 %v6903_v2, %v3088_v61 }
 0xce0   : > { %v3093_v0 = vadd.f32 %v6902_v63, %v3083_v62  ;;  %v3106_v4 = vsel %vm1171_vm1, %v7983_v3, 0.0 }
 0xce2   : > { %v3103_v1 = vsel %vm1171_vm1, %v3093_v0, 0.0 }
 0xce3   : > { %3104 = vadd.xlane.f32.xlu0 %v3103_v1 }
 0xce7   : > { %3107 = vadd.xlane.f32.xlu0 %v3106_v4 }
 0xd4d   : > { %v3102_v9 = vpop.xlane.xlu1 %3101 }
 0xd4e   : > { %v3111_v10 = vmul.f32 0.015625, %v3102_v9 }
 0xd4f   : > { %v3099_v11 = vpop.xlane.xlu0 %3098 }
 0xd50   : > { %v7991_v12 = vsub.f32 %v3092_v53, %v3111_v10  ;;  %v3110_v13 = vmul.f32 0.015625, %v3099_v11  ;;  %v5980_v11 = vld [vmem:[%s8562_s9] ss:$0 sm:$0xff] }
 0xd52   : > { %v7993_v14 = vsub.f32 %v3091_v52, %v3110_v13  ;;  %v3119_v15 = vmul.f32 %v7991_v12, %v7991_v12  ;;  %v5979_v52 = vld [vmem:[%s8560_s19] ss:$0 sm:$0xff] }
 0xd54   : > { %v3125_v16 = vsel %vm1171_vm1, %v3119_v15, 0.0  ;;  %v3118_v17 = vmul.f32 %v7993_v14, %v7993_v14 }
 0xd55   : > { %3126 = vadd.xlane.f32.xlu0 %v3125_v16 }
 0xd56   : > { %v3122_v18 = vsel %vm1171_vm1, %v3118_v17, 0.0 }
 0xd57   : > { %3123 = vadd.xlane.f32.xlu1 %v3122_v18 }
 0xd6c   : > { %v3105_v26 = vpop.xlane.xlu0 %3104 }
 0xd6d   : > { %v3112_v28 = vmul.f32 0.015625, %v3105_v26 }
 0xd6f   : > { %v3116_v30 = vsub.f32 %v3093_v0, %v3112_v28 }
 0xd70   : > { %v3108_v32 = vpop.xlane.xlu0 %3107 }
 0xd71   : > { %v3113_v56 = vmul.f32 0.015625, %v3108_v32  ;;  %v3120_v34 = vmul.f32 %v3116_v30, %v3116_v30 }
 0xd73   : > { %v3117_v38 = vsub.f32 %v7983_v3, %v3113_v56  ;;  %v3128_v39 = vsel %vm1171_vm1, %v3120_v34, 0.0 }
 0xd74   : > { %3129 = vadd.xlane.f32.xlu1 %v3128_v39 }
 0xd75   : > { %v3121_v33 = vmul.f32 %v3117_v38, %v3117_v38 }
 0xd77   : > { %v3131_v51 = vsel %vm1171_vm1, %v3121_v33, 0.0 }
 0xd78   : > { %3132 = vadd.xlane.f32.xlu0 %v3131_v51 }
 0xdde   : > { %v3127_v55 = vpop.xlane.xlu0 %3126 }
 0xddf   : > { %v3135_v43 = vmul.f32 0.015625, %v3127_v55 }
 0xde0   : > { %v3124_v44 = vpop.xlane.xlu1 %3123 }
 0xde1   : > { %v3139_v45 = vadd.f32 1e-05, %v3135_v43  ;;  %v3134_v46 = vmul.f32 0.015625, %v3124_v44 }
 0xde3   : > { %6812 = vrsqrt.f32 %v3139_v45  ;;  %v3138_v54 = vadd.f32 1e-05, %v3134_v46 }
 0xde5   : > { %6814 = vrsqrt.f32 %v3138_v54 }
 0xdf0   : > { %v6813_v48 = vpop.eup %6812 }
 0xdf1   : > { %v3147_v47 = vmul.f32 %v6813_v48, %v7991_v12  ;;  %v6424_v12 = vpop.f32.mrf.mxu0 }
 0xdf2   : > { %v6815_v53 = vpop.eup %6814  ;;  %v8053_v13 = vadd.f32 %v6424_v12, %v5980_v11 }
 0xdf3   : > { %v3146_v41 = vmul.f32 %v6815_v53, %v7993_v14  ;;  %v3157_v49 = vmul.f32 %v5978_v50, %v3147_v47  ;;  %v3263_v14 = vpop.f32.mrf.mxu0 }
 0xdf4   : > { %6450 = vmatprep.subr.msk.mxu1 %vm1283_vm2, %v8053_v13  ;;  %v8057_v15 = vadd.f32 %v5980_v11, %v3263_v14 }
 0xdf5   : > { %v3156_v57 = vmul.f32 %v5978_v50, %v3146_v41  ;;  %v8034_v60 = vadd.f32 %v5979_v52, %v3157_v49  ;;  %6451 = vmatpush3.xpose.msk.msra.mxu1 %vm1283_vm2, %v8053_v13  ;;  %v6427_v16 = vpop.f32.mrf.mxu0 }
 0xdf6   : > { %6452 = vmatprep.subr.msk.mxu1 %vm1283_vm2, %v8057_v15  ;;  %v8065_v17 = vadd.f32 %v6427_v16, %v5980_v11 }
 0xdf7   : > { %v8032_v59 = vadd.f32 %v5979_v52, %v3156_v57  ;;  %v3273_v18 = vpop.f32.mrf.mxu0 }
 0xdf8   : > { %v8080_v26 = vadd.f32 %v5980_v11, %v3273_v18 }
 0xdf9   : > { %6444 = vmatprep.mubr.msk.f32.mxu0 %vm1171_vm1, %v8032_v59  ;;  %6453 = vmatpush3.xpose.msk.msra.mxu1 %vm1283_vm2, %v8057_v15 }
 0xdfa   : > { %6445 = vmatmul.mubr.msk.f32.vlgmr.msra.gmra.mxu0 %vm1171_vm1, %v8034_v60  ;;  %6457 = vmatprep.subr.msk.mxu1 %vm1283_vm2, %v8065_v17 }
 0xdfd   : > { %v3130_v61 = vpop.xlane.xlu1 %3129 }
 0xdfe   : > { %v3136_v62 = vmul.f32 0.015625, %v3130_v61 }
 0xe00   : > { %v3140_v63 = vadd.f32 1e-05, %v3136_v62 }
 0xe01   : > { %v3133_v0 = vpop.xlane.xlu0 %3132 }
 0xe02   : > { %6816 = vrsqrt.f32 %v3140_v63  ;;  %v3137_v1 = vmul.f32 0.015625, %v3133_v0 }
 0xe04   : > { %v3141_v2 = vadd.f32 1e-05, %v3137_v1 }
 0xe06   : > { %6818 = vrsqrt.f32 %v3141_v2 }
 0xe0f   : > { %v6817_v3 = vpop.eup %6816 }
 0xe10   : > { %v3148_v4 = vmul.f32 %v6817_v3, %v3116_v30 }
 0xe12   : > { %v3158_v5 = vmul.f32 %v5978_v50, %v3148_v4 }
 0xe13   : > { %v6819_v6 = vpop.eup %6818 }
 0xe14   : > { %v8040_v7 = vadd.f32 %v5979_v52, %v3158_v5  ;;  %v3149_v8 = vmul.f32 %v6819_v6, %v3117_v38 }
 0xe16   : > { %6447 = vmatprep.mubr.msk.f32.mxu0 %vm1171_vm1, %v8040_v7  ;;  %v3159_v9 = vmul.f32 %v5978_v50, %v3149_v8 }
 0xe18   : > { %v8044_v10 = vadd.f32 %v5979_v52, %v3159_v9 }
 0xe1a   : > { %6448 = vmatmul.mubr.msk.f32.gmra.mxu0 %vm1171_vm1, %v8044_v10 }
 0xeba   : > { %v6446_v20 = vpop.f32.mrf.mxu0 }
 0xebb   : > { %v3381_v21 = vadd.f32 %v6446_v20, %v5985_v19 }
 0xebc   : > { %v3375_v22 = vpop.f32.mrf.mxu0 }
 0xebd   : > { %v3376_v23 = vadd.f32 %v5985_v19, %v3375_v22  ;;  %v8076_v25 = vmul.f32 0.25, %v3381_v21 }
 0xebf   : > { %v8074_v24 = vmul.f32 0.25, %v3376_v23 }
 0xec1   : > { %6454 = vmatprep.mubr.msk.f32.mxu1 %vm1283_vm2, %v8074_v24 }
 0xec2   : > { %6455 = vmatmul.mubr.msk.f32.vlgmr.msra.gmra.mxu1 %vm1283_vm2, %v8076_v25 }
 0xec3   : > { %6458 = vmatpush3.xpose.msk.msra.mxu1 %vm1283_vm2, %v8065_v17 }
 0xec4   : > { %6459 = vmatprep.subr.msk.mxu1 %vm1283_vm2, %v8080_v26 }
 0xec7   : > { %6460 = vmatpush3.xpose.msk.msra.mxu1 %vm1283_vm2, %v8080_v26 }
 0xeda   : > { %v6449_v27 = vpop.f32.mrf.mxu0 }
 0xedb   : > { %v3391_v28 = vadd.f32 %v6449_v27, %v5985_v19 }
 0xedc   : > { %v3385_v29 = vpop.f32.mrf.mxu0 }
 0xedd   : > { %v3386_v30 = vadd.f32 %v5985_v19, %v3385_v29  ;;  %v8092_v58 = vmul.f32 0.25, %v3391_v28 }
 0xedf   : > { %v8090_v32 = vmul.f32 0.25, %v3386_v30 }
 0xee1   : > { %6461 = vmatprep.mubr.msk.f32.mxu1 %vm1283_vm2, %v8090_v32 }
 0xee2   : > { %6462 = vmatmul.mubr.msk.f32.vlgmr.msra.gmra.mxu1 %vm1283_vm2, %v8092_v58 }
 0xf82   : > { %v6456_v56 = vpop.f32.mrf.mxu1 }
 0xf83   : > { %v3575_v34 = vsel %vm1283_vm2, %v6456_v56, -inf }
 0xf84   : > { %3576 = vmax.xlane.f32.xlu0 %v3575_v34  ;;  %v3476_v35 = vpop.f32.mrf.mxu1 }
 0xf85   : > { %v3572_v37 = vsel %vm1283_vm2, %v3476_v35, -inf }
 0xf86   : > { %3573 = vmax.xlane.f32.xlu1 %v3572_v37 }
 0xfa2   : > { %v6463_v31 = vpop.f32.mrf.mxu1 }
 0xfa3   : > { %v3581_v36 = vsel %vm1283_vm2, %v6463_v31, -inf }
 0xfa4   : > { %3582 = vmax.xlane.f32.xlu0 %v3581_v36  ;;  %v3563_v38 = vpop.f32.mrf.mxu1 }
 0xfa5   : > { %v3578_v39 = vsel %vm1283_vm2, %v3563_v38, -inf }
 0xfa6   : > { %3579 = vmax.xlane.f32.xlu1 %v3578_v39 }
0x100d   : > { %v3577_v40 = vpop.xlane.xlu0 %3576 }
0x100e   : > { %v3585_v33 = vsub.f32 %v6456_v56, %v3577_v40 }
0x100f   : > { %v3574_v42 = vpop.xlane.xlu1 %3573 }
0x1010   : > { %v3590_v51 = vmul.f32 1.442695, %v3585_v33  ;;  %v3584_v55 = vsub.f32 %v3476_v35, %v3574_v42 }
0x1012   : > { %6820 = vpow2.f32 %v3590_v51  ;;  %v3588_v43 = vmul.f32 1.442695, %v3584_v55 }
0x1014   : > { %6822 = vpow2.f32 %v3588_v43 }
0x101f   : > { %v6821_v44 = vpop.eup %6820 }
0x1020   : > { %v3599_v45 = vsel %vm1283_vm2, %v6821_v44, 0.0 }
0x1021   : > { %v6823_v46 = vpop.eup %6822  ;;  %3600 = vadd.xlane.f32.xlu0 %v3599_v45 }
0x1022   : > { %v3596_v54 = vsel %vm1283_vm2, %v6823_v46, 0.0 }
0x1023   : > { %3597 = vadd.xlane.f32.xlu1 %v3596_v54 }
0x102d   : > { %v3583_v48 = vpop.xlane.xlu0 %3582 }
0x102e   : > { %v3587_v47 = vsub.f32 %v6463_v31, %v3583_v48 }
0x102f   : > { %v3580_v53 = vpop.xlane.xlu1 %3579 }
0x1030   : > { %v3594_v50 = vmul.f32 1.442695, %v3587_v47  ;;  %v3586_v41 = vsub.f32 %v3563_v38, %v3580_v53 }
0x1032   : > { %6824 = vpow2.f32 %v3594_v50  ;;  %v3592_v49 = vmul.f32 1.442695, %v3586_v41 }
0x1034   : > { %3618 = vrot.lane.b32.xlu1 %v8053_v13, %s7180_s10  ;;  %6826 = vpow2.f32 %v3592_v49 }
0x1037   : > { %3616 = vrot.lane.b32.xlu0 %v8057_v15, %s7180_s10 }
0x1038   : > { %3705 = vrot.lane.b32.xlu1 %v8065_v17, %s7180_s10 }
0x103b   : > { %3703 = vrot.lane.b32.xlu0 %v8080_v26, %s7180_s10  ;;  %s8564_s10 = sld [smem:[#allocation26_spill]] }
0x103c   : > { %3800 = vrot.lane.b32.xlu1 %v8053_v13, %s7182_s22 }
0x103f   : > { %3891 = vrot.lane.b32.xlu0 %v8065_v17, %s7182_s22  ;;  %v6825_v52 = vpop.eup %6824 }
0x1040   : > { %3798 = vrot.lane.b32.xlu1 %v8057_v15, %s7182_s22  ;;  %v3605_v57 = vsel %vm1283_vm2, %v6825_v52, 0.0 }
0x1041   : > { %v6827_v61 = vpop.eup %6826 }
0x1042   : > { %v3602_v62 = vsel %vm1283_vm2, %v6827_v61, 0.0 }
0x1044   : > { %3794 = vrot.lane.b32.xlu1 %v8074_v24, %s7182_s22 }
0x1048   : > { %3889 = vrot.lane.b32.xlu1 %v8080_v26, %s7182_s22 }
0x105e   : > { %3606 = vadd.xlane.f32.xlu0 %v3605_v57 }
0x106c   : > { %3603 = vadd.xlane.f32.xlu1 %v3602_v62 }
0x1074   : > { %3796 = vrot.lane.b32.xlu0 %v8076_v25, %s7182_s22 }
0x1078   : > { %3885 = vrot.lane.b32.xlu0 %v8090_v32, %s7182_s22 }
0x107d   : > { %3887 = vrot.lane.b32.xlu1 %v8092_v58, %s7182_s22 }
0x10aa   : > { %v3601_v63 = vpop.xlane.xlu0 %3600 }
0x10ab   : > { %6828 = vrcp.f32 %v3601_v63 }
0x10ac   : > { %v3598_v0 = vpop.xlane.xlu1 %3597 }
0x10ad   : > { %6830 = vrcp.f32 %v3598_v0 }
0x10ae   : > { %v3617_v1 = vpop.permute.xlu0 %3616 }
0x10b0   : > { %v3619_v2 = vpop.permute.xlu1 %3618 }
0x10b1   : > { %6464 = vmatprep.subr.mxu1 %v3619_v2 }
0x10b2   : > { %6465 = vmatpush3.msra.mxu1 %v3619_v2  ;;  %v3704_v3 = vpop.permute.xlu0 %3703 }
0x10b3   : > { %6466 = vmatprep.subr.mxu1 %v3617_v1 }
0x10b4   : > { %v3706_v4 = vpop.permute.xlu1 %3705  ;;  %6467 = vmatpush3.msra.mxu1 %v3617_v1 }
0x10b5   : > { %6471 = vmatprep.subr.mxu0 %v3706_v4 }
0x10b6   : > { %6472 = vmatpush3.msra.mxu0 %v3706_v4  ;;  %v3892_v5 = vpop.permute.xlu0 %3891 }
0x10b7   : > { %6473 = vmatprep.subr.mxu0 %v3704_v3 }
0x10b8   : > { %v3801_v6 = vpop.permute.xlu1 %3800  ;;  %6474 = vmatpush3.msra.mxu0 %v3704_v3  ;;  %v6829_v8 = vpop.eup %6828 }
0x10b9   : > { %6478 = vmatprep.subr.msk.mxu1 %vm1283_vm2, %v3801_v6  ;;  %6485 = vmatprep.subr.msk.mxu0 %vm1283_vm2, %v3892_v5  ;;  %v3611_v14 = vmul.f32 %v6829_v8, %v6821_v44 }
0x10ba   : > { %v6831_v9 = vpop.eup %6830 }
0x10bb   : > { %v3609_v11 = vmul.f32 %v6831_v9, %v6823_v46 }
0x10bc   : > { %v3799_v12 = vpop.permute.xlu1 %3798 }
0x10bd   : > { %6468 = vmatprep.mubr.msk.f32.mxu1 %vm1283_vm2, %v3609_v11 }
0x10be   : > { %6469 = vmatmul.mubr.msk.f32.vlgmr.msra.gmra.mxu1 %vm1283_vm2, %v3611_v14 }
0x10bf   : > { %6479 = vmatpush3.xpose.msk.msra.mxu1 %vm1283_vm2, %v3801_v6 }
0x10c0   : > { %6480 = vmatprep.subr.msk.mxu1 %vm1283_vm2, %v3799_v12  ;;  %v3795_v16 = vpop.permute.xlu1 %3794 }
0x10c1   : > { %6482 = vmatprep.mubr.msk.f32.mxu1 %vm1283_vm2, %v3795_v16 }
0x10c3   : > { %6481 = vmatpush3.xpose.msk.msra.mxu1 %vm1283_vm2, %v3799_v12 }
0x10c4   : > { %v3890_v20 = vpop.permute.xlu1 %3889 }
0x10e7   : > { %v3607_v18 = vpop.xlane.xlu0 %3606 }
0x10e8   : > { %6832 = vrcp.f32 %v3607_v18 }
0x10eb   : > { %v3797_v19 = vpop.permute.xlu0 %3796 }
0x10ec   : > { %6483 = vmatmul.mubr.msk.f32.vlgmr.msra.gmra.mxu1 %vm1283_vm2, %v3797_v19 }
0x10ef   : > { %v3886_v29 = vpop.permute.xlu0 %3885 }
0x10f5   : > { %v3604_v21 = vpop.xlane.xlu1 %3603  ;;  %v6833_v22 = vpop.eup %6832 }
0x10f6   : > { %6834 = vrcp.f32 %v3604_v21  ;;  %v3615_v28 = vmul.f32 %v6833_v22, %v6825_v52 }
0x10f9   : > { %v3888_v30 = vpop.permute.xlu1 %3887 }
0x1103   : > { %v6835_v23 = vpop.eup %6834 }
0x1104   : > { %v3613_v27 = vmul.f32 %v6835_v23, %v6827_v61 }
0x1106   : > { %6475 = vmatprep.mubr.msk.f32.mxu0 %vm1283_vm2, %v3613_v27 }
0x1107   : > { %6476 = vmatmul.mubr.msk.f32.vlgmr.msra.gmra.mxu0 %vm1283_vm2, %v3615_v28 }
0x1108   : > { %6486 = vmatpush3.xpose.msk.msra.mxu0 %vm1283_vm2, %v3892_v5  ;;  %6489 = vmatprep.mubr.msk.f32.mxu0 %vm1283_vm2, %v3886_v29 }
0x1109   : > { %6487 = vmatprep.subr.msk.mxu0 %vm1283_vm2, %v3890_v20 }
0x110c   : > { %6488 = vmatpush3.xpose.msk.msra.mxu0 %vm1283_vm2, %v3890_v20 }
0x110f   : > { %6490 = vmatmul.mubr.msk.f32.vlgmr.msra.gmra.mxu0 %vm1283_vm2, %v3888_v30 }
0x117e   : > { %v6470_v56 = vpop.f32.mrf.mxu1 }
0x117f   : > { %3791 = vst.msk [vmem:[#allocation2 + $0x8] sm:$0xff] %vm1283_vm2, %v6470_v56 }
0x1180   : > { %v3694_v34 = vpop.f32.mrf.mxu1 }
0x1181   : > { %3790 = vst.msk [vmem:[#allocation2] sm:$0xff] %vm1283_vm2, %v3694_v34 }
0x11ac   : > { %v6484_v35 = vpop.f32.mrf.mxu1 }
0x11ad   : > { %v3979_v37 = vsel %vm1283_vm2, %v6484_v35, -inf }
0x11ae   : > { %3980 = vmax.xlane.f32.xlu1 %v3979_v37  ;;  %v3876_v31 = vpop.f32.mrf.mxu1 }
0x11af   : > { %v3976_v36 = vsel %vm1283_vm2, %v3876_v31, -inf }
0x11b0   : > { %3977 = vmax.xlane.f32.xlu0 %v3976_v36 }
0x11c7   : > { %v6477_v38 = vpop.f32.mrf.mxu0 }
0x11c8   : > { %3793 = vst.msk [vmem:[#allocation2 + $0x48] sm:$0xff] %vm1283_vm2, %v6477_v38 }
0x11c9   : > { %v3781_v39 = vpop.f32.mrf.mxu0 }
0x11ca   : > { %3792 = vst.msk [vmem:[#allocation2 + $0x40] sm:$0xff] %vm1283_vm2, %v3781_v39 }
0x11cf   : > { %v6491_v40 = vpop.f32.mrf.mxu0 }
0x11d0   : > { %v3985_v51 = vsel %vm1283_vm2, %v6491_v40, -inf }
0x11d1   : > { %v3967_v33 = vpop.f32.mrf.mxu0 }
0x11d2   : > { %v3982_v42 = vsel %vm1283_vm2, %v3967_v33, -inf }
0x11d3   : > { %3983 = vmax.xlane.f32.xlu0 %v3982_v42 }
0x11d7   : > { %3986 = vmax.xlane.f32.xlu0 %v3985_v51 }
0x1237   : > { %v3981_v55 = vpop.xlane.xlu1 %3980 }
0x1238   : > { %v3989_v43 = vsub.f32 %v6484_v35, %v3981_v55 }
0x1239   : > { %v3978_v44 = vpop.xlane.xlu0 %3977 }
0x123a   : > { %v3994_v45 = vmul.f32 1.442695, %v3989_v43  ;;  %v3988_v46 = vsub.f32 %v3876_v31, %v3978_v44 }
0x123c   : > { %6836 = vpow2.f32 %v3994_v45  ;;  %v3992_v54 = vmul.f32 1.442695, %v3988_v46 }
0x123e   : > { %6838 = vpow2.f32 %v3992_v54 }
0x1249   : > { %v6837_v48 = vpop.eup %6836 }
0x124a   : > { %v4003_v47 = vsel %vm1283_vm2, %v6837_v48, 0.0 }
0x124b   : > { %v6839_v50 = vpop.eup %6838  ;;  %4004 = vadd.xlane.f32.xlu0 %v4003_v47 }
0x124c   : > { %v4000_v53 = vsel %vm1283_vm2, %v6839_v50, 0.0 }
0x124d   : > { %4001 = vadd.xlane.f32.xlu1 %v4000_v53 }
0x125c   : > { %v3984_v41 = vpop.xlane.xlu0 %3983 }
0x125d   : > { %v3990_v61 = vsub.f32 %v3967_v33, %v3984_v41 }
0x125e   : > { %4022 = vrot.lane.b32.xlu1 %v8053_v13, %s7181_s14 }
0x125f   : > { %v3996_v62 = vmul.f32 1.442695, %v3990_v61 }
0x1260   : > { %v3987_v49 = vpop.xlane.xlu0 %3986 }
0x1261   : > { %4020 = vrot.lane.b32.xlu0 %v8057_v15, %s7181_s14  ;;  %v3991_v52 = vsub.f32 %v6491_v40, %v3987_v49 }
0x1262   : > { %4109 = vrot.lane.b32.xlu1 %v8065_v17, %s7181_s14 }
0x1263   : > { %v3998_v57 = vmul.f32 1.442695, %v3991_v52 }
0x1265   : > { %4107 = vrot.lane.b32.xlu0 %v8080_v26, %s7181_s14  ;;  %6840 = vpow2.f32 %v3998_v57 }
0x1266   : > { %4204 = vrot.lane.b32.xlu1 %v8053_v13, %s7184_s4  ;;  %6842 = vpow2.f32 %v3996_v62 }
0x1269   : > { %4295 = vrot.lane.b32.xlu0 %v8065_v17, %s7184_s4 }
0x126a   : > { %4202 = vrot.lane.b32.xlu1 %v8057_v15, %s7184_s4 }
0x126e   : > { %4198 = vrot.lane.b32.xlu1 %v8074_v24, %s7184_s4 }
0x1272   : > { %4293 = vrot.lane.b32.xlu1 %v8080_v26, %s7184_s4  ;;  %v6841_v63 = vpop.eup %6840 }
0x1273   : > { %v4009_v0 = vsel %vm1283_vm2, %v6841_v63, 0.0  ;;  %v6843_v1 = vpop.eup %6842 }
0x1274   : > { %v4006_v2 = vsel %vm1283_vm2, %v6843_v1, 0.0 }
0x1288   : > { %4010 = vadd.xlane.f32.xlu0 %v4009_v0 }
0x1296   : > { %4007 = vadd.xlane.f32.xlu1 %v4006_v2 }
0x129e   : > { %4200 = vrot.lane.b32.xlu0 %v8076_v25, %s7184_s4 }
0x12a2   : > { %4289 = vrot.lane.b32.xlu0 %v8090_v32, %s7184_s4 }
0x12a7   : > { %4291 = vrot.lane.b32.xlu1 %v8092_v58, %s7184_s4 }
0x12d4   : > { %v4005_v3 = vpop.xlane.xlu0 %4004 }
0x12d5   : > { %6844 = vrcp.f32 %v4005_v3 }
0x12d6   : > { %v4002_v4 = vpop.xlane.xlu1 %4001 }
0x12d7   : > { %6846 = vrcp.f32 %v4002_v4 }
0x12d8   : > { %v4021_v5 = vpop.permute.xlu0 %4020 }
0x12da   : > { %v4023_v6 = vpop.permute.xlu1 %4022 }
0x12db   : > { %6492 = vmatprep.subr.mxu1 %v4023_v6 }
0x12dc   : > { %6493 = vmatpush3.msra.mxu1 %v4023_v6  ;;  %v4108_v8 = vpop.permute.xlu0 %4107 }
0x12dd   : > { %6494 = vmatprep.subr.mxu1 %v4021_v5 }
0x12de   : > { %v4110_v9 = vpop.permute.xlu1 %4109  ;;  %6495 = vmatpush3.msra.mxu1 %v4021_v5 }
0x12df   : > { %6499 = vmatprep.subr.mxu0 %v4110_v9 }
0x12e0   : > { %6500 = vmatpush3.msra.mxu0 %v4110_v9  ;;  %v4296_v11 = vpop.permute.xlu0 %4295 }
0x12e1   : > { %6501 = vmatprep.subr.mxu0 %v4108_v8 }
0x12e2   : > { %v4205_v12 = vpop.permute.xlu1 %4204  ;;  %6502 = vmatpush3.msra.mxu0 %v4108_v8  ;;  %v6845_v14 = vpop.eup %6844 }
0x12e3   : > { %6506 = vmatprep.subr.msk.mxu1 %vm1283_vm2, %v4205_v12  ;;  %6513 = vmatprep.subr.msk.mxu0 %vm1283_vm2, %v4296_v11  ;;  %v4015_v20 = vmul.f32 %v6845_v14, %v6837_v48 }
0x12e4   : > { %v6847_v16 = vpop.eup %6846 }
0x12e5   : > { %v4013_v18 = vmul.f32 %v6847_v16, %v6839_v50 }
0x12e6   : > { %v4203_v19 = vpop.permute.xlu1 %4202 }
0x12e7   : > { %6496 = vmatprep.mubr.msk.f32.mxu1 %vm1283_vm2, %v4013_v18 }
0x12e8   : > { %6497 = vmatmul.mubr.msk.f32.vlgmr.msra.gmra.mxu1 %vm1283_vm2, %v4015_v20 }
0x12e9   : > { %6507 = vmatpush3.xpose.msk.msra.mxu1 %vm1283_vm2, %v4205_v12 }
0x12ea   : > { %6508 = vmatprep.subr.msk.mxu1 %vm1283_vm2, %v4203_v19  ;;  %v4199_v21 = vpop.permute.xlu1 %4198 }
0x12eb   : > { %6510 = vmatprep.mubr.msk.f32.mxu1 %vm1283_vm2, %v4199_v21 }
0x12ed   : > { %6509 = vmatpush3.xpose.msk.msra.mxu1 %vm1283_vm2, %v4203_v19 }
0x12ee   : > { %v4294_v27 = vpop.permute.xlu1 %4293 }
0x1311   : > { %v4011_v22 = vpop.xlane.xlu0 %4010 }
0x1312   : > { %6848 = vrcp.f32 %v4011_v22 }
0x1315   : > { %v4201_v23 = vpop.permute.xlu0 %4200 }
0x1316   : > { %6511 = vmatmul.mubr.msk.f32.vlgmr.msra.gmra.mxu1 %vm1283_vm2, %v4201_v23 }
0x1319   : > { %v4290_v35 = vpop.permute.xlu0 %4289 }
0x131f   : > { %v4008_v28 = vpop.xlane.xlu1 %4007  ;;  %v6849_v29 = vpop.eup %6848 }
0x1320   : > { %6850 = vrcp.f32 %v4008_v28  ;;  %v4019_v34 = vmul.f32 %v6849_v29, %v6841_v63 }
0x1323   : > { %v4292_v37 = vpop.permute.xlu1 %4291 }
0x132d   : > { %v6851_v30 = vpop.eup %6850 }
0x132e   : > { %v4017_v56 = vmul.f32 %v6851_v30, %v6843_v1 }
0x1330   : > { %6503 = vmatprep.mubr.msk.f32.mxu0 %vm1283_vm2, %v4017_v56 }
0x1331   : > { %6504 = vmatmul.mubr.msk.f32.vlgmr.msra.gmra.mxu0 %vm1283_vm2, %v4019_v34 }
0x1332   : > { %6514 = vmatpush3.xpose.msk.msra.mxu0 %vm1283_vm2, %v4296_v11  ;;  %6517 = vmatprep.mubr.msk.f32.mxu0 %vm1283_vm2, %v4290_v35 }
0x1333   : > { %6515 = vmatprep.subr.msk.mxu0 %vm1283_vm2, %v4294_v27 }
0x1336   : > { %6516 = vmatpush3.xpose.msk.msra.mxu0 %vm1283_vm2, %v4294_v27 }
0x1339   : > { %6518 = vmatmul.mubr.msk.f32.vlgmr.msra.gmra.mxu0 %vm1283_vm2, %v4292_v37 }
0x13a8   : > { %v6498_v31 = vpop.f32.mrf.mxu1 }
0x13a9   : > { %4195 = vst.msk [vmem:[#allocation2 + $0x18] sm:$0xff] %vm1283_vm2, %v6498_v31 }
0x13aa   : > { %v4098_v36 = vpop.f32.mrf.mxu1 }
0x13ab   : > { %4194 = vst.msk [vmem:[#allocation2 + $0x10] sm:$0xff] %vm1283_vm2, %v4098_v36 }
0x13d6   : > { %v6512_v38 = vpop.f32.mrf.mxu1 }
0x13d7   : > { %v4383_v39 = vsel %vm1283_vm2, %v6512_v38, -inf }
0x13d8   : > { %4384 = vmax.xlane.f32.xlu1 %v4383_v39  ;;  %v4280_v40 = vpop.f32.mrf.mxu1 }
0x13d9   : > { %v4380_v33 = vsel %vm1283_vm2, %v4280_v40, -inf }
0x13da   : > { %4381 = vmax.xlane.f32.xlu0 %v4380_v33 }
0x13f1   : > { %v6505_v42 = vpop.f32.mrf.mxu0 }
0x13f2   : > { %4197 = vst.msk [vmem:[#allocation2 + $0x58] sm:$0xff] %vm1283_vm2, %v6505_v42 }
0x13f3   : > { %v4185_v51 = vpop.f32.mrf.mxu0 }
0x13f4   : > { %4196 = vst.msk [vmem:[#allocation2 + $0x50] sm:$0xff] %vm1283_vm2, %v4185_v51 }
0x13f9   : > { %v6519_v55 = vpop.f32.mrf.mxu0 }
0x13fa   : > { %v4389_v45 = vsel %vm1283_vm2, %v6519_v55, -inf }
0x13fb   : > { %v4371_v43 = vpop.f32.mrf.mxu0 }
0x13fc   : > { %v4386_v44 = vsel %vm1283_vm2, %v4371_v43, -inf }
0x13fd   : > { %4387 = vmax.xlane.f32.xlu0 %v4386_v44 }
0x1401   : > { %4390 = vmax.xlane.f32.xlu0 %v4389_v45 }
0x1461   : > { %v4385_v46 = vpop.xlane.xlu1 %4384 }
0x1462   : > { %v4393_v54 = vsub.f32 %v6512_v38, %v4385_v46 }
0x1463   : > { %v4382_v48 = vpop.xlane.xlu0 %4381 }
0x1464   : > { %v4398_v47 = vmul.f32 1.442695, %v4393_v54  ;;  %v4392_v50 = vsub.f32 %v4280_v40, %v4382_v48 }
0x1466   : > { %6852 = vpow2.f32 %v4398_v47  ;;  %v4396_v53 = vmul.f32 1.442695, %v4392_v50 }
0x1468   : > { %6854 = vpow2.f32 %v4396_v53 }
0x1473   : > { %v6853_v41 = vpop.eup %6852 }
0x1474   : > { %v4407_v49 = vsel %vm1283_vm2, %v6853_v41, 0.0 }
0x1475   : > { %v6855_v52 = vpop.eup %6854  ;;  %4408 = vadd.xlane.f32.xlu0 %v4407_v49 }
0x1476   : > { %v4404_v57 = vsel %vm1283_vm2, %v6855_v52, 0.0 }
0x1477   : > { %4405 = vadd.xlane.f32.xlu1 %v4404_v57 }
0x1486   : > { %v4388_v61 = vpop.xlane.xlu0 %4387 }
0x1487   : > { %v4394_v1 = vsub.f32 %v4371_v43, %v4388_v61 }
0x1488   : > { %4426 = vrot.lane.b32.xlu1 %v8053_v13, %s7183_s25 }
0x1489   : > { %v4400_v2 = vmul.f32 1.442695, %v4394_v1 }
0x148a   : > { %v4391_v62 = vpop.xlane.xlu0 %4390 }
0x148b   : > { %4424 = vrot.lane.b32.xlu0 %v8057_v15, %s7183_s25  ;;  %v4395_v63 = vsub.f32 %v6519_v55, %v4391_v62 }
0x148c   : > { %4513 = vrot.lane.b32.xlu1 %v8065_v17, %s7183_s25 }
0x148d   : > { %v4402_v0 = vmul.f32 1.442695, %v4395_v63 }
0x148f   : > { %4511 = vrot.lane.b32.xlu0 %v8080_v26, %s7183_s25  ;;  %6856 = vpow2.f32 %v4402_v0 }
0x1490   : > { %4608 = vrot.lane.b32.xlu1 %v8053_v13, %s7186_s23  ;;  %6858 = vpow2.f32 %v4400_v2 }
0x1493   : > { %4699 = vrot.lane.b32.xlu0 %v8065_v17, %s7186_s23 }
0x1494   : > { %4606 = vrot.lane.b32.xlu1 %v8057_v15, %s7186_s23 }
0x1498   : > { %4602 = vrot.lane.b32.xlu1 %v8074_v24, %s7186_s23 }
0x149c   : > { %4697 = vrot.lane.b32.xlu1 %v8080_v26, %s7186_s23  ;;  %v6857_v3 = vpop.eup %6856 }
0x149d   : > { %v4413_v4 = vsel %vm1283_vm2, %v6857_v3, 0.0  ;;  %v6859_v5 = vpop.eup %6858 }
0x149e   : > { %v4410_v6 = vsel %vm1283_vm2, %v6859_v5, 0.0 }
0x14b2   : > { %4414 = vadd.xlane.f32.xlu0 %v4413_v4 }
0x14c0   : > { %4411 = vadd.xlane.f32.xlu1 %v4410_v6 }
0x14c8   : > { %4604 = vrot.lane.b32.xlu0 %v8076_v25, %s7186_s23 }
0x14cc   : > { %4693 = vrot.lane.b32.xlu0 %v8090_v32, %s7186_s23 }
0x14d1   : > { %4695 = vrot.lane.b32.xlu1 %v8092_v58, %s7186_s23  ;;  %s8567_s23 = sld [smem:[#allocation40_spill]] }
0x14d7   : > { %s8568_s29 = scalar_lea.vmem %s8567_s23, %s7588_s1 }
0x14fe   : > { %v4409_v24 = vpop.xlane.xlu0 %4408 }
0x14ff   : > { %6860 = vrcp.f32 %v4409_v24  ;;  %v5018_v24 = vld [vmem:[#allocation2 + $0x3] ss:$4 sm:$0xff] }
0x1500   : > { %v4406_v8 = vpop.xlane.xlu1 %4405 }
0x1501   : > { %6862 = vrcp.f32 %v4406_v8  ;;  %v5012_v8 = vld [vmem:[#allocation2 + $0x41] ss:$4 sm:$0xff] }
0x1502   : > { %v4425_v9 = vpop.permute.xlu0 %4424 }
0x1504   : > { %v4427_v11 = vpop.permute.xlu1 %4426 }
0x1505   : > { %6520 = vmatprep.subr.mxu1 %v4427_v11 }
0x1506   : > { %6521 = vmatpush3.msra.mxu1 %v4427_v11  ;;  %v4512_v12 = vpop.permute.xlu0 %4511  ;;  %v5020_v11 = vld [vmem:[#allocation2 + $0x43] ss:$4 sm:$0xff] }
0x1507   : > { %6522 = vmatprep.subr.mxu1 %v4425_v9 }
0x1508   : > { %v4514_v14 = vpop.permute.xlu1 %4513  ;;  %6523 = vmatpush3.msra.mxu1 %v4425_v9  ;;  %v5016_v9 = vld [vmem:[#allocation2 + $0x42] ss:$4 sm:$0xff] }
0x1509   : > { %6527 = vmatprep.subr.mxu0 %v4514_v14 }
0x150a   : > { %6528 = vmatpush3.msra.mxu0 %v4514_v14  ;;  %v4700_v25 = vpop.permute.xlu0 %4699 }
0x150b   : > { %6529 = vmatprep.subr.mxu0 %v4512_v12 }
0x150c   : > { %v4609_v32 = vpop.permute.xlu1 %4608  ;;  %6530 = vmatpush3.msra.mxu0 %v4512_v12  ;;  %v6861_v16 = vpop.eup %6860 }
0x150d   : > { %6534 = vmatprep.subr.msk.mxu1 %vm1283_vm2, %v4609_v32  ;;  %6541 = vmatprep.subr.msk.mxu0 %vm1283_vm2, %v4700_v25  ;;  %v4419_v20 = vmul.f32 %v6861_v16, %v6853_v41 }
0x150e   : > { %v6863_v58 = vpop.eup %6862 }
0x150f   : > { %v4417_v18 = vmul.f32 %v6863_v58, %v6855_v52 }
0x1510   : > { %v4607_v19 = vpop.permute.xlu1 %4606 }
0x1511   : > { %6524 = vmatprep.mubr.msk.f32.mxu1 %vm1283_vm2, %v4417_v18 }
0x1512   : > { %6525 = vmatmul.mubr.msk.f32.vlgmr.msra.gmra.mxu1 %vm1283_vm2, %v4419_v20 }
0x1513   : > { %6535 = vmatpush3.xpose.msk.msra.mxu1 %vm1283_vm2, %v4609_v32 }
0x1514   : > { %6536 = vmatprep.subr.msk.mxu1 %vm1283_vm2, %v4607_v19  ;;  %v4603_v21 = vpop.permute.xlu1 %4602 }
0x1515   : > { %6538 = vmatprep.mubr.msk.f32.mxu1 %vm1283_vm2, %v4603_v21 }
0x1517   : > { %6537 = vmatpush3.xpose.msk.msra.mxu1 %vm1283_vm2, %v4607_v19 }
0x1518   : > { %v4698_v27 = vpop.permute.xlu1 %4697 }
0x153b   : > { %v4415_v22 = vpop.xlane.xlu0 %4414 }
0x153c   : > { %6864 = vrcp.f32 %v4415_v22  ;;  %v5006_v22 = vld [vmem:[#allocation2] ss:$4 sm:$0xff] }
0x153f   : > { %v4605_v23 = vpop.permute.xlu0 %4604 }
0x1540   : > { %6539 = vmatmul.mubr.msk.f32.vlgmr.msra.gmra.mxu1 %vm1283_vm2, %v4605_v23 }
0x1543   : > { %v4694_v35 = vpop.permute.xlu0 %4693 }
0x1549   : > { %v4412_v28 = vpop.xlane.xlu1 %4411  ;;  %v6865_v29 = vpop.eup %6864 }
0x154a   : > { %6866 = vrcp.f32 %v4412_v28  ;;  %v4423_v34 = vmul.f32 %v6865_v29, %v6857_v3 }
0x154d   : > { %v4696_v37 = vpop.permute.xlu1 %4695 }
0x1557   : > { %v6867_v30 = vpop.eup %6866 }
0x1558   : > { %v4421_v56 = vmul.f32 %v6867_v30, %v6859_v5 }
0x155a   : > { %6531 = vmatprep.mubr.msk.f32.mxu0 %vm1283_vm2, %v4421_v56 }
0x155b   : > { %6532 = vmatmul.mubr.msk.f32.vlgmr.msra.gmra.mxu0 %vm1283_vm2, %v4423_v34 }
0x155c   : > { %6542 = vmatpush3.xpose.msk.msra.mxu0 %vm1283_vm2, %v4700_v25  ;;  %6545 = vmatprep.mubr.msk.f32.mxu0 %vm1283_vm2, %v4694_v35 }
0x155d   : > { %6543 = vmatprep.subr.msk.mxu0 %vm1283_vm2, %v4698_v27 }
0x1560   : > { %6544 = vmatpush3.xpose.msk.msra.mxu0 %vm1283_vm2, %v4698_v27 }
0x1563   : > { %6546 = vmatmul.mubr.msk.f32.vlgmr.msra.gmra.mxu0 %vm1283_vm2, %v4696_v37 }
0x15d2   : > { %v6526_v31 = vpop.f32.mrf.mxu1 }
0x15d3   : > { %4599 = vst.msk [vmem:[#allocation2 + $0x28] sm:$0xff] %vm1283_vm2, %v6526_v31 }
0x15d4   : > { %v4502_v36 = vpop.f32.mrf.mxu1 }
0x15d5   : > { %4598 = vst.msk [vmem:[#allocation2 + $0x20] sm:$0xff] %vm1283_vm2, %v4502_v36  ;;  %v5089_v36 = vld [vmem:[%s8564_s10 + $0x38] sm:$0xff] }
0x1600   : > { %v6540_v38 = vpop.f32.mrf.mxu1 }
0x1601   : > { %v4787_v39 = vsel %vm1283_vm2, %v6540_v38, -inf }
0x1602   : > { %4788 = vmax.xlane.f32.xlu1 %v4787_v39  ;;  %v4684_v40 = vpop.f32.mrf.mxu1  ;;  %v5087_v39 = vld [vmem:[%s8564_s10 + $0x28] sm:$0xff] }
0x1603   : > { %v4784_v33 = vsel %vm1283_vm2, %v4684_v40, -inf }
0x1604   : > { %4785 = vmax.xlane.f32.xlu0 %v4784_v33  ;;  %v5085_v33 = vld [vmem:[%s8564_s10 + $0x18] sm:$0xff] }
0x161b   : > { %v6533_v42 = vpop.f32.mrf.mxu0 }
0x161c   : > { %4601 = vst.msk [vmem:[#allocation2 + $0x68] sm:$0xff] %vm1283_vm2, %v6533_v42  ;;  %v5084_v42 = vld [vmem:[%s8564_s10 + $0x10] sm:$0xff] }
0x161d   : > { %v4589_v51 = vpop.f32.mrf.mxu0 }
0x161e   : > { %4600 = vst.msk [vmem:[#allocation2 + $0x60] sm:$0xff] %vm1283_vm2, %v4589_v51 }
0x1623   : > { %v6547_v55 = vpop.f32.mrf.mxu0 }
0x1624   : > { %v4793_v45 = vsel %vm1283_vm2, %v6547_v55, -inf }
0x1625   : > { %v4775_v43 = vpop.f32.mrf.mxu0 }
0x1626   : > { %v4790_v44 = vsel %vm1283_vm2, %v4775_v43, -inf }
0x1627   : > { %4791 = vmax.xlane.f32.xlu0 %v4790_v44  ;;  %v5082_v44 = vld [vmem:[%s8564_s10] sm:$0xff] }
0x162b   : > { %4794 = vmax.xlane.f32.xlu0 %v4793_v45 }
0x168b   : > { %v4789_v46 = vpop.xlane.xlu1 %4788 }
0x168c   : > { %v4797_v54 = vsub.f32 %v6540_v38, %v4789_v46  ;;  %v5088_v38 = vld [vmem:[%s8564_s10 + $0x30] sm:$0xff] }
0x168d   : > { %v4786_v48 = vpop.xlane.xlu0 %4785 }
0x168e   : > { %v4802_v47 = vmul.f32 1.442695, %v4797_v54  ;;  %v4796_v50 = vsub.f32 %v4684_v40, %v4786_v48  ;;  %v5086_v40 = vld [vmem:[%s8564_s10 + $0x20] sm:$0xff] }
0x1690   : > { %6868 = vpow2.f32 %v4802_v47  ;;  %v4800_v53 = vmul.f32 1.442695, %v4796_v50 }
0x1692   : > { %6870 = vpow2.f32 %v4800_v53 }
0x169d   : > { %v6869_v41 = vpop.eup %6868 }
0x169e   : > { %v4811_v49 = vsel %vm1283_vm2, %v6869_v41, 0.0 }
0x169f   : > { %v6871_v52 = vpop.eup %6870  ;;  %4812 = vadd.xlane.f32.xlu0 %v4811_v49 }
0x16a0   : > { %v4808_v57 = vsel %vm1283_vm2, %v6871_v52, 0.0 }
0x16a1   : > { %4809 = vadd.xlane.f32.xlu1 %v4808_v57 }
0x16b0   : > { %v4792_v61 = vpop.xlane.xlu0 %4791 }
0x16b1   : > { %v4798_v1 = vsub.f32 %v4775_v43, %v4792_v61  ;;  %v5083_v43 = vld [vmem:[%s8564_s10 + $0x8] sm:$0xff] }
0x16b2   : > { %4830 = vrot.lane.b32.xlu1 %v8053_v13, %s7185_s16  ;;  %v5010_v13 = vld [vmem:[#allocation2 + $0x1] ss:$4 sm:$0xff] }
0x16b3   : > { %v4804_v2 = vmul.f32 1.442695, %v4798_v1 }
0x16b4   : > { %v4795_v62 = vpop.xlane.xlu0 %4794 }
0x16b5   : > { %v4799_v63 = vsub.f32 %v6547_v55, %v4795_v62 }
0x16b6   : > { %4917 = vrot.lane.b32.xlu1 %v8065_v17, %s7185_s16  ;;  %v5014_v17 = vld [vmem:[#allocation2 + $0x2] ss:$4 sm:$0xff] }
0x16b7   : > { %v4806_v0 = vmul.f32 1.442695, %v4799_v63  ;;  %v5008_v63 = vld [vmem:[#allocation2 + $0x40] ss:$4 sm:$0xff] }
0x16b9   : > { %6872 = vpow2.f32 %v4806_v0 }
0x16ba   : > { %6874 = vpow2.f32 %v4804_v2 }
0x16c6   : > { %v6873_v3 = vpop.eup %6872 }
0x16c7   : > { %v4817_v4 = vsel %vm1283_vm2, %v6873_v3, 0.0  ;;  %v6875_v5 = vpop.eup %6874 }
0x16c8   : > { %4818 = vadd.xlane.f32.xlu0 %v4817_v4  ;;  %v4814_v6 = vsel %vm1283_vm2, %v6875_v5, 0.0 }
0x16da   : > { %4815 = vadd.xlane.f32.xlu1 %v4814_v6 }
0x16de   : > { %4828 = vrot.lane.b32.xlu0 %v8057_v15, %s7185_s16 }
0x16e2   : > { %5026 = vrot.lane.b32.xlu0 %v5010_v13, %s7185_s16 }
0x16e6   : > { %5042 = vrot.lane.b32.xlu0 %v5014_v17, %s7183_s25 }
0x16ea   : > { %5058 = vrot.lane.b32.xlu0 %v5018_v24, %s7181_s14 }
0x16eb   : > { %4915 = vrot.lane.b32.xlu1 %v8080_v26, %s7185_s16 }
0x16ee   : > { %5030 = vrot.lane.b32.xlu0 %v5012_v8, %s7185_s16 }
0x16f2   : > { %5046 = vrot.lane.b32.xlu0 %v5016_v9, %s7183_s25 }
0x16f6   : > { %5062 = vrot.lane.b32.xlu0 %v5020_v11, %s7181_s14 }
0x1728   : > { %v4813_v26 = vpop.xlane.xlu0 %4812 }
0x172a   : > { %v4810_v15 = vpop.xlane.xlu1 %4809 }
0x172b   : > { %6876 = vrcp.f32 %v4810_v15 }
0x172c   : > { %6878 = vrcp.f32 %v4813_v26 }
0x172e   : > { %v4831_v12 = vpop.permute.xlu1 %4830 }
0x172f   : > { %6548 = vmatprep.subr.mxu1 %v4831_v12 }
0x1730   : > { %6549 = vmatpush3.msra.mxu1 %v4831_v12 }
0x1732   : > { %v4918_v14 = vpop.permute.xlu1 %4917 }
0x1733   : > { %6555 = vmatprep.subr.mxu0 %v4918_v14 }
0x1734   : > { %6556 = vmatpush3.msra.mxu0 %v4918_v14 }
0x1738   : > { %v6877_v25 = vpop.eup %6876 }
0x1739   : > { %v4821_v32 = vmul.f32 %v6877_v25, %v6871_v52  ;;  %v6879_v58 = vpop.eup %6878 }
0x173a   : > { %v4823_v19 = vmul.f32 %v6879_v58, %v6869_v41 }
0x173b   : > { %6552 = vmatprep.mubr.msk.f32.mxu1 %vm1283_vm2, %v4821_v32 }
0x1751   : > { %v4819_v16 = vpop.xlane.xlu0 %4818 }
0x1752   : > { %6880 = vrcp.f32 %v4819_v16 }
0x1755   : > { %v4829_v18 = vpop.permute.xlu0 %4828 }
0x1756   : > { %6550 = vmatprep.subr.mxu1 %v4829_v18 }
0x1757   : > { %6551 = vmatpush3.msra.mxu1 %v4829_v18 }
0x1758   : > { %6553 = vmatmul.mubr.msk.f32.vlgmr.msra.gmra.mxu1 %vm1283_vm2, %v4823_v19  ;;  %6562 = vmatprep.subr.mxu1 %v5089_v36 }
0x1759   : > { %v5027_v20 = vpop.permute.xlu0 %5026  ;;  %6563 = vmatpush3.msra.mxu1 %v5089_v36 }
0x175a   : > { %v5070_v23 = vsel %vm1283_vm2, %v5006_v22, %v5027_v20  ;;  %6564 = vmatprep.subr.mxu1 %v5088_v38 }
0x175b   : > { %6565 = vmatpush3.msra.mxu1 %v5088_v38 }
0x175c   : > { %6566 = vmatprep.subr.mxu1 %v5087_v39 }
0x175d   : > { %v5043_v21 = vpop.permute.xlu0 %5042  ;;  %6567 = vmatpush3.msra.mxu1 %v5087_v39  ;;  %v5279_v39 = vld [vmem:[%s7662_s6 + $0x38] sm:$0xff] }
0x175e   : > { %v5074_v27 = vsel %vm2969_vm3, %v5070_v23, %v5043_v21  ;;  %6568 = vmatprep.subr.mxu1 %v5086_v40 }
0x175f   : > { %v6881_v34 = vpop.eup %6880  ;;  %6569 = vmatpush3.msra.mxu1 %v5086_v40 }
0x1760   : > { %v4827_v31 = vmul.f32 %v6881_v34, %v6873_v3  ;;  %6570 = vmatprep.subr.mxu1 %v5085_v33 }
0x1761   : > { %v5059_v28 = vpop.permute.xlu0 %5058  ;;  %6571 = vmatpush3.msra.mxu1 %v5085_v33  ;;  %v5278_v33 = vld [vmem:[%s7662_s6 + $0x30] sm:$0xff] }
0x1762   : > { %v5078_v29 = vsel %vm2974_vm4, %v5074_v27, %v5059_v28  ;;  %6572 = vmatprep.subr.mxu1 %v5084_v42 }
0x1763   : > { %6578 = vmatprep.mubr.msk.f32.mxu1 %vm1171_vm1, %v5078_v29  ;;  %v4816_v30 = vpop.xlane.xlu1 %4815  ;;  %6573 = vmatpush3.msra.mxu1 %v5084_v42 }
0x1764   : > { %6882 = vrcp.f32 %v4816_v30  ;;  %6574 = vmatprep.subr.mxu1 %v5083_v43 }
0x1765   : > { %6575 = vmatpush3.msra.mxu1 %v5083_v43  ;;  %v5031_v49 = vpop.permute.xlu0 %5030 }
0x1766   : > { %6576 = vmatprep.subr.mxu1 %v5082_v44  ;;  %v5072_v2 = vsel %vm1283_vm2, %v5008_v63, %v5031_v49  ;;  %v5272_v49 = vld [vmem:[%s7662_s6] sm:$0xff]  ;;  %v5400_v63 = vld [vmem:[%s7647_s20 + $0x60] sm:$0xff] }
0x1767   : > { %v4916_v56 = vpop.permute.xlu1 %4915  ;;  %6577 = vmatpush3.msra.mxu1 %v5082_v44  ;;  %v5276_v44 = vld [vmem:[%s7662_s6 + $0x20] sm:$0xff] }
0x1768   : > { %6557 = vmatprep.subr.mxu0 %v4916_v56 }
0x1769   : > { %6558 = vmatpush3.msra.mxu0 %v4916_v56  ;;  %v5047_v57 = vpop.permute.xlu0 %5046 }
0x176a   : > { %6584 = vmatprep.subr.mxu0 %v5279_v39 }
0x176d   : > { %v5063_v0 = vpop.permute.xlu0 %5062 }
0x1771   : > { %v6883_v35 = vpop.eup %6882 }
0x1772   : > { %v4825_v37 = vmul.f32 %v6883_v35, %v6875_v5  ;;  %v5076_v5 = vsel %vm2969_vm3, %v5072_v2, %v5047_v57  ;;  %v5403_v57 = vld [vmem:[%s7647_s20 + $0x78] sm:$0xff]  ;;  %v5397_v2 = vld [vmem:[%s7647_s20 + $0x48] sm:$0xff] }
0x1773   : > { %v5080_v13 = vsel %vm2974_vm4, %v5076_v5, %v5063_v0  ;;  %6606 = vmatprep.subr.mxu1 %v5403_v57  ;;  %v5399_v0 = vld [vmem:[%s7647_s20 + $0x58] sm:$0xff]  ;;  %v5394_v5 = vld [vmem:[%s7647_s20 + $0x30] sm:$0xff] }
0x1774   : > { %6559 = vmatprep.mubr.msk.f32.mxu0 %vm1283_vm2, %v4825_v37 }
0x1775   : > { %6560 = vmatmul.mubr.msk.f32.vlgmr.msra.gmra.mxu0 %vm1283_vm2, %v4827_v31 }
0x1776   : > { %6585 = vmatpush3.msra.mxu0 %v5279_v39  ;;  %v6045_v39 = vld [vmem:[%s1105_s0] ss:$0 sm:$0xff] }
0x1777   : > { %6586 = vmatprep.subr.mxu0 %v5278_v33 }
0x1778   : > { %6587 = vmatpush3.msra.mxu0 %v5278_v33 }
0x1818   : > { %v6554_v51 = vpop.f32.mrf.mxu1 }
0x1819   : > { %5003 = vst.msk [vmem:[#allocation2 + $0x38] sm:$0xff] %vm1283_vm2, %v6554_v51  ;;  %v5277_v51 = vld [vmem:[%s7662_s6 + $0x28] sm:$0xff] }
0x181a   : > { %v4906_v55 = vpop.f32.mrf.mxu1  ;;  %6588 = vmatprep.subr.mxu0 %v5277_v51 }
0x181b   : > { %5002 = vst.msk [vmem:[#allocation2 + $0x30] sm:$0xff] %vm1283_vm2, %v4906_v55  ;;  %6589 = vmatpush3.msra.mxu0 %v5277_v51 }
0x181c   : > { %6590 = vmatprep.subr.mxu0 %v5276_v44 }
0x181d   : > { %6591 = vmatpush3.msra.mxu0 %v5276_v44 }
0x1822   : > { %v5011_v45 = vld [vmem:[#allocation2 + $0x21] ss:$4 sm:$0xff]  ;;  %v5015_v46 = vld [vmem:[#allocation2 + $0x22] ss:$4 sm:$0xff]  ;;  %v5019_v54 = vld [vmem:[#allocation2 + $0x23] ss:$4 sm:$0xff] }
0x1823   : > { %5028 = vrot.lane.b32.xlu1 %v5011_v45, %s7185_s16  ;;  %v5007_v62 = vld [vmem:[#allocation2 + $0x20] ss:$4 sm:$0xff] }
0x1827   : > { %5044 = vrot.lane.b32.xlu1 %v5015_v46, %s7183_s25 }
0x182b   : > { %5060 = vrot.lane.b32.xlu1 %v5019_v54, %s7181_s14  ;;  %v5275_v54 = vld [vmem:[%s7662_s6 + $0x18] sm:$0xff] }
0x182c   : > { %6592 = vmatprep.subr.mxu0 %v5275_v54 }
0x182d   : > { %6593 = vmatpush3.msra.mxu0 %v5275_v54 }
0x1835   : > { %v6561_v48 = vpop.f32.mrf.mxu0 }
0x1836   : > { %5005 = vst.msk [vmem:[#allocation2 + $0x78] sm:$0xff] %vm1283_vm2, %v6561_v48  ;;  %v5274_v48 = vld [vmem:[%s7662_s6 + $0x10] sm:$0xff] }
0x1837   : > { %v4993_v47 = vpop.f32.mrf.mxu0  ;;  %6594 = vmatprep.subr.mxu0 %v5274_v48 }
0x1838   : > { %5004 = vst.msk [vmem:[#allocation2 + $0x70] sm:$0xff] %vm1283_vm2, %v4993_v47  ;;  %6595 = vmatpush3.msra.mxu0 %v5274_v48 }
0x183f   : > { %v5013_v50 = vld [vmem:[#allocation2 + $0x61] ss:$4 sm:$0xff]  ;;  %v5017_v53 = vld [vmem:[#allocation2 + $0x62] ss:$4 sm:$0xff]  ;;  %v5021_v41 = vld [vmem:[#allocation2 + $0x63] ss:$4 sm:$0xff] }
0x1840   : > { %5032 = vrot.lane.b32.xlu1 %v5013_v50, %s7185_s16  ;;  %v5009_v8 = vld [vmem:[#allocation2 + $0x60] ss:$4 sm:$0xff] }
0x1844   : > { %5048 = vrot.lane.b32.xlu1 %v5017_v53, %s7183_s25  ;;  %s8565_s25 = sld [smem:[#allocation39_spill]]  ;;  %v5273_v53 = vld [vmem:[%s7662_s6 + $0x8] sm:$0xff] }
0x1845   : > { %6596 = vmatprep.subr.mxu0 %v5273_v53 }
0x1846   : > { %6597 = vmatpush3.msra.mxu0 %v5273_v53 }
0x1847   : > { %6598 = vmatprep.subr.mxu0 %v5272_v49 }
0x1848   : > { %5064 = vrot.lane.b32.xlu1 %v5021_v41, %s7181_s14  ;;  %6599 = vmatpush3.msra.mxu0 %v5272_v49 }
0x184a   : > { %s8566_s4 = scalar_lea.vmem %s8565_s25, %s7588_s1  ;;  %s7187_s1 = smov [#allocation15]  }
0x184b   : > { %v6038_v14 = vld [vmem:[%s8566_s4] ss:$0 sm:$0xff] }
0x1895   : > { %v5029_v52 = vpop.permute.xlu1 %5028 }
0x1896   : > { %v5071_v1 = vsel %vm1283_vm2, %v5007_v62, %v5029_v52  ;;  %v5401_v62 = vld [vmem:[%s7647_s20 + $0x68] sm:$0xff] }
0x1899   : > { %v5045_v61 = vpop.permute.xlu1 %5044 }
0x189a   : > { %v5075_v3 = vsel %vm2969_vm3, %v5071_v1, %v5045_v61  ;;  %v5402_v61 = vld [vmem:[%s7647_s20 + $0x70] sm:$0xff] }
0x189b   : > { %v5398_v1 = vld [vmem:[%s7647_s20 + $0x50] sm:$0xff] }
0x189d   : > { %v5061_v4 = vpop.permute.xlu1 %5060 }
0x189e   : > { %v5079_v6 = vsel %vm2974_vm4, %v5075_v3, %v5061_v4  ;;  %v5396_v3 = vld [vmem:[%s7647_s20 + $0x40] sm:$0xff]  ;;  %v5395_v4 = vld [vmem:[%s7647_s20 + $0x38] sm:$0xff] }
0x189f   : > { %6579 = vmatmul.mubr.msk.f32.vlgmr.msra.gmra.mxu1 %vm1171_vm1, %v5079_v6  ;;  %v5393_v6 = vld [vmem:[%s7647_s20 + $0x28] sm:$0xff] }
0x18a0   : > { %6581 = vmatprep.mubr.msk.f32.mxu1 %vm1171_vm1, %v5080_v13  ;;  %6607 = vmatpush3.msra.mxu1 %v5403_v57  ;;  %v5392_v13 = vld [vmem:[%s7647_s20 + $0x20] sm:$0xff] }
0x18a1   : > { %6608 = vmatprep.subr.mxu1 %v5402_v61 }
0x18a2   : > { %6609 = vmatpush3.msra.mxu1 %v5402_v61 }
0x18a3   : > { %6610 = vmatprep.subr.mxu1 %v5401_v62 }
0x18a4   : > { %6611 = vmatpush3.msra.mxu1 %v5401_v62 }
0x18a5   : > { %6612 = vmatprep.subr.mxu1 %v5400_v63 }
0x18a6   : > { %6613 = vmatpush3.msra.mxu1 %v5400_v63 }
0x18a7   : > { %6614 = vmatprep.subr.mxu1 %v5399_v0 }
0x18a8   : > { %6615 = vmatpush3.msra.mxu1 %v5399_v0 }
0x18a9   : > { %6616 = vmatprep.subr.mxu1 %v5398_v1 }
0x18aa   : > { %6617 = vmatpush3.msra.mxu1 %v5398_v1 }
0x18ab   : > { %6618 = vmatprep.subr.mxu1 %v5397_v2 }
0x18ac   : > { %6619 = vmatpush3.msra.mxu1 %v5397_v2 }
0x18ad   : > { %6620 = vmatprep.subr.mxu1 %v5396_v3 }
0x18ae   : > { %6621 = vmatpush3.msra.mxu1 %v5396_v3 }
0x18af   : > { %6622 = vmatprep.subr.mxu1 %v5395_v4 }
0x18b0   : > { %6623 = vmatpush3.msra.mxu1 %v5395_v4 }
0x18b1   : > { %6624 = vmatprep.subr.mxu1 %v5394_v5 }
0x18b2   : > { %v5033_v17 = vpop.permute.xlu1 %5032  ;;  %6625 = vmatpush3.msra.mxu1 %v5394_v5 }
0x18b3   : > { %v5073_v9 = vsel %vm1283_vm2, %v5009_v8, %v5033_v17  ;;  %6626 = vmatprep.subr.mxu1 %v5393_v6 }
0x18b4   : > { %6627 = vmatpush3.msra.mxu1 %v5393_v6 }
0x18b5   : > { %6628 = vmatprep.subr.mxu1 %v5392_v13 }
0x18b6   : > { %v5049_v24 = vpop.permute.xlu1 %5048  ;;  %6629 = vmatpush3.msra.mxu1 %v5392_v13 }
0x18b7   : > { %v5077_v11 = vsel %vm2969_vm3, %v5073_v9, %v5049_v24 }
0x18ba   : > { %v5065_v15 = vpop.permute.xlu1 %5064 }
0x18bb   : > { %v5081_v12 = vsel %vm2974_vm4, %v5077_v11, %v5065_v15 }
0x18bc   : > { %6582 = vmatmul.mubr.msk.f32.gmra.mxu1 %vm1171_vm1, %v5081_v12 }
0x195f   : > { %v6580_v25 = vpop.f32.mrf.mxu1 }
0x1960   : > { %v5181_v32 = vadd.f32 %v6580_v25, %v6038_v14  ;;  %v6043_v25 = vld [vmem:[%s8568_s29] ss:$0 sm:$0xff] }
0x1961   : > { %v5175_v26 = vpop.f32.mrf.mxu1 }
0x1962   : > { %v5195_v16 = vadd.f32 %v5181_v32, %v8034_v60  ;;  %v5176_v58 = vadd.f32 %v6038_v14, %v5175_v26 }
0x1964   : > { %v5194_v18 = vadd.f32 %v5176_v58, %v8032_v59  ;;  %v5203_v19 = vsel %vm1171_vm1, %v5195_v16, 0.0  ;;  %v6044_v58 = vld [vmem:[%s8570_s28] ss:$0 sm:$0xff] }
0x1965   : > { %5204 = vadd.xlane.f32.xlu1 %v5203_v19 }
0x1966   : > { %v5200_v20 = vsel %vm1171_vm1, %v5194_v18, 0.0 }
0x1967   : > { %5201 = vadd.xlane.f32.xlu0 %v5200_v20 }
0x197c   : > { %v6583_v21 = vpop.f32.mrf.mxu1 }
0x197d   : > { %v5191_v23 = vadd.f32 %v6583_v21, %v6038_v14 }
0x197e   : > { %v5185_v22 = vpop.f32.mrf.mxu1 }
0x197f   : > { %v5186_v27 = vadd.f32 %v6038_v14, %v5185_v22  ;;  %v5197_v29 = vadd.f32 %v5191_v23, %v8044_v10 }
0x1981   : > { %v5196_v28 = vadd.f32 %v5186_v27, %v8040_v7  ;;  %v5209_v59 = vsel %vm1171_vm1, %v5197_v29, 0.0 }
0x1983   : > { %v5206_v30 = vsel %vm1171_vm1, %v5196_v28, 0.0 }
0x1984   : > { %5207 = vadd.xlane.f32.xlu0 %v5206_v30 }
0x1988   : > { %5210 = vadd.xlane.f32.xlu0 %v5209_v59 }
0x19ee   : > { %v5205_v60 = vpop.xlane.xlu1 %5204 }
0x19ef   : > { %v5213_v56 = vmul.f32 0.015625, %v5205_v60 }
0x19f0   : > { %v5202_v34 = vpop.xlane.xlu0 %5201 }
0x19f1   : > { %v8327_v35 = vsub.f32 %v5195_v16, %v5213_v56  ;;  %v5212_v37 = vmul.f32 0.015625, %v5202_v34 }
0x19f3   : > { %v8329_v31 = vsub.f32 %v5194_v18, %v5212_v37  ;;  %v5221_v7 = vmul.f32 %v8327_v35, %v8327_v35 }
0x19f5   : > { %v5227_v10 = vsel %vm1171_vm1, %v5221_v7, 0.0  ;;  %v5220_v36 = vmul.f32 %v8329_v31, %v8329_v31  ;;  %v5391_v7 = vld [vmem:[%s7647_s20 + $0x18] sm:$0xff] }
0x19f6   : > { %5228 = vadd.xlane.f32.xlu0 %v5227_v10  ;;  %6630 = vmatprep.subr.mxu1 %v5391_v7  ;;  %v5390_v10 = vld [vmem:[%s7647_s20 + $0x10] sm:$0xff] }
0x19f7   : > { %v5224_v38 = vsel %vm1171_vm1, %v5220_v36, 0.0  ;;  %6631 = vmatpush3.msra.mxu1 %v5391_v7  ;;  %v5389_v36 = vld [vmem:[%s7647_s20 + $0x8] sm:$0xff]  ;;  %v6052_v7 = vld [vmem:[%s1119_s30] ss:$0 sm:$0xff] }
0x19f8   : > { %5225 = vadd.xlane.f32.xlu1 %v5224_v38  ;;  %6632 = vmatprep.subr.mxu1 %v5390_v10  ;;  %v5388_v38 = vld [vmem:[%s7647_s20] sm:$0xff] }
0x19f9   : > { %6633 = vmatpush3.msra.mxu1 %v5390_v10 }
0x19fa   : > { %6634 = vmatprep.subr.mxu1 %v5389_v36 }
0x19fb   : > { %6635 = vmatpush3.msra.mxu1 %v5389_v36 }
0x19fc   : > { %6636 = vmatprep.subr.mxu1 %v5388_v38 }
0x19fd   : > { %6637 = vmatpush3.msra.mxu1 %v5388_v38 }
0x1a0d   : > { %v5208_v40 = vpop.xlane.xlu0 %5207 }
0x1a0e   : > { %v5214_v42 = vmul.f32 0.015625, %v5208_v40 }
0x1a10   : > { %v8340_v55 = vsub.f32 %v5196_v28, %v5214_v42 }
0x1a11   : > { %v5211_v43 = vpop.xlane.xlu0 %5210 }
0x1a12   : > { %v5215_v45 = vmul.f32 0.015625, %v5211_v43  ;;  %v5222_v46 = vmul.f32 %v8340_v55, %v8340_v55 }
0x1a14   : > { %v8347_v47 = vsub.f32 %v5197_v29, %v5215_v45  ;;  %v5230_v50 = vsel %vm1171_vm1, %v5222_v46, 0.0 }
0x1a15   : > { %5231 = vadd.xlane.f32.xlu1 %v5230_v50  ;;  %v6050_v50 = vld [vmem:[%s1113_s11] ss:$0 sm:$0xff] }
0x1a16   : > { %v5223_v41 = vmul.f32 %v8347_v47, %v8347_v47 }
0x1a18   : > { %v5233_v52 = vsel %vm1171_vm1, %v5223_v41, 0.0 }
0x1a19   : > { %5234 = vadd.xlane.f32.xlu0 %v5233_v52 }
0x1a7f   : > { %v5229_v17 = vpop.xlane.xlu0 %5228 }
0x1a80   : > { %v5237_v24 = vmul.f32 0.015625, %v5229_v17 }
0x1a81   : > { %v5226_v8 = vpop.xlane.xlu1 %5225 }
0x1a82   : > { %v5241_v9 = vadd.f32 1e-05, %v5237_v24  ;;  %v5236_v11 = vmul.f32 0.015625, %v5226_v8 }
0x1a84   : > { %6884 = vrsqrt.f32 %v5241_v9  ;;  %v5240_v15 = vadd.f32 1e-05, %v5236_v11 }
0x1a86   : > { %6886 = vrsqrt.f32 %v5240_v15 }
0x1a91   : > { %v6885_v12 = vpop.eup %6884 }
0x1a92   : > { %v5249_v14 = vmul.f32 %v6885_v12, %v8327_v35 }
0x1a93   : > { %v6887_v32 = vpop.eup %6886 }
0x1a94   : > { %v5248_v26 = vmul.f32 %v6887_v32, %v8329_v31  ;;  %v5259_v16 = vmul.f32 %v6043_v25, %v5249_v14 }
0x1a96   : > { %v5258_v18 = vmul.f32 %v6043_v25, %v5248_v26  ;;  %v5269_v20 = vadd.f32 %v6044_v58, %v5259_v16 }
0x1a98   : > { %v5268_v19 = vadd.f32 %v6044_v58, %v5258_v18 }
0x1a9a   : > { %6600 = vmatprep.mubr.msk.f32.mxu0 %vm1171_vm1, %v5268_v19 }
0x1a9b   : > { %6601 = vmatmul.mubr.msk.f32.vlgmr.msra.gmra.mxu0 %vm1171_vm1, %v5269_v20 }
0x1a9e   : > { %v5232_v21 = vpop.xlane.xlu1 %5231 }
0x1a9f   : > { %v5238_v22 = vmul.f32 0.015625, %v5232_v21 }
0x1aa1   : > { %v5242_v23 = vadd.f32 1e-05, %v5238_v22 }
0x1aa2   : > { %v5235_v27 = vpop.xlane.xlu0 %5234 }
0x1aa3   : > { %6888 = vrsqrt.f32 %v5242_v23  ;;  %v5239_v28 = vmul.f32 0.015625, %v5235_v27 }
0x1aa5   : > { %v5243_v29 = vadd.f32 1e-05, %v5239_v28 }
0x1aa7   : > { %6890 = vrsqrt.f32 %v5243_v29 }
0x1ab0   : > { %v6889_v30 = vpop.eup %6888 }
0x1ab1   : > { %v5250_v59 = vmul.f32 %v6889_v30, %v8340_v55 }
0x1ab3   : > { %v5260_v60 = vmul.f32 %v6043_v25, %v5250_v59 }
0x1ab4   : > { %v6891_v56 = vpop.eup %6890 }
0x1ab5   : > { %v5270_v34 = vadd.f32 %v6044_v58, %v5260_v60  ;;  %v5251_v35 = vmul.f32 %v6891_v56, %v8347_v47 }
0x1ab7   : > { %6603 = vmatprep.mubr.msk.f32.mxu0 %vm1171_vm1, %v5270_v34  ;;  %v5261_v37 = vmul.f32 %v6043_v25, %v5251_v35  ;;  %v6051_v35 = vld [vmem:[%s1116_s27] ss:$0 sm:$0xff]  ;;  %s5584_s27 = sshll.u32 %s7187_s1, 4  ;;  %s5585_s27 = int_to_ptr.vmem [resolvable:$true] %s5584_s27 }
0x1ab8   : > { %s7094_s30 = scalar_lea.vmem %s5585_s27, 512  ;;  %p7101_p1 = scmp.lt.s32.totalorder %s5585_s27, %s5585_s27 }
0x1ab9   : > { %v5271_v31 = vadd.f32 %v6044_v58, %v5261_v37  ;;  %p7095_p6 = scmp.ne.s32.totalorder %s5585_s27, %s7094_s30  ;;  %p7102_p12 = scmp.lt.s32.totalorder %s7094_s30, %s7094_s30 }
0x1abb   : > { %6604 = vmatmul.mubr.msk.f32.gmra.mxu0 %vm1171_vm1, %v5271_v31  ;;  %p7096_p7 = pnand %p7095_p6, %p6698_p13  ;;  %p7103_p2 = por %p7102_p12, %p7101_p1 }
0x1abd   : > { %p7097_p11 = pneg %p7096_p7 }
0x1abf   : > { %p7104_p3 = pnand %p7103_p2, %p7097_p11 }
0x1b5b   : > { %v6602_v40 = vpop.f32.mrf.mxu0 }
0x1b5c   : > { %v5371_v33 = vadd.f32 %v6602_v40, %v6045_v39 }
0x1b5d   : > { %v5365_v42 = vpop.f32.mrf.mxu0 }
0x1b5e   : > { %v5366_v51 = vadd.f32 %v6045_v39, %v5365_v42  ;;  %v5385_v43 = vmax.f32 %v5371_v33, 0.0 }
0x1b60   : > { %v5384_v55 = vmax.f32 %v5366_v51, 0.0 }
0x1b62   : > { %6638 = vmatprep.mubr.f32.mxu1 %v5384_v55 }
0x1b63   : > { %6639 = vmatmul.mubr.f32.vlgmr.msra.gmra.mxu1 %v5385_v43 }
0x1b7b   : > { %v6605_v44 = vpop.f32.mrf.mxu0 }
0x1b7c   : > { %v5381_v45 = vadd.f32 %v6605_v44, %v6045_v39 }
0x1b7d   : > { %v5375_v46 = vpop.f32.mrf.mxu0 }
0x1b7e   : > { %v5376_v54 = vadd.f32 %v6045_v39, %v5375_v46  ;;  %v5387_v47 = vmax.f32 %v5381_v45, 0.0 }
0x1b80   : > { %v5386_v48 = vmax.f32 %v5376_v54, 0.0 }
0x1b82   : > { %6641 = vmatprep.mubr.f32.mxu1 %v5386_v48 }
0x1b83   : > { %6642 = vmatmul.mubr.f32.gmra.mxu1 %v5387_v47 }
0x1c23   : > { %v6640_v53 = vpop.f32.mrf.mxu1 }
0x1c24   : > { %v5483_v41 = vadd.f32 %v6640_v53, %v6050_v50 }
0x1c25   : > { %v5477_v49 = vpop.f32.mrf.mxu1 }
0x1c26   : > { %v5497_v52 = vadd.f32 %v5483_v41, %v5269_v20  ;;  %v5478_v57 = vadd.f32 %v6050_v50, %v5477_v49 }
0x1c28   : > { %v5496_v61 = vadd.f32 %v5478_v57, %v5268_v19  ;;  %v5505_v62 = vsel %vm1171_vm1, %v5497_v52, 0.0 }
0x1c29   : > { %5506 = vadd.xlane.f32.xlu0 %v5505_v62 }
0x1c2a   : > { %v5502_v63 = vsel %vm1171_vm1, %v5496_v61, 0.0 }
0x1c2b   : > { %5503 = vadd.xlane.f32.xlu1 %v5502_v63 }
0x1c43   : > { %v6643_v0 = vpop.f32.mrf.mxu1 }
0x1c44   : > { %v5493_v1 = vadd.f32 %v6643_v0, %v6050_v50 }
0x1c45   : > { %v5487_v2 = vpop.f32.mrf.mxu1 }
0x1c46   : > { %v5499_v3 = vadd.f32 %v5493_v1, %v5271_v31  ;;  %v5488_v4 = vadd.f32 %v6050_v50, %v5487_v2 }
0x1c48   : > { %v5498_v5 = vadd.f32 %v5488_v4, %v5270_v34  ;;  %v5511_v6 = vsel %vm1171_vm1, %v5499_v3, 0.0 }
0x1c49   : > { %5512 = vadd.xlane.f32.xlu0 %v5511_v6 }
0x1c4a   : > { %v5508_v13 = vsel %vm1171_vm1, %v5498_v5, 0.0 }
0x1c4b   : > { %5509 = vadd.xlane.f32.xlu1 %v5508_v13 }
0x1cb2   : > { %v5507_v17 = vpop.xlane.xlu0 %5506 }
0x1cb3   : > { %v5515_v24 = vmul.f32 0.015625, %v5507_v17 }
0x1cb4   : > { %v5504_v8 = vpop.xlane.xlu1 %5503 }
0x1cb5   : > { %v5519_v9 = vsub.f32 %v5497_v52, %v5515_v24  ;;  %v5514_v11 = vmul.f32 0.015625, %v5504_v8 }
0x1cb7   : > { %v5518_v15 = vsub.f32 %v5496_v61, %v5514_v11  ;;  %v5523_v12 = vmul.f32 %v5519_v9, %v5519_v9 }
0x1cb9   : > { %v5529_v14 = vsel %vm1171_vm1, %v5523_v12, 0.0  ;;  %v5522_v25 = vmul.f32 %v5518_v15, %v5518_v15 }
0x1cba   : > { %5530 = vadd.xlane.f32.xlu0 %v5529_v14 }
0x1cbb   : > { %v5526_v32 = vsel %vm1171_vm1, %v5522_v25, 0.0 }
0x1cbc   : > { %5527 = vadd.xlane.f32.xlu1 %v5526_v32 }
0x1cd2   : > { %v5513_v26 = vpop.xlane.xlu0 %5512 }
0x1cd3   : > { %v5517_v16 = vmul.f32 0.015625, %v5513_v26 }
0x1cd4   : > { %v5510_v58 = vpop.xlane.xlu1 %5509 }
0x1cd5   : > { %v5521_v18 = vsub.f32 %v5499_v3, %v5517_v16  ;;  %v5516_v19 = vmul.f32 0.015625, %v5510_v58 }
0x1cd7   : > { %v5520_v20 = vsub.f32 %v5498_v5, %v5516_v19  ;;  %v5525_v21 = vmul.f32 %v5521_v18, %v5521_v18 }
0x1cd9   : > { %v5535_v22 = vsel %vm1171_vm1, %v5525_v21, 0.0  ;;  %v5524_v23 = vmul.f32 %v5520_v20, %v5520_v20 }
0x1cda   : > { %5536 = vadd.xlane.f32.xlu0 %v5535_v22 }
0x1cdb   : > { %v5532_v27 = vsel %vm1171_vm1, %v5524_v23, 0.0 }
0x1cdc   : > { %5533 = vadd.xlane.f32.xlu1 %v5532_v27 }
0x1d43   : > { %v5531_v28 = vpop.xlane.xlu0 %5530 }
0x1d44   : > { %v5539_v29 = vmul.f32 0.015625, %v5531_v28 }
0x1d45   : > { %v5528_v30 = vpop.xlane.xlu1 %5527 }
0x1d46   : > { %v5543_v59 = vadd.f32 1e-05, %v5539_v29  ;;  %v5538_v60 = vmul.f32 0.015625, %v5528_v30 }
0x1d48   : > { %6892 = vrsqrt.f32 %v5543_v59  ;;  %v5542_v56 = vadd.f32 1e-05, %v5538_v60 }
0x1d4a   : > { %6894 = vrsqrt.f32 %v5542_v56 }
0x1d55   : > { %v6893_v34 = vpop.eup %6892 }
0x1d56   : > { %v5551_v37 = vmul.f32 %v6893_v34, %v5519_v9 }
0x1d57   : > { %v6895_v31 = vpop.eup %6894 }
0x1d58   : > { %v5561_v10 = vmul.f32 %v6051_v35, %v5551_v37  ;;  %v5550_v36 = vmul.f32 %v6895_v31, %v5518_v15 }
0x1d5a   : > { %v5571_v38 = vadd.f32 %v6052_v7, %v5561_v10  ;;  %v5560_v39 = vmul.f32 %v6051_v35, %v5550_v36 }
0x1d5c   : > { %5575 = vst.msk [vmem:[#allocation15 + $0x8] sm:$0xff] %vm1171_vm1, %v5571_v38  ;;  %v5570_v40 = vadd.f32 %v6052_v7, %v5560_v39 }
0x1d5e   : > { %5574 = vst.msk [vmem:[#allocation15] sm:$0xff] %vm1171_vm1, %v5570_v40 }
0x1d63   : > { %v5537_v33 = vpop.xlane.xlu0 %5536 }
0x1d64   : > { %v5541_v42 = vmul.f32 0.015625, %v5537_v33 }
0x1d65   : > { %v5534_v51 = vpop.xlane.xlu1 %5533 }
0x1d66   : > { %v5545_v55 = vadd.f32 1e-05, %v5541_v42  ;;  %v5540_v43 = vmul.f32 0.015625, %v5534_v51 }
0x1d68   : > { %6896 = vrsqrt.f32 %v5545_v55  ;;  %v5544_v44 = vadd.f32 1e-05, %v5540_v43 }
0x1d6a   : > { %6898 = vrsqrt.f32 %v5544_v44 }
0x1d75   : > { %v6897_v45 = vpop.eup %6896 }
0x1d76   : > { %v5553_v46 = vmul.f32 %v6897_v45, %v5521_v18 }
0x1d77   : > { %v6899_v54 = vpop.eup %6898 }
0x1d78   : > { %v5563_v48 = vmul.f32 %v6051_v35, %v5553_v46  ;;  %v5552_v47 = vmul.f32 %v6899_v54, %v5520_v20 }
0x1d7a   : > { %v5573_v50 = vadd.f32 %v6052_v7, %v5563_v48  ;;  %v5562_v53 = vmul.f32 %v6051_v35, %v5552_v47 }
0x1d7c   : > { %5577 = vst.msk [vmem:[#allocation15 + $0x18] sm:$0xff] %vm1171_vm1, %v5573_v50  ;;  %v5572_v41 = vadd.f32 %v6052_v7, %v5562_v53 }
0x1d7e   : > { %5576 = vst.msk [vmem:[#allocation15 + $0x10] sm:$0xff] %vm1171_vm1, %v5572_v41 }
0x1d7f   : > { %7107 = shalt.err (!%p7104_p3)
}
0x1d80   : > { %s7188_s10 = smov 128   ;;  %s7189_s14 = smov 8  }
0x1d81   : > { %s8575_s4 = sld [smem:[#allocation48_spill]] }
0x1d87   : > { %6665 = dma.vmem_to_hbm [thread:$0]  (%p6698_p13), %s5585_s27, 512, %s8575_s4, [#allocation5], %s7188_s10, %s7188_s10, %s7189_s14  }
0x1d88   : > { %7151 = dma.done.wait (%p6698_p13), [#allocation5], 512  }
0x1d89   : > { %7153 = vsyncadd (%p6698_p13), [#allocation5], 4294966784 }
0x1d8a PF: > { %s8576_s25 = sld [smem:[#allocation23_spill]] }
0x1d8b   : > { %s8577_s4 = sld [smem:[#allocation21_spill]] }
0x1d8c   : > { %s8578_s30 = sld [smem:[#allocation22_spill]] }
0x1d8d   : > { %s8579_s24 = sld [smem:[#allocation24_spill]] }
0x1d90   : > { %p39_p5 = scmp.ge.s32.totalorder %s8576_s25, 4  }
0x1d92   :  { %41 = sbr.rel (!%p39_p5) target bundleno = 31 (0x1f), region = 264 }
0x1d97   :  { %5600 = vsyncpa [#allocation4], 1 }
0x1d98   :  { %5602 = vsyncpa [#allocation4 + $0x1], 1 }
0x1d99   :  { %5603 = vsyncpa [#allocation7], 1 }
0x1d9a   :  { %5604 = vsyncpa [#allocation10], 1 }
0x1d9b   :  { %5606 = vsyncpa [#allocation10 + $0x1], 1 }
0x1d9c   :  { %5607 = vsyncpa [#allocation13], 1 }
0x1d9d   :  { %5609 = vsyncpa [#allocation13 + $0x1], 1 }
0x1d9e   :  { %5610 = vsyncpa [#allocation5], 1 }
0x1d9f   :  { %5612 = vsyncpa [#allocation5 + $0x1], 1 }

</bundles_post_ra>
